<compile_context>
chip_gen: v7x
topology: tpu7x:2x2x1
jax: 0.10.0
libtpu: 0.0.40
codegen_flags: <defaults>
</compile_context>

<pallas_src>
import functools

import jax
import jax.numpy as jnp
from jax import lax
from jax.experimental import pallas as pl
from jax.experimental.pallas import tpu as pltpu

F32 = jnp.float32
NEG = -1e30      # python float (a jnp scalar here would be a captured constant)
EPS = 1e-16
LANE = 128

_VMEM = pl.BlockSpec(memory_space=pltpu.MemorySpace.VMEM)

# (name, in_channels, out_channels) for the four MPL layers
_CONVS = (("c1", 1, 4), ("c2", 4, 8), ("c3", 8, 8), ("c4", 8, 16))


def _dot(a, b):
    return jnp.dot(a, b, preferred_element_type=jnp.float32)


def _dot_nt(a, b):
    # a [M, K] contracted with b [Q, K] over K -> [M, Q]; the MXU consumes the
    # transposed RHS natively, so no explicit transpose is materialized.
    return lax.dot_general(a, b, (((1,), (1,)), ((), ())),
                           preferred_element_type=jnp.float32)


# ---------------------------------------------------------------------------
# Parameter packing: every weight/bias goes into one [R, 128] f32 slab.
# layout[name] = (row_offset, rows, cols) with static Python ints; each entry
# is padded to an 8-row boundary so every slice starts sublane-aligned.
# ---------------------------------------------------------------------------
def pack_params(params):
    pieces = []
    layout = {}
    row = 0

    def add(name, arr):
        nonlocal row
        arr = jnp.asarray(arr, F32)
        r, c = arr.shape
        layout[name] = (row, r, c)
        pad_r = (-r) % 8
        arr = jnp.pad(arr, ((0, pad_r), (0, LANE - c)))
        pieces.append(arr)
        row += r + pad_r

    for name, cin, cout in _CONVS:
        p = params["conv" + name[1]]
        (W1, b1), (W2, b2) = p["mlp1"], p["mlp2"]
        (W3, b3), (W4, b4) = p["mlp3"], p["mlp4"]
        (W5, b5), (W6, b6) = p["mlp5"], p["mlp6"]
        (W7, b7) = p["mlp7"]
        (We1, be1), (We2, be2) = p["edge1"], p["edge2"]

        # mlp1 acts on cat([x_i, x_j - x_i, e_feat]); split its rows so the
        # kernel never concatenates:
        #   cat(...) @ W1 = x_i @ (W1a - W1b) + x_j @ W1b + ef @ W1c
        W1a, W1b, W1c = W1[:cin], W1[cin:2 * cin], W1[2 * cin:]

        # Merged message weights (cols [:cout] -> mlp1 message, cols [cout:]
        # -> mlp5 attention on x_i):   pre = x_i@Wim + x_j@Wjm + ef@Wem + bm
        Wim = jnp.zeros((cin, cout + 16), F32)
        Wim = Wim.at[:, :cout].set(W1a - W1b)
        Wim = Wim.at[:, cout:].set(W5)
        Wjm = jnp.zeros((cin, cout + 16), F32).at[:, :cout].set(W1b)
        Wem = jnp.zeros((16, cout + 16), F32).at[:, :cout].set(W1c)
        bm = jnp.concatenate([b1, b5], axis=1)

        # Merged gate weights (col 0 = mlp3 scales msg, col 1 = mlp4 scales x),
        # split by input so cat([x, msg]) is never formed:
        #   gates = sigmoid(xr @ W34x + agg @ W34m + b34)
        W34x = jnp.concatenate([W3[:cout], W4[:cout]], axis=1)
        W34m = jnp.concatenate([W3[cout:], W4[cout:]], axis=1)
        b34 = jnp.concatenate([b3, b4], axis=1)

        add(name + "_We1", We1); add(name + "_be1", be1)
        add(name + "_We2", We2); add(name + "_be2", be2)
        add(name + "_Wim", Wim); add(name + "_Wjm", Wjm)
        add(name + "_Wem", Wem); add(name + "_bm", bm)
        add(name + "_W2", W2);   add(name + "_b2", b2)
        add(name + "_W34x", W34x); add(name + "_W34m", W34m)
        add(name + "_b34", b34)
        add(name + "_W6", W6);   add(name + "_b6", b6)
        add(name + "_W7", W7);   add(name + "_b7", b7)

    add("p1_Wg", params["pool1"][0]); add("p1_bg", params["pool1"][1])
    add("p2_Wg", params["pool2"][0]); add("p2_bg", params["pool2"][1])

    # lin1 acts on cat([x1, x2]); split its rows (8 for x1, 16 for x2).
    W_lin1, b_lin1 = params["lin1"]
    add("lin1_Wa", W_lin1[:8]); add("lin1_Wb", W_lin1[8:]); add("lin1_b", b_lin1)
    for ln in ("lin2", "lin3", "lin4"):
        add(ln + "_W", params[ln][0]); add(ln + "_b", params[ln][1])

    slab = jnp.concatenate(pieces, axis=0)   # rows already a multiple of 8
    return slab, layout


# ---------------------------------------------------------------------------
# Fused forward kernel (single block; everything stays in VMEM).
# ---------------------------------------------------------------------------
def make_kernel(layout):
    def kernel(x_ref, ea_ref, gsrc_ref, gdst_ref, bmat_ref, w_ref, out_ref):
        def get(name):
            off, r, c = layout[name]           # static Python ints, 8-aligned off
            return w_ref[off:off + r, :c]

        ea = ea_ref[...]                       # [E, 3]
        gsrc = gsrc_ref[...]                   # [E, N] one-hot of edge_index[0]
        gdst = gdst_ref[...]                   # [E, N] one-hot of edge_index[1]
        bmat = bmat_ref[...]                   # [N, B]
        ssrc = gsrc.T                          # [N, E] (segment-sum over source)
        sdst = gdst.T                          # [N, E] (scatter-add into target)
        bsel = bmat.T                          # [B, N]

        def mpl(name, x, cout):
            # edge_mlp: Linear -> ReLU -> Linear
            eh = jnp.maximum(_dot(ea, get(name + "_We1")) + get(name + "_be1"), 0.0)
            ef = _dot(eh, get(name + "_We2")) + get(name + "_be2")    # [E, 16]

            x_i = _dot(gdst, x)                # [E, cin]  target endpoint
            x_j = _dot(gsrc, x)                # [E, cin]  source endpoint

            # merged mlp1 (message) + mlp5 (x_i attention), concat-free
            pre = (_dot(x_i, get(name + "_Wim"))
                   + _dot(x_j, get(name + "_Wjm"))
                   + _dot(ef, get(name + "_Wem"))
                   + get(name + "_bm"))                               # [E, cout+16]
            msg = jnp.maximum(pre[:, :cout], 0.0)                     # [E, cout]
            a1 = jnp.tanh(pre[:, cout:])                              # [E, 16]
            a2 = jnp.tanh(_dot(msg, get(name + "_W6")) + get(name + "_b6"))
            w = _dot(a1 * a2, get(name + "_W7")) + get(name + "_b7")  # [E, 1]

            # segment softmax over edges grouped by source node (edge_index[0])
            grp = jnp.where(gsrc > 0.0, w, NEG)                       # [E, N]
            gmax = jnp.max(grp, axis=0, keepdims=True)                # [1, N]
            max_e = _dot_nt(gsrc, gmax)                               # [E, 1]
            expw = jnp.exp(w - max_e)
            denom_e = _dot(gsrc, _dot(ssrc, expw)) + EPS              # [E, 1]
            alpha = expw * pl.reciprocal(denom_e, approx=True)

            # aggregate weighted messages into target nodes (aggr='add')
            agg = _dot(sdst, msg * alpha)                             # [N, cout]

            # node update with merged sigmoid gates (mlp3 | mlp4), concat-free
            xr = jnp.maximum(_dot(x, get(name + "_W2")) + get(name + "_b2"), 0.0)
            gates = jax.nn.sigmoid(
                _dot(xr, get(name + "_W34x")) + _dot(agg, get(name + "_W34m"))
                + get(name + "_b34"))                                 # [N, 2]
            out = gates[:, 0:1] * agg + gates[:, 1:2] * xr
            return jnp.maximum(out, 0.0)       # outer F.relu in MODEL_GNN

        def pool(name, x):
            score = _dot(x, get(name + "_Wg")) + get(name + "_bg")    # [N, 1]
            grp = jnp.where(bmat > 0.0, score, NEG)                   # [N, B]
            gmax = jnp.max(grp, axis=0, keepdims=True)                # [1, B]
            max_n = _dot_nt(bmat, gmax)                               # [N, 1]
            exps = jnp.exp(score - max_n)
            denom_n = _dot(bmat, _dot(bsel, exps)) + EPS              # [N, 1]
            gate = exps * pl.reciprocal(denom_n, approx=True)
            return _dot(bsel, gate * x)                               # [B, C]

        h = mpl("c1", x_ref[...], 4)
        h = mpl("c2", h, 8)
        x1 = pool("p1", h)                                            # [B, 8]
        h = mpl("c3", h, 8)
        h = mpl("c4", h, 16)
        x2 = pool("p2", h)                                            # [B, 16]

        # MLP head; lin1 split so cat([x1, x2]) is never materialized.
        hg = jnp.maximum(_dot(x1, get("lin1_Wa")) + _dot(x2, get("lin1_Wb"))
                         + get("lin1_b"), 0.0)
        hg = jnp.maximum(_dot(hg, get("lin2_W")) + get("lin2_b"), 0.0)
        hg = jnp.maximum(_dot(hg, get("lin3_W")) + get("lin3_b"), 0.0)
        out_ref[...] = _dot(hg, get("lin4_W")) + get("lin4_b")        # [B, 1]

    return kernel


# ---------------------------------------------------------------------------
# Host wrapper: one fused pallas_call for the whole forward pass.
# ---------------------------------------------------------------------------
@functools.partial(jax.jit, static_argnames=("num_graphs",))
def model_gnn_forward(params, x, edge_index, edge_attr, batch, num_graphs):
    n = x.shape[0]
    b = int(num_graphs)
    gsrc = jax.nn.one_hot(edge_index[0], n, dtype=F32)     # [E, N]
    gdst = jax.nn.one_hot(edge_index[1], n, dtype=F32)     # [E, N]
    bmat = jax.nn.one_hot(batch, b, dtype=F32)             # [N, B]

    slab, layout = pack_params(params)
    out = pl.pallas_call(
        make_kernel(layout),
        out_shape=jax.ShapeDtypeStruct((b, 1), F32),
        in_specs=[_VMEM] * 6,
        out_specs=_VMEM,
    )(x, edge_attr, gsrc, gdst, bmat, slab)
    return out[:, 0]                                        # squeeze(1)


# ---------------------------------------------------------------------------
# Parameter init (deterministic, PyTorch-Linear-like uniform(-1/sqrt(fan_in)))
# ---------------------------------------------------------------------------
def linear_init(key, fin, fout):
    k = 1.0 / float(fin) ** 0.5
    kw, kb = jax.random.split(key)
    w = jax.random.uniform(kw, (fin, fout), F32, -k, k)
    b = jax.random.uniform(kb, (1, fout), F32, -k, k)
    return w, b


def mpl_init(key, cin, cout, edge_attr_dim=3, edge_hidden=16):
    ks = jax.random.split(key, 9)
    return {
        "mlp1": linear_init(ks[0], 2 * cin + edge_hidden, cout),
        "mlp2": linear_init(ks[1], cin, cout),
        "mlp3": linear_init(ks[2], 2 * cout, 1),
        "mlp4": linear_init(ks[3], 2 * cout, 1),
        "mlp5": linear_init(ks[4], cin, 16),
        "mlp6": linear_init(ks[5], cout, 16),
        "mlp7": linear_init(ks[6], 16, 1),
        "edge1": linear_init(ks[7], edge_attr_dim, edge_hidden),
        "edge2": linear_init(ks[8], edge_hidden, edge_hidden),
    }


def model_init(key):
    ks = jax.random.split(key, 10)
    return {
        "conv1": mpl_init(ks[0], 1, 4),
        "conv2": mpl_init(ks[1], 4, 8),
        "conv3": mpl_init(ks[2], 8, 8),
        "conv4": mpl_init(ks[3], 8, 16),
        "pool1": linear_init(ks[4], 8, 1),
        "pool2": linear_init(ks[5], 16, 1),
        "lin1": linear_init(ks[6], 24, 32),
        "lin2": linear_init(ks[7], 32, 16),
        "lin3": linear_init(ks[8], 16, 16),
        "lin4": linear_init(ks[9], 16, 1),
    }


if __name__ == "__main__":
    key = jax.random.PRNGKey(0)
    k_param, k_x, k_e, k_a = jax.random.split(key, 4)

    num_graphs = 2
    nodes_per_graph = 8
    edges_per_graph = 16
    N = num_graphs * nodes_per_graph
    E = num_graphs * edges_per_graph

    # node features [N, 1]
    x = jax.random.normal(k_x, (N, 1), dtype=F32)

    # edges kept inside each graph
    ek = jax.random.split(k_e, num_graphs)
    cols = []
    for g in range(num_graphs):
        eg = jax.random.randint(ek[g], (2, edges_per_graph), 0, nodes_per_graph)
        cols.append(eg + g * nodes_per_graph)
    edge_index = jnp.concatenate(cols, axis=1).astype(jnp.int32)   # [2, E]

    edge_attr = jax.random.normal(k_a, (E, 3), dtype=F32)
    batch = jnp.repeat(jnp.arange(num_graphs, dtype=jnp.int32), nodes_per_graph)

    params = model_init(k_param)
    out = model_gnn_forward(params, x, edge_index, edge_attr, batch,
                            num_graphs=num_graphs)
    out = jax.block_until_ready(out)
    assert out.shape == (num_graphs,)
    print("KERNEL_OK")
</pallas_src>

<mosaic_0001>
module attributes {stable_mosaic.version = 11 : i64} {
  func.func @kernel(%arg0: memref<16x1xf32, #tpu.memory_space<vmem>>, %arg1: memref<32x3xf32, #tpu.memory_space<vmem>>, %arg2: memref<32x16xf32, #tpu.memory_space<vmem>>, %arg3: memref<32x16xf32, #tpu.memory_space<vmem>>, %arg4: memref<16x2xf32, #tpu.memory_space<vmem>>, %arg5: memref<824x128xf32, #tpu.memory_space<vmem>>, %arg6: memref<2x1xf32, #tpu.memory_space<vmem>>) attributes {dimension_semantics = [], scalar_prefetch = 0 : i64, scratch_operands = 0 : i64, tpu.core_type = #tpu.core_type<tc>} {
    %c0 = arith.constant 0 : index
    %c0_0 = arith.constant 0 : index
    %0 = vector.load %arg1[%c0, %c0_0] : memref<32x3xf32, #tpu.memory_space<vmem>>, vector<32x3xf32>
    %c0_1 = arith.constant 0 : index
    %c0_2 = arith.constant 0 : index
    %1 = vector.load %arg2[%c0_1, %c0_2] : memref<32x16xf32, #tpu.memory_space<vmem>>, vector<32x16xf32>
    %c0_3 = arith.constant 0 : index
    %c0_4 = arith.constant 0 : index
    %2 = vector.load %arg3[%c0_3, %c0_4] : memref<32x16xf32, #tpu.memory_space<vmem>>, vector<32x16xf32>
    %c0_5 = arith.constant 0 : index
    %c0_6 = arith.constant 0 : index
    %3 = vector.load %arg4[%c0_5, %c0_6] : memref<16x2xf32, #tpu.memory_space<vmem>>, vector<16x2xf32>
    %4 = tpu.transpose %1, [1, 0] : vector<32x16xf32> -> vector<16x32xf32>
    %5 = tpu.transpose %2, [1, 0] : vector<32x16xf32> -> vector<16x32xf32>
    %6 = tpu.transpose %3, [1, 0] : vector<16x2xf32> -> vector<2x16xf32>
    %c0_7 = arith.constant 0 : index
    %c0_8 = arith.constant 0 : index
    %7 = vector.load %arg0[%c0_7, %c0_8] : memref<16x1xf32, #tpu.memory_space<vmem>>, vector<16x1xf32>
    %c0_9 = arith.constant 0 : index
    %c0_10 = arith.constant 0 : index
    %8 = vector.load %arg5[%c0_9, %c0_10] : memref<824x128xf32, #tpu.memory_space<vmem>>, vector<3x16xf32>
    %cst = arith.constant dense<0.000000e+00> : vector<32x16xf32>
    %9 = tpu.matmul %0, %8, %cst {dimension_numbers = #tpu.dot_dimension_numbers<[1], [0], [0], [1], [0, 0, 1, 1], [], []>} : vector<32x3xf32>, vector<3x16xf32>, vector<32x16xf32> -> vector<32x16xf32>
    %c8 = arith.constant 8 : index
    %c0_11 = arith.constant 0 : index
    %10 = vector.load %arg5[%c8, %c0_11] : memref<824x128xf32, #tpu.memory_space<vmem>>, vector<1x16xf32>
    %11 = vector.broadcast %10 : vector<1x16xf32> to vector<32x16xf32>
    %12 = arith.addf %9, %11 : vector<32x16xf32>
    %cst_12 = arith.constant 0.000000e+00 : f32
    %13 = vector.broadcast %cst_12 : f32 to vector<32x16xf32>
    %14 = arith.maximumf %12, %13 : vector<32x16xf32>
    %c16 = arith.constant 16 : index
    %c0_13 = arith.constant 0 : index
    %15 = vector.load %arg5[%c16, %c0_13] : memref<824x128xf32, #tpu.memory_space<vmem>>, vector<16x16xf32>
    %cst_14 = arith.constant dense<0.000000e+00> : vector<32x16xf32>
    %16 = tpu.matmul %14, %15, %cst_14 {dimension_numbers = #tpu.dot_dimension_numbers<[1], [0], [0], [1], [0, 0, 1, 1], [], []>} : vector<32x16xf32>, vector<16x16xf32>, vector<32x16xf32> -> vector<32x16xf32>
    %c32 = arith.constant 32 : index
    %c0_15 = arith.constant 0 : index
    %17 = vector.load %arg5[%c32, %c0_15] : memref<824x128xf32, #tpu.memory_space<vmem>>, vector<1x16xf32>
    %18 = vector.broadcast %17 : vector<1x16xf32> to vector<32x16xf32>
    %19 = arith.addf %16, %18 : vector<32x16xf32>
    %cst_16 = arith.constant dense<0.000000e+00> : vector<32x1xf32>
    %20 = tpu.matmul %2, %7, %cst_16 {dimension_numbers = #tpu.dot_dimension_numbers<[1], [0], [0], [1], [0, 0, 1, 1], [], []>} : vector<32x16xf32>, vector<16x1xf32>, vector<32x1xf32> -> vector<32x1xf32>
    %cst_17 = arith.constant dense<0.000000e+00> : vector<32x1xf32>
    %21 = tpu.matmul %1, %7, %cst_17 {dimension_numbers = #tpu.dot_dimension_numbers<[1], [0], [0], [1], [0, 0, 1, 1], [], []>} : vector<32x16xf32>, vector<16x1xf32>, vector<32x1xf32> -> vector<32x1xf32>
    %c40 = arith.constant 40 : index
    %c0_18 = arith.constant 0 : index
    %22 = vector.load %arg5[%c40, %c0_18] : memref<824x128xf32, #tpu.memory_space<vmem>>, vector<1x20xf32>
    %cst_19 = arith.constant dense<0.000000e+00> : vector<32x20xf32>
    %23 = tpu.matmul %20, %22, %cst_19 {dimension_numbers = #tpu.dot_dimension_numbers<[1], [0], [0], [1], [0, 0, 1, 1], [], []>} : vector<32x1xf32>, vector<1x20xf32>, vector<32x20xf32> -> vector<32x20xf32>
    %c48 = arith.constant 48 : index
    %c0_20 = arith.constant 0 : index
    %24 = vector.load %arg5[%c48, %c0_20] : memref<824x128xf32, #tpu.memory_space<vmem>>, vector<1x20xf32>
    %cst_21 = arith.constant dense<0.000000e+00> : vector<32x20xf32>
    %25 = tpu.matmul %21, %24, %cst_21 {dimension_numbers = #tpu.dot_dimension_numbers<[1], [0], [0], [1], [0, 0, 1, 1], [], []>} : vector<32x1xf32>, vector<1x20xf32>, vector<32x20xf32> -> vector<32x20xf32>
    %26 = arith.addf %23, %25 : vector<32x20xf32>
    %c56 = arith.constant 56 : index
    %c0_22 = arith.constant 0 : index
    %27 = vector.load %arg5[%c56, %c0_22] : memref<824x128xf32, #tpu.memory_space<vmem>>, vector<16x20xf32>
    %cst_23 = arith.constant dense<0.000000e+00> : vector<32x20xf32>
    %28 = tpu.matmul %19, %27, %cst_23 {dimension_numbers = #tpu.dot_dimension_numbers<[1], [0], [0], [1], [0, 0, 1, 1], [], []>} : vector<32x16xf32>, vector<16x20xf32>, vector<32x20xf32> -> vector<32x20xf32>
    %29 = arith.addf %26, %28 : vector<32x20xf32>
    %c72 = arith.constant 72 : index
    %c0_24 = arith.constant 0 : index
    %30 = vector.load %arg5[%c72, %c0_24] : memref<824x128xf32, #tpu.memory_space<vmem>>, vector<1x20xf32>
    %31 = vector.broadcast %30 : vector<1x20xf32> to vector<32x20xf32>
    %32 = arith.addf %29, %31 : vector<32x20xf32>
    %33 = vector.extract_strided_slice %32 {offsets = [0, 0], sizes = [32, 4], strides = [1, 1]} : vector<32x20xf32> to vector<32x4xf32>
    %cst_25 = arith.constant 0.000000e+00 : f32
    %34 = vector.broadcast %cst_25 : f32 to vector<32x4xf32>
    %35 = arith.maximumf %33, %34 : vector<32x4xf32>
    %36 = vector.extract_strided_slice %32 {offsets = [0, 4], sizes = [32, 16], strides = [1, 1]} : vector<32x20xf32> to vector<32x16xf32>
    %37 = math.tanh %36 : vector<32x16xf32>
    %c120 = arith.constant 120 : index
    %c0_26 = arith.constant 0 : index
    %38 = vector.load %arg5[%c120, %c0_26] : memref<824x128xf32, #tpu.memory_space<vmem>>, vector<4x16xf32>
    %cst_27 = arith.constant dense<0.000000e+00> : vector<32x16xf32>
    %39 = tpu.matmul %35, %38, %cst_27 {dimension_numbers = #tpu.dot_dimension_numbers<[1], [0], [0], [1], [0, 0, 1, 1], [], []>} : vector<32x4xf32>, vector<4x16xf32>, vector<32x16xf32> -> vector<32x16xf32>
    %c128 = arith.constant 128 : index
    %c0_28 = arith.constant 0 : index
    %40 = vector.load %arg5[%c128, %c0_28] : memref<824x128xf32, #tpu.memory_space<vmem>>, vector<1x16xf32>
    %41 = vector.broadcast %40 : vector<1x16xf32> to vector<32x16xf32>
    %42 = arith.addf %39, %41 : vector<32x16xf32>
    %43 = math.tanh %42 : vector<32x16xf32>
    %44 = arith.mulf %37, %43 : vector<32x16xf32>
    %c136 = arith.constant 136 : index
    %c0_29 = arith.constant 0 : index
    %45 = vector.load %arg5[%c136, %c0_29] : memref<824x128xf32, #tpu.memory_space<vmem>>, vector<16x1xf32>
    %cst_30 = arith.constant dense<0.000000e+00> : vector<32x1xf32>
    %46 = tpu.matmul %44, %45, %cst_30 {dimension_numbers = #tpu.dot_dimension_numbers<[1], [0], [0], [1], [0, 0, 1, 1], [], []>} : vector<32x16xf32>, vector<16x1xf32>, vector<32x1xf32> -> vector<32x1xf32>
    %c152 = arith.constant 152 : index
    %c0_31 = arith.constant 0 : index
    %47 = vector.load %arg5[%c152, %c0_31] : memref<824x128xf32, #tpu.memory_space<vmem>>, vector<1x1xf32>
    %48 = vector.broadcast %47 : vector<1x1xf32> to vector<32x1xf32>
    %49 = arith.addf %46, %48 : vector<32x1xf32>
    %cst_32 = arith.constant 0.000000e+00 : f32
    %50 = vector.broadcast %cst_32 : f32 to vector<32x16xf32>
    %51 = arith.cmpf ogt, %1, %50 : vector<32x16xf32>
    %cst_33 = arith.constant -1.000000e+30 : f32
    %52 = vector.shape_cast %49 : vector<32x1xf32> to vector<32x1xf32>
    %53 = vector.broadcast %52 : vector<32x1xf32> to vector<32x16xf32>
    %54 = vector.broadcast %cst_33 : f32 to vector<32x16xf32>
    %55 = arith.select %51, %53, %54 : vector<32x16xi1>, vector<32x16xf32>
    %cst_34 = arith.constant dense<0xFF800000> : vector<16xf32>
    %56 = vector.multi_reduction <maximumf>, %55, %cst_34 [0] : vector<32x16xf32> to vector<16xf32>
    %57 = vector.shape_cast %56 : vector<16xf32> to vector<1x16xf32>
    %cst_35 = arith.constant dense<0.000000e+00> : vector<32x1xf32>
    %58 = tpu.matmul %1, %57, %cst_35 {dimension_numbers = #tpu.dot_dimension_numbers<[1], [1], [0], [0], [0, 0, 1, 0], [], []>} : vector<32x16xf32>, vector<1x16xf32>, vector<32x1xf32> -> vector<32x1xf32>
    %59 = arith.subf %49, %58 : vector<32x1xf32>
    %60 = math.exp %59 : vector<32x1xf32>
    %cst_36 = arith.constant dense<0.000000e+00> : vector<16x1xf32>
    %61 = tpu.matmul %4, %60, %cst_36 {dimension_numbers = #tpu.dot_dimension_numbers<[1], [0], [0], [1], [0, 0, 1, 1], [], []>} : vector<16x32xf32>, vector<32x1xf32>, vector<16x1xf32> -> vector<16x1xf32>
    %cst_37 = arith.constant dense<0.000000e+00> : vector<32x1xf32>
    %62 = tpu.matmul %1, %61, %cst_37 {dimension_numbers = #tpu.dot_dimension_numbers<[1], [0], [0], [1], [0, 0, 1, 1], [], []>} : vector<32x16xf32>, vector<16x1xf32>, vector<32x1xf32> -> vector<32x1xf32>
    %cst_38 = arith.constant 1.000000e-16 : f32
    %63 = vector.broadcast %cst_38 : f32 to vector<32x1xf32>
    %64 = arith.addf %62, %63 : vector<32x1xf32>
    %65 = tpu.reciprocal %64 {approx = true} : vector<32x1xf32> -> vector<32x1xf32>
    %66 = arith.mulf %60, %65 : vector<32x1xf32>
    %67 = vector.broadcast %66 : vector<32x1xf32> to vector<32x4xf32>
    %68 = arith.mulf %35, %67 : vector<32x4xf32>
    %cst_39 = arith.constant dense<0.000000e+00> : vector<16x4xf32>
    %69 = tpu.matmul %5, %68, %cst_39 {dimension_numbers = #tpu.dot_dimension_numbers<[1], [0], [0], [1], [0, 0, 1, 1], [], []>} : vector<16x32xf32>, vector<32x4xf32>, vector<16x4xf32> -> vector<16x4xf32>
    %c80 = arith.constant 80 : index
    %c0_40 = arith.constant 0 : index
    %70 = vector.load %arg5[%c80, %c0_40] : memref<824x128xf32, #tpu.memory_space<vmem>>, vector<1x4xf32>
    %cst_41 = arith.constant dense<0.000000e+00> : vector<16x4xf32>
    %71 = tpu.matmul %7, %70, %cst_41 {dimension_numbers = #tpu.dot_dimension_numbers<[1], [0], [0], [1], [0, 0, 1, 1], [], []>} : vector<16x1xf32>, vector<1x4xf32>, vector<16x4xf32> -> vector<16x4xf32>
    %c88 = arith.constant 88 : index
    %c0_42 = arith.constant 0 : index
    %72 = vector.load %arg5[%c88, %c0_42] : memref<824x128xf32, #tpu.memory_space<vmem>>, vector<1x4xf32>
    %73 = vector.broadcast %72 : vector<1x4xf32> to vector<16x4xf32>
    %74 = arith.addf %71, %73 : vector<16x4xf32>
    %cst_43 = arith.constant 0.000000e+00 : f32
    %75 = vector.broadcast %cst_43 : f32 to vector<16x4xf32>
    %76 = arith.maximumf %74, %75 : vector<16x4xf32>
    %c96 = arith.constant 96 : index
    %c0_44 = arith.constant 0 : index
    %77 = vector.load %arg5[%c96, %c0_44] : memref<824x128xf32, #tpu.memory_space<vmem>>, vector<4x2xf32>
    %cst_45 = arith.constant dense<0.000000e+00> : vector<16x2xf32>
    %78 = tpu.matmul %76, %77, %cst_45 {dimension_numbers = #tpu.dot_dimension_numbers<[1], [0], [0], [1], [0, 0, 1, 1], [], []>} : vector<16x4xf32>, vector<4x2xf32>, vector<16x2xf32> -> vector<16x2xf32>
    %c104 = arith.constant 104 : index
    %c0_46 = arith.constant 0 : index
    %79 = vector.load %arg5[%c104, %c0_46] : memref<824x128xf32, #tpu.memory_space<vmem>>, vector<4x2xf32>
    %cst_47 = arith.constant dense<0.000000e+00> : vector<16x2xf32>
    %80 = tpu.matmul %69, %79, %cst_47 {dimension_numbers = #tpu.dot_dimension_numbers<[1], [0], [0], [1], [0, 0, 1, 1], [], []>} : vector<16x4xf32>, vector<4x2xf32>, vector<16x2xf32> -> vector<16x2xf32>
    %81 = arith.addf %78, %80 : vector<16x2xf32>
    %c112 = arith.constant 112 : index
    %c0_48 = arith.constant 0 : index
    %82 = vector.load %arg5[%c112, %c0_48] : memref<824x128xf32, #tpu.memory_space<vmem>>, vector<1x2xf32>
    %83 = vector.broadcast %82 : vector<1x2xf32> to vector<16x2xf32>
    %84 = arith.addf %81, %83 : vector<16x2xf32>
    %85 = arith.negf %84 : vector<16x2xf32>
    %86 = math.exp %85 : vector<16x2xf32>
    %cst_49 = arith.constant 1.000000e+00 : f32
    %87 = vector.broadcast %cst_49 : f32 to vector<16x2xf32>
    %88 = arith.addf %87, %86 : vector<16x2xf32>
    %89 = arith.divf %87, %88 : vector<16x2xf32>
    %90 = vector.extract_strided_slice %89 {offsets = [0, 0], sizes = [16, 1], strides = [1, 1]} : vector<16x2xf32> to vector<16x1xf32>
    %91 = vector.broadcast %90 : vector<16x1xf32> to vector<16x4xf32>
    %92 = arith.mulf %91, %69 : vector<16x4xf32>
    %93 = vector.extract_strided_slice %89 {offsets = [0, 1], sizes = [16, 1], strides = [1, 1]} : vector<16x2xf32> to vector<16x1xf32>
    %94 = vector.broadcast %93 : vector<16x1xf32> to vector<16x4xf32>
    %95 = arith.mulf %94, %76 : vector<16x4xf32>
    %96 = arith.addf %92, %95 : vector<16x4xf32>
    %cst_50 = arith.constant 0.000000e+00 : f32
    %97 = vector.broadcast %cst_50 : f32 to vector<16x4xf32>
    %98 = arith.maximumf %96, %97 : vector<16x4xf32>
    %c160 = arith.constant 160 : index
    %c0_51 = arith.constant 0 : index
    %99 = vector.load %arg5[%c160, %c0_51] : memref<824x128xf32, #tpu.memory_space<vmem>>, vector<3x16xf32>
    %cst_52 = arith.constant dense<0.000000e+00> : vector<32x16xf32>
    %100 = tpu.matmul %0, %99, %cst_52 {dimension_numbers = #tpu.dot_dimension_numbers<[1], [0], [0], [1], [0, 0, 1, 1], [], []>} : vector<32x3xf32>, vector<3x16xf32>, vector<32x16xf32> -> vector<32x16xf32>
    %c168 = arith.constant 168 : index
    %c0_53 = arith.constant 0 : index
    %101 = vector.load %arg5[%c168, %c0_53] : memref<824x128xf32, #tpu.memory_space<vmem>>, vector<1x16xf32>
    %102 = vector.broadcast %101 : vector<1x16xf32> to vector<32x16xf32>
    %103 = arith.addf %100, %102 : vector<32x16xf32>
    %cst_54 = arith.constant 0.000000e+00 : f32
    %104 = vector.broadcast %cst_54 : f32 to vector<32x16xf32>
    %105 = arith.maximumf %103, %104 : vector<32x16xf32>
    %c176 = arith.constant 176 : index
    %c0_55 = arith.constant 0 : index
    %106 = vector.load %arg5[%c176, %c0_55] : memref<824x128xf32, #tpu.memory_space<vmem>>, vector<16x16xf32>
    %cst_56 = arith.constant dense<0.000000e+00> : vector<32x16xf32>
    %107 = tpu.matmul %105, %106, %cst_56 {dimension_numbers = #tpu.dot_dimension_numbers<[1], [0], [0], [1], [0, 0, 1, 1], [], []>} : vector<32x16xf32>, vector<16x16xf32>, vector<32x16xf32> -> vector<32x16xf32>
    %c192 = arith.constant 192 : index
    %c0_57 = arith.constant 0 : index
    %108 = vector.load %arg5[%c192, %c0_57] : memref<824x128xf32, #tpu.memory_space<vmem>>, vector<1x16xf32>
    %109 = vector.broadcast %108 : vector<1x16xf32> to vector<32x16xf32>
    %110 = arith.addf %107, %109 : vector<32x16xf32>
    %cst_58 = arith.constant dense<0.000000e+00> : vector<32x4xf32>
    %111 = tpu.matmul %2, %98, %cst_58 {dimension_numbers = #tpu.dot_dimension_numbers<[1], [0], [0], [1], [0, 0, 1, 1], [], []>} : vector<32x16xf32>, vector<16x4xf32>, vector<32x4xf32> -> vector<32x4xf32>
    %cst_59 = arith.constant dense<0.000000e+00> : vector<32x4xf32>
    %112 = tpu.matmul %1, %98, %cst_59 {dimension_numbers = #tpu.dot_dimension_numbers<[1], [0], [0], [1], [0, 0, 1, 1], [], []>} : vector<32x16xf32>, vector<16x4xf32>, vector<32x4xf32> -> vector<32x4xf32>
    %c200 = arith.constant 200 : index
    %c0_60 = arith.constant 0 : index
    %113 = vector.load %arg5[%c200, %c0_60] : memref<824x128xf32, #tpu.memory_space<vmem>>, vector<4x24xf32>
    %cst_61 = arith.constant dense<0.000000e+00> : vector<32x24xf32>
    %114 = tpu.matmul %111, %113, %cst_61 {dimension_numbers = #tpu.dot_dimension_numbers<[1], [0], [0], [1], [0, 0, 1, 1], [], []>} : vector<32x4xf32>, vector<4x24xf32>, vector<32x24xf32> -> vector<32x24xf32>
    %c208 = arith.constant 208 : index
    %c0_62 = arith.constant 0 : index
    %115 = vector.load %arg5[%c208, %c0_62] : memref<824x128xf32, #tpu.memory_space<vmem>>, vector<4x24xf32>
    %cst_63 = arith.constant dense<0.000000e+00> : vector<32x24xf32>
    %116 = tpu.matmul %112, %115, %cst_63 {dimension_numbers = #tpu.dot_dimension_numbers<[1], [0], [0], [1], [0, 0, 1, 1], [], []>} : vector<32x4xf32>, vector<4x24xf32>, vector<32x24xf32> -> vector<32x24xf32>
    %117 = arith.addf %114, %116 : vector<32x24xf32>
    %c216 = arith.constant 216 : index
    %c0_64 = arith.constant 0 : index
    %118 = vector.load %arg5[%c216, %c0_64] : memref<824x128xf32, #tpu.memory_space<vmem>>, vector<16x24xf32>
    %cst_65 = arith.constant dense<0.000000e+00> : vector<32x24xf32>
    %119 = tpu.matmul %110, %118, %cst_65 {dimension_numbers = #tpu.dot_dimension_numbers<[1], [0], [0], [1], [0, 0, 1, 1], [], []>} : vector<32x16xf32>, vector<16x24xf32>, vector<32x24xf32> -> vector<32x24xf32>
    %120 = arith.addf %117, %119 : vector<32x24xf32>
    %c232 = arith.constant 232 : index
    %c0_66 = arith.constant 0 : index
    %121 = vector.load %arg5[%c232, %c0_66] : memref<824x128xf32, #tpu.memory_space<vmem>>, vector<1x24xf32>
    %122 = vector.broadcast %121 : vector<1x24xf32> to vector<32x24xf32>
    %123 = arith.addf %120, %122 : vector<32x24xf32>
    %124 = vector.extract_strided_slice %123 {offsets = [0, 0], sizes = [32, 8], strides = [1, 1]} : vector<32x24xf32> to vector<32x8xf32>
    %cst_67 = arith.constant 0.000000e+00 : f32
    %125 = vector.broadcast %cst_67 : f32 to vector<32x8xf32>
    %126 = arith.maximumf %124, %125 : vector<32x8xf32>
    %127 = vector.extract_strided_slice %123 {offsets = [0, 8], sizes = [32, 16], strides = [1, 1]} : vector<32x24xf32> to vector<32x16xf32>
    %128 = math.tanh %127 : vector<32x16xf32>
    %c280 = arith.constant 280 : index
    %c0_68 = arith.constant 0 : index
    %129 = vector.load %arg5[%c280, %c0_68] : memref<824x128xf32, #tpu.memory_space<vmem>>, vector<8x16xf32>
    %cst_69 = arith.constant dense<0.000000e+00> : vector<32x16xf32>
    %130 = tpu.matmul %126, %129, %cst_69 {dimension_numbers = #tpu.dot_dimension_numbers<[1], [0], [0], [1], [0, 0, 1, 1], [], []>} : vector<32x8xf32>, vector<8x16xf32>, vector<32x16xf32> -> vector<32x16xf32>
    %c288 = arith.constant 288 : index
    %c0_70 = arith.constant 0 : index
    %131 = vector.load %arg5[%c288, %c0_70] : memref<824x128xf32, #tpu.memory_space<vmem>>, vector<1x16xf32>
    %132 = vector.broadcast %131 : vector<1x16xf32> to vector<32x16xf32>
    %133 = arith.addf %130, %132 : vector<32x16xf32>
    %134 = math.tanh %133 : vector<32x16xf32>
    %135 = arith.mulf %128, %134 : vector<32x16xf32>
    %c296 = arith.constant 296 : index
    %c0_71 = arith.constant 0 : index
    %136 = vector.load %arg5[%c296, %c0_71] : memref<824x128xf32, #tpu.memory_space<vmem>>, vector<16x1xf32>
    %cst_72 = arith.constant dense<0.000000e+00> : vector<32x1xf32>
    %137 = tpu.matmul %135, %136, %cst_72 {dimension_numbers = #tpu.dot_dimension_numbers<[1], [0], [0], [1], [0, 0, 1, 1], [], []>} : vector<32x16xf32>, vector<16x1xf32>, vector<32x1xf32> -> vector<32x1xf32>
    %c312 = arith.constant 312 : index
    %c0_73 = arith.constant 0 : index
    %138 = vector.load %arg5[%c312, %c0_73] : memref<824x128xf32, #tpu.memory_space<vmem>>, vector<1x1xf32>
    %139 = vector.broadcast %138 : vector<1x1xf32> to vector<32x1xf32>
    %140 = arith.addf %137, %139 : vector<32x1xf32>
    %cst_74 = arith.constant 0.000000e+00 : f32
    %141 = vector.broadcast %cst_74 : f32 to vector<32x16xf32>
    %142 = arith.cmpf ogt, %1, %141 : vector<32x16xf32>
    %cst_75 = arith.constant -1.000000e+30 : f32
    %143 = vector.shape_cast %140 : vector<32x1xf32> to vector<32x1xf32>
    %144 = vector.broadcast %143 : vector<32x1xf32> to vector<32x16xf32>
    %145 = vector.broadcast %cst_75 : f32 to vector<32x16xf32>
    %146 = arith.select %142, %144, %145 : vector<32x16xi1>, vector<32x16xf32>
    %cst_76 = arith.constant dense<0xFF800000> : vector<16xf32>
    %147 = vector.multi_reduction <maximumf>, %146, %cst_76 [0] : vector<32x16xf32> to vector<16xf32>
    %148 = vector.shape_cast %147 : vector<16xf32> to vector<1x16xf32>
    %cst_77 = arith.constant dense<0.000000e+00> : vector<32x1xf32>
    %149 = tpu.matmul %1, %148, %cst_77 {dimension_numbers = #tpu.dot_dimension_numbers<[1], [1], [0], [0], [0, 0, 1, 0], [], []>} : vector<32x16xf32>, vector<1x16xf32>, vector<32x1xf32> -> vector<32x1xf32>
    %150 = arith.subf %140, %149 : vector<32x1xf32>
    %151 = math.exp %150 : vector<32x1xf32>
    %cst_78 = arith.constant dense<0.000000e+00> : vector<16x1xf32>
    %152 = tpu.matmul %4, %151, %cst_78 {dimension_numbers = #tpu.dot_dimension_numbers<[1], [0], [0], [1], [0, 0, 1, 1], [], []>} : vector<16x32xf32>, vector<32x1xf32>, vector<16x1xf32> -> vector<16x1xf32>
    %cst_79 = arith.constant dense<0.000000e+00> : vector<32x1xf32>
    %153 = tpu.matmul %1, %152, %cst_79 {dimension_numbers = #tpu.dot_dimension_numbers<[1], [0], [0], [1], [0, 0, 1, 1], [], []>} : vector<32x16xf32>, vector<16x1xf32>, vector<32x1xf32> -> vector<32x1xf32>
    %cst_80 = arith.constant 1.000000e-16 : f32
    %154 = vector.broadcast %cst_80 : f32 to vector<32x1xf32>
    %155 = arith.addf %153, %154 : vector<32x1xf32>
    %156 = tpu.reciprocal %155 {approx = true} : vector<32x1xf32> -> vector<32x1xf32>
    %157 = arith.mulf %151, %156 : vector<32x1xf32>
    %158 = vector.broadcast %157 : vector<32x1xf32> to vector<32x8xf32>
    %159 = arith.mulf %126, %158 : vector<32x8xf32>
    %cst_81 = arith.constant dense<0.000000e+00> : vector<16x8xf32>
    %160 = tpu.matmul %5, %159, %cst_81 {dimension_numbers = #tpu.dot_dimension_numbers<[1], [0], [0], [1], [0, 0, 1, 1], [], []>} : vector<16x32xf32>, vector<32x8xf32>, vector<16x8xf32> -> vector<16x8xf32>
    %c240 = arith.constant 240 : index
    %c0_82 = arith.constant 0 : index
    %161 = vector.load %arg5[%c240, %c0_82] : memref<824x128xf32, #tpu.memory_space<vmem>>, vector<4x8xf32>
    %cst_83 = arith.constant dense<0.000000e+00> : vector<16x8xf32>
    %162 = tpu.matmul %98, %161, %cst_83 {dimension_numbers = #tpu.dot_dimension_numbers<[1], [0], [0], [1], [0, 0, 1, 1], [], []>} : vector<16x4xf32>, vector<4x8xf32>, vector<16x8xf32> -> vector<16x8xf32>
    %c248 = arith.constant 248 : index
    %c0_84 = arith.constant 0 : index
    %163 = vector.load %arg5[%c248, %c0_84] : memref<824x128xf32, #tpu.memory_space<vmem>>, vector<1x8xf32>
    %164 = vector.broadcast %163 : vector<1x8xf32> to vector<16x8xf32>
    %165 = arith.addf %162, %164 : vector<16x8xf32>
    %cst_85 = arith.constant 0.000000e+00 : f32
    %166 = vector.broadcast %cst_85 : f32 to vector<16x8xf32>
    %167 = arith.maximumf %165, %166 : vector<16x8xf32>
    %c256 = arith.constant 256 : index
    %c0_86 = arith.constant 0 : index
    %168 = vector.load %arg5[%c256, %c0_86] : memref<824x128xf32, #tpu.memory_space<vmem>>, vector<8x2xf32>
    %cst_87 = arith.constant dense<0.000000e+00> : vector<16x2xf32>
    %169 = tpu.matmul %167, %168, %cst_87 {dimension_numbers = #tpu.dot_dimension_numbers<[1], [0], [0], [1], [0, 0, 1, 1], [], []>} : vector<16x8xf32>, vector<8x2xf32>, vector<16x2xf32> -> vector<16x2xf32>
    %c264 = arith.constant 264 : index
    %c0_88 = arith.constant 0 : index
    %170 = vector.load %arg5[%c264, %c0_88] : memref<824x128xf32, #tpu.memory_space<vmem>>, vector<8x2xf32>
    %cst_89 = arith.constant dense<0.000000e+00> : vector<16x2xf32>
    %171 = tpu.matmul %160, %170, %cst_89 {dimension_numbers = #tpu.dot_dimension_numbers<[1], [0], [0], [1], [0, 0, 1, 1], [], []>} : vector<16x8xf32>, vector<8x2xf32>, vector<16x2xf32> -> vector<16x2xf32>
    %172 = arith.addf %169, %171 : vector<16x2xf32>
    %c272 = arith.constant 272 : index
    %c0_90 = arith.constant 0 : index
    %173 = vector.load %arg5[%c272, %c0_90] : memref<824x128xf32, #tpu.memory_space<vmem>>, vector<1x2xf32>
    %174 = vector.broadcast %173 : vector<1x2xf32> to vector<16x2xf32>
    %175 = arith.addf %172, %174 : vector<16x2xf32>
    %176 = arith.negf %175 : vector<16x2xf32>
    %177 = math.exp %176 : vector<16x2xf32>
    %cst_91 = arith.constant 1.000000e+00 : f32
    %178 = vector.broadcast %cst_91 : f32 to vector<16x2xf32>
    %179 = arith.addf %178, %177 : vector<16x2xf32>
    %180 = arith.divf %178, %179 : vector<16x2xf32>
    %181 = vector.extract_strided_slice %180 {offsets = [0, 0], sizes = [16, 1], strides = [1, 1]} : vector<16x2xf32> to vector<16x1xf32>
    %182 = vector.broadcast %181 : vector<16x1xf32> to vector<16x8xf32>
    %183 = arith.mulf %182, %160 : vector<16x8xf32>
    %184 = vector.extract_strided_slice %180 {offsets = [0, 1], sizes = [16, 1], strides = [1, 1]} : vector<16x2xf32> to vector<16x1xf32>
    %185 = vector.broadcast %184 : vector<16x1xf32> to vector<16x8xf32>
    %186 = arith.mulf %185, %167 : vector<16x8xf32>
    %187 = arith.addf %183, %186 : vector<16x8xf32>
    %cst_92 = arith.constant 0.000000e+00 : f32
    %188 = vector.broadcast %cst_92 : f32 to vector<16x8xf32>
    %189 = arith.maximumf %187, %188 : vector<16x8xf32>
    %c664 = arith.constant 664 : index
    %c0_93 = arith.constant 0 : index
    %190 = vector.load %arg5[%c664, %c0_93] : memref<824x128xf32, #tpu.memory_space<vmem>>, vector<8x1xf32>
    %cst_94 = arith.constant dense<0.000000e+00> : vector<16x1xf32>
    %191 = tpu.matmul %189, %190, %cst_94 {dimension_numbers = #tpu.dot_dimension_numbers<[1], [0], [0], [1], [0, 0, 1, 1], [], []>} : vector<16x8xf32>, vector<8x1xf32>, vector<16x1xf32> -> vector<16x1xf32>
    %c672 = arith.constant 672 : index
    %c0_95 = arith.constant 0 : index
    %192 = vector.load %arg5[%c672, %c0_95] : memref<824x128xf32, #tpu.memory_space<vmem>>, vector<1x1xf32>
    %193 = vector.broadcast %192 : vector<1x1xf32> to vector<16x1xf32>
    %194 = arith.addf %191, %193 : vector<16x1xf32>
    %cst_96 = arith.constant 0.000000e+00 : f32
    %195 = vector.broadcast %cst_96 : f32 to vector<16x2xf32>
    %196 = arith.cmpf ogt, %3, %195 : vector<16x2xf32>
    %cst_97 = arith.constant -1.000000e+30 : f32
    %197 = vector.shape_cast %194 : vector<16x1xf32> to vector<16x1xf32>
    %198 = vector.broadcast %197 : vector<16x1xf32> to vector<16x2xf32>
    %199 = vector.broadcast %cst_97 : f32 to vector<16x2xf32>
    %200 = arith.select %196, %198, %199 : vector<16x2xi1>, vector<16x2xf32>
    %cst_98 = arith.constant dense<0xFF800000> : vector<2xf32>
    %201 = vector.multi_reduction <maximumf>, %200, %cst_98 [0] : vector<16x2xf32> to vector<2xf32>
    %202 = vector.shape_cast %201 : vector<2xf32> to vector<1x2xf32>
    %cst_99 = arith.constant dense<0.000000e+00> : vector<16x1xf32>
    %203 = tpu.matmul %3, %202, %cst_99 {dimension_numbers = #tpu.dot_dimension_numbers<[1], [1], [0], [0], [0, 0, 1, 0], [], []>} : vector<16x2xf32>, vector<1x2xf32>, vector<16x1xf32> -> vector<16x1xf32>
    %204 = arith.subf %194, %203 : vector<16x1xf32>
    %205 = math.exp %204 : vector<16x1xf32>
    %cst_100 = arith.constant dense<0.000000e+00> : vector<2x1xf32>
    %206 = tpu.matmul %6, %205, %cst_100 {dimension_numbers = #tpu.dot_dimension_numbers<[1], [0], [0], [1], [0, 0, 1, 1], [], []>} : vector<2x16xf32>, vector<16x1xf32>, vector<2x1xf32> -> vector<2x1xf32>
    %cst_101 = arith.constant dense<0.000000e+00> : vector<16x1xf32>
    %207 = tpu.matmul %3, %206, %cst_101 {dimension_numbers = #tpu.dot_dimension_numbers<[1], [0], [0], [1], [0, 0, 1, 1], [], []>} : vector<16x2xf32>, vector<2x1xf32>, vector<16x1xf32> -> vector<16x1xf32>
    %cst_102 = arith.constant 1.000000e-16 : f32
    %208 = vector.broadcast %cst_102 : f32 to vector<16x1xf32>
    %209 = arith.addf %207, %208 : vector<16x1xf32>
    %210 = tpu.reciprocal %209 {approx = true} : vector<16x1xf32> -> vector<16x1xf32>
    %211 = arith.mulf %205, %210 : vector<16x1xf32>
    %212 = vector.broadcast %211 : vector<16x1xf32> to vector<16x8xf32>
    %213 = arith.mulf %212, %189 : vector<16x8xf32>
    %cst_103 = arith.constant dense<0.000000e+00> : vector<2x8xf32>
    %214 = tpu.matmul %6, %213, %cst_103 {dimension_numbers = #tpu.dot_dimension_numbers<[1], [0], [0], [1], [0, 0, 1, 1], [], []>} : vector<2x16xf32>, vector<16x8xf32>, vector<2x8xf32> -> vector<2x8xf32>
    %c320 = arith.constant 320 : index
    %c0_104 = arith.constant 0 : index
    %215 = vector.load %arg5[%c320, %c0_104] : memref<824x128xf32, #tpu.memory_space<vmem>>, vector<3x16xf32>
    %cst_105 = arith.constant dense<0.000000e+00> : vector<32x16xf32>
    %216 = tpu.matmul %0, %215, %cst_105 {dimension_numbers = #tpu.dot_dimension_numbers<[1], [0], [0], [1], [0, 0, 1, 1], [], []>} : vector<32x3xf32>, vector<3x16xf32>, vector<32x16xf32> -> vector<32x16xf32>
    %c328 = arith.constant 328 : index
    %c0_106 = arith.constant 0 : index
    %217 = vector.load %arg5[%c328, %c0_106] : memref<824x128xf32, #tpu.memory_space<vmem>>, vector<1x16xf32>
    %218 = vector.broadcast %217 : vector<1x16xf32> to vector<32x16xf32>
    %219 = arith.addf %216, %218 : vector<32x16xf32>
    %cst_107 = arith.constant 0.000000e+00 : f32
    %220 = vector.broadcast %cst_107 : f32 to vector<32x16xf32>
    %221 = arith.maximumf %219, %220 : vector<32x16xf32>
    %c336 = arith.constant 336 : index
    %c0_108 = arith.constant 0 : index
    %222 = vector.load %arg5[%c336, %c0_108] : memref<824x128xf32, #tpu.memory_space<vmem>>, vector<16x16xf32>
    %cst_109 = arith.constant dense<0.000000e+00> : vector<32x16xf32>
    %223 = tpu.matmul %221, %222, %cst_109 {dimension_numbers = #tpu.dot_dimension_numbers<[1], [0], [0], [1], [0, 0, 1, 1], [], []>} : vector<32x16xf32>, vector<16x16xf32>, vector<32x16xf32> -> vector<32x16xf32>
    %c352 = arith.constant 352 : index
    %c0_110 = arith.constant 0 : index
    %224 = vector.load %arg5[%c352, %c0_110] : memref<824x128xf32, #tpu.memory_space<vmem>>, vector<1x16xf32>
    %225 = vector.broadcast %224 : vector<1x16xf32> to vector<32x16xf32>
    %226 = arith.addf %223, %225 : vector<32x16xf32>
    %cst_111 = arith.constant dense<0.000000e+00> : vector<32x8xf32>
    %227 = tpu.matmul %2, %189, %cst_111 {dimension_numbers = #tpu.dot_dimension_numbers<[1], [0], [0], [1], [0, 0, 1, 1], [], []>} : vector<32x16xf32>, vector<16x8xf32>, vector<32x8xf32> -> vector<32x8xf32>
    %cst_112 = arith.constant dense<0.000000e+00> : vector<32x8xf32>
    %228 = tpu.matmul %1, %189, %cst_112 {dimension_numbers = #tpu.dot_dimension_numbers<[1], [0], [0], [1], [0, 0, 1, 1], [], []>} : vector<32x16xf32>, vector<16x8xf32>, vector<32x8xf32> -> vector<32x8xf32>
    %c360 = arith.constant 360 : index
    %c0_113 = arith.constant 0 : index
    %229 = vector.load %arg5[%c360, %c0_113] : memref<824x128xf32, #tpu.memory_space<vmem>>, vector<8x24xf32>
    %cst_114 = arith.constant dense<0.000000e+00> : vector<32x24xf32>
    %230 = tpu.matmul %227, %229, %cst_114 {dimension_numbers = #tpu.dot_dimension_numbers<[1], [0], [0], [1], [0, 0, 1, 1], [], []>} : vector<32x8xf32>, vector<8x24xf32>, vector<32x24xf32> -> vector<32x24xf32>
    %c368 = arith.constant 368 : index
    %c0_115 = arith.constant 0 : index
    %231 = vector.load %arg5[%c368, %c0_115] : memref<824x128xf32, #tpu.memory_space<vmem>>, vector<8x24xf32>
    %cst_116 = arith.constant dense<0.000000e+00> : vector<32x24xf32>
    %232 = tpu.matmul %228, %231, %cst_116 {dimension_numbers = #tpu.dot_dimension_numbers<[1], [0], [0], [1], [0, 0, 1, 1], [], []>} : vector<32x8xf32>, vector<8x24xf32>, vector<32x24xf32> -> vector<32x24xf32>
    %233 = arith.addf %230, %232 : vector<32x24xf32>
    %c376 = arith.constant 376 : index
    %c0_117 = arith.constant 0 : index
    %234 = vector.load %arg5[%c376, %c0_117] : memref<824x128xf32, #tpu.memory_space<vmem>>, vector<16x24xf32>
    %cst_118 = arith.constant dense<0.000000e+00> : vector<32x24xf32>
    %235 = tpu.matmul %226, %234, %cst_118 {dimension_numbers = #tpu.dot_dimension_numbers<[1], [0], [0], [1], [0, 0, 1, 1], [], []>} : vector<32x16xf32>, vector<16x24xf32>, vector<32x24xf32> -> vector<32x24xf32>
    %236 = arith.addf %233, %235 : vector<32x24xf32>
    %c392 = arith.constant 392 : index
    %c0_119 = arith.constant 0 : index
    %237 = vector.load %arg5[%c392, %c0_119] : memref<824x128xf32, #tpu.memory_space<vmem>>, vector<1x24xf32>
    %238 = vector.broadcast %237 : vector<1x24xf32> to vector<32x24xf32>
    %239 = arith.addf %236, %238 : vector<32x24xf32>
    %240 = vector.extract_strided_slice %239 {offsets = [0, 0], sizes = [32, 8], strides = [1, 1]} : vector<32x24xf32> to vector<32x8xf32>
    %cst_120 = arith.constant 0.000000e+00 : f32
    %241 = vector.broadcast %cst_120 : f32 to vector<32x8xf32>
    %242 = arith.maximumf %240, %241 : vector<32x8xf32>
    %243 = vector.extract_strided_slice %239 {offsets = [0, 8], sizes = [32, 16], strides = [1, 1]} : vector<32x24xf32> to vector<32x16xf32>
    %244 = math.tanh %243 : vector<32x16xf32>
    %c440 = arith.constant 440 : index
    %c0_121 = arith.constant 0 : index
    %245 = vector.load %arg5[%c440, %c0_121] : memref<824x128xf32, #tpu.memory_space<vmem>>, vector<8x16xf32>
    %cst_122 = arith.constant dense<0.000000e+00> : vector<32x16xf32>
    %246 = tpu.matmul %242, %245, %cst_122 {dimension_numbers = #tpu.dot_dimension_numbers<[1], [0], [0], [1], [0, 0, 1, 1], [], []>} : vector<32x8xf32>, vector<8x16xf32>, vector<32x16xf32> -> vector<32x16xf32>
    %c448 = arith.constant 448 : index
    %c0_123 = arith.constant 0 : index
    %247 = vector.load %arg5[%c448, %c0_123] : memref<824x128xf32, #tpu.memory_space<vmem>>, vector<1x16xf32>
    %248 = vector.broadcast %247 : vector<1x16xf32> to vector<32x16xf32>
    %249 = arith.addf %246, %248 : vector<32x16xf32>
    %250 = math.tanh %249 : vector<32x16xf32>
    %251 = arith.mulf %244, %250 : vector<32x16xf32>
    %c456 = arith.constant 456 : index
    %c0_124 = arith.constant 0 : index
    %252 = vector.load %arg5[%c456, %c0_124] : memref<824x128xf32, #tpu.memory_space<vmem>>, vector<16x1xf32>
    %cst_125 = arith.constant dense<0.000000e+00> : vector<32x1xf32>
    %253 = tpu.matmul %251, %252, %cst_125 {dimension_numbers = #tpu.dot_dimension_numbers<[1], [0], [0], [1], [0, 0, 1, 1], [], []>} : vector<32x16xf32>, vector<16x1xf32>, vector<32x1xf32> -> vector<32x1xf32>
    %c472 = arith.constant 472 : index
    %c0_126 = arith.constant 0 : index
    %254 = vector.load %arg5[%c472, %c0_126] : memref<824x128xf32, #tpu.memory_space<vmem>>, vector<1x1xf32>
    %255 = vector.broadcast %254 : vector<1x1xf32> to vector<32x1xf32>
    %256 = arith.addf %253, %255 : vector<32x1xf32>
    %cst_127 = arith.constant 0.000000e+00 : f32
    %257 = vector.broadcast %cst_127 : f32 to vector<32x16xf32>
    %258 = arith.cmpf ogt, %1, %257 : vector<32x16xf32>
    %cst_128 = arith.constant -1.000000e+30 : f32
    %259 = vector.shape_cast %256 : vector<32x1xf32> to vector<32x1xf32>
    %260 = vector.broadcast %259 : vector<32x1xf32> to vector<32x16xf32>
    %261 = vector.broadcast %cst_128 : f32 to vector<32x16xf32>
    %262 = arith.select %258, %260, %261 : vector<32x16xi1>, vector<32x16xf32>
    %cst_129 = arith.constant dense<0xFF800000> : vector<16xf32>
    %263 = vector.multi_reduction <maximumf>, %262, %cst_129 [0] : vector<32x16xf32> to vector<16xf32>
    %264 = vector.shape_cast %263 : vector<16xf32> to vector<1x16xf32>
    %cst_130 = arith.constant dense<0.000000e+00> : vector<32x1xf32>
    %265 = tpu.matmul %1, %264, %cst_130 {dimension_numbers = #tpu.dot_dimension_numbers<[1], [1], [0], [0], [0, 0, 1, 0], [], []>} : vector<32x16xf32>, vector<1x16xf32>, vector<32x1xf32> -> vector<32x1xf32>
    %266 = arith.subf %256, %265 : vector<32x1xf32>
    %267 = math.exp %266 : vector<32x1xf32>
    %cst_131 = arith.constant dense<0.000000e+00> : vector<16x1xf32>
    %268 = tpu.matmul %4, %267, %cst_131 {dimension_numbers = #tpu.dot_dimension_numbers<[1], [0], [0], [1], [0, 0, 1, 1], [], []>} : vector<16x32xf32>, vector<32x1xf32>, vector<16x1xf32> -> vector<16x1xf32>
    %cst_132 = arith.constant dense<0.000000e+00> : vector<32x1xf32>
    %269 = tpu.matmul %1, %268, %cst_132 {dimension_numbers = #tpu.dot_dimension_numbers<[1], [0], [0], [1], [0, 0, 1, 1], [], []>} : vector<32x16xf32>, vector<16x1xf32>, vector<32x1xf32> -> vector<32x1xf32>
    %cst_133 = arith.constant 1.000000e-16 : f32
    %270 = vector.broadcast %cst_133 : f32 to vector<32x1xf32>
    %271 = arith.addf %269, %270 : vector<32x1xf32>
    %272 = tpu.reciprocal %271 {approx = true} : vector<32x1xf32> -> vector<32x1xf32>
    %273 = arith.mulf %267, %272 : vector<32x1xf32>
    %274 = vector.broadcast %273 : vector<32x1xf32> to vector<32x8xf32>
    %275 = arith.mulf %242, %274 : vector<32x8xf32>
    %cst_134 = arith.constant dense<0.000000e+00> : vector<16x8xf32>
    %276 = tpu.matmul %5, %275, %cst_134 {dimension_numbers = #tpu.dot_dimension_numbers<[1], [0], [0], [1], [0, 0, 1, 1], [], []>} : vector<16x32xf32>, vector<32x8xf32>, vector<16x8xf32> -> vector<16x8xf32>
    %c400 = arith.constant 400 : index
    %c0_135 = arith.constant 0 : index
    %277 = vector.load %arg5[%c400, %c0_135] : memref<824x128xf32, #tpu.memory_space<vmem>>, vector<8x8xf32>
    %cst_136 = arith.constant dense<0.000000e+00> : vector<16x8xf32>
    %278 = tpu.matmul %189, %277, %cst_136 {dimension_numbers = #tpu.dot_dimension_numbers<[1], [0], [0], [1], [0, 0, 1, 1], [], []>} : vector<16x8xf32>, vector<8x8xf32>, vector<16x8xf32> -> vector<16x8xf32>
    %c408 = arith.constant 408 : index
    %c0_137 = arith.constant 0 : index
    %279 = vector.load %arg5[%c408, %c0_137] : memref<824x128xf32, #tpu.memory_space<vmem>>, vector<1x8xf32>
    %280 = vector.broadcast %279 : vector<1x8xf32> to vector<16x8xf32>
    %281 = arith.addf %278, %280 : vector<16x8xf32>
    %cst_138 = arith.constant 0.000000e+00 : f32
    %282 = vector.broadcast %cst_138 : f32 to vector<16x8xf32>
    %283 = arith.maximumf %281, %282 : vector<16x8xf32>
    %c416 = arith.constant 416 : index
    %c0_139 = arith.constant 0 : index
    %284 = vector.load %arg5[%c416, %c0_139] : memref<824x128xf32, #tpu.memory_space<vmem>>, vector<8x2xf32>
    %cst_140 = arith.constant dense<0.000000e+00> : vector<16x2xf32>
    %285 = tpu.matmul %283, %284, %cst_140 {dimension_numbers = #tpu.dot_dimension_numbers<[1], [0], [0], [1], [0, 0, 1, 1], [], []>} : vector<16x8xf32>, vector<8x2xf32>, vector<16x2xf32> -> vector<16x2xf32>
    %c424 = arith.constant 424 : index
    %c0_141 = arith.constant 0 : index
    %286 = vector.load %arg5[%c424, %c0_141] : memref<824x128xf32, #tpu.memory_space<vmem>>, vector<8x2xf32>
    %cst_142 = arith.constant dense<0.000000e+00> : vector<16x2xf32>
    %287 = tpu.matmul %276, %286, %cst_142 {dimension_numbers = #tpu.dot_dimension_numbers<[1], [0], [0], [1], [0, 0, 1, 1], [], []>} : vector<16x8xf32>, vector<8x2xf32>, vector<16x2xf32> -> vector<16x2xf32>
    %288 = arith.addf %285, %287 : vector<16x2xf32>
    %c432 = arith.constant 432 : index
    %c0_143 = arith.constant 0 : index
    %289 = vector.load %arg5[%c432, %c0_143] : memref<824x128xf32, #tpu.memory_space<vmem>>, vector<1x2xf32>
    %290 = vector.broadcast %289 : vector<1x2xf32> to vector<16x2xf32>
    %291 = arith.addf %288, %290 : vector<16x2xf32>
    %292 = arith.negf %291 : vector<16x2xf32>
    %293 = math.exp %292 : vector<16x2xf32>
    %cst_144 = arith.constant 1.000000e+00 : f32
    %294 = vector.broadcast %cst_144 : f32 to vector<16x2xf32>
    %295 = arith.addf %294, %293 : vector<16x2xf32>
    %296 = arith.divf %294, %295 : vector<16x2xf32>
    %297 = vector.extract_strided_slice %296 {offsets = [0, 0], sizes = [16, 1], strides = [1, 1]} : vector<16x2xf32> to vector<16x1xf32>
    %298 = vector.broadcast %297 : vector<16x1xf32> to vector<16x8xf32>
    %299 = arith.mulf %298, %276 : vector<16x8xf32>
    %300 = vector.extract_strided_slice %296 {offsets = [0, 1], sizes = [16, 1], strides = [1, 1]} : vector<16x2xf32> to vector<16x1xf32>
    %301 = vector.broadcast %300 : vector<16x1xf32> to vector<16x8xf32>
    %302 = arith.mulf %301, %283 : vector<16x8xf32>
    %303 = arith.addf %299, %302 : vector<16x8xf32>
    %cst_145 = arith.constant 0.000000e+00 : f32
    %304 = vector.broadcast %cst_145 : f32 to vector<16x8xf32>
    %305 = arith.maximumf %303, %304 : vector<16x8xf32>
    %c480 = arith.constant 480 : index
    %c0_146 = arith.constant 0 : index
    %306 = vector.load %arg5[%c480, %c0_146] : memref<824x128xf32, #tpu.memory_space<vmem>>, vector<3x16xf32>
    %cst_147 = arith.constant dense<0.000000e+00> : vector<32x16xf32>
    %307 = tpu.matmul %0, %306, %cst_147 {dimension_numbers = #tpu.dot_dimension_numbers<[1], [0], [0], [1], [0, 0, 1, 1], [], []>} : vector<32x3xf32>, vector<3x16xf32>, vector<32x16xf32> -> vector<32x16xf32>
    %c488 = arith.constant 488 : index
    %c0_148 = arith.constant 0 : index
    %308 = vector.load %arg5[%c488, %c0_148] : memref<824x128xf32, #tpu.memory_space<vmem>>, vector<1x16xf32>
    %309 = vector.broadcast %308 : vector<1x16xf32> to vector<32x16xf32>
    %310 = arith.addf %307, %309 : vector<32x16xf32>
    %cst_149 = arith.constant 0.000000e+00 : f32
    %311 = vector.broadcast %cst_149 : f32 to vector<32x16xf32>
    %312 = arith.maximumf %310, %311 : vector<32x16xf32>
    %c496 = arith.constant 496 : index
    %c0_150 = arith.constant 0 : index
    %313 = vector.load %arg5[%c496, %c0_150] : memref<824x128xf32, #tpu.memory_space<vmem>>, vector<16x16xf32>
    %cst_151 = arith.constant dense<0.000000e+00> : vector<32x16xf32>
    %314 = tpu.matmul %312, %313, %cst_151 {dimension_numbers = #tpu.dot_dimension_numbers<[1], [0], [0], [1], [0, 0, 1, 1], [], []>} : vector<32x16xf32>, vector<16x16xf32>, vector<32x16xf32> -> vector<32x16xf32>
    %c512 = arith.constant 512 : index
    %c0_152 = arith.constant 0 : index
    %315 = vector.load %arg5[%c512, %c0_152] : memref<824x128xf32, #tpu.memory_space<vmem>>, vector<1x16xf32>
    %316 = vector.broadcast %315 : vector<1x16xf32> to vector<32x16xf32>
    %317 = arith.addf %314, %316 : vector<32x16xf32>
    %cst_153 = arith.constant dense<0.000000e+00> : vector<32x8xf32>
    %318 = tpu.matmul %2, %305, %cst_153 {dimension_numbers = #tpu.dot_dimension_numbers<[1], [0], [0], [1], [0, 0, 1, 1], [], []>} : vector<32x16xf32>, vector<16x8xf32>, vector<32x8xf32> -> vector<32x8xf32>
    %cst_154 = arith.constant dense<0.000000e+00> : vector<32x8xf32>
    %319 = tpu.matmul %1, %305, %cst_154 {dimension_numbers = #tpu.dot_dimension_numbers<[1], [0], [0], [1], [0, 0, 1, 1], [], []>} : vector<32x16xf32>, vector<16x8xf32>, vector<32x8xf32> -> vector<32x8xf32>
    %c520 = arith.constant 520 : index
    %c0_155 = arith.constant 0 : index
    %320 = vector.load %arg5[%c520, %c0_155] : memref<824x128xf32, #tpu.memory_space<vmem>>, vector<8x32xf32>
    %cst_156 = arith.constant dense<0.000000e+00> : vector<32x32xf32>
    %321 = tpu.matmul %318, %320, %cst_156 {dimension_numbers = #tpu.dot_dimension_numbers<[1], [0], [0], [1], [0, 0, 1, 1], [], []>} : vector<32x8xf32>, vector<8x32xf32>, vector<32x32xf32> -> vector<32x32xf32>
    %c528 = arith.constant 528 : index
    %c0_157 = arith.constant 0 : index
    %322 = vector.load %arg5[%c528, %c0_157] : memref<824x128xf32, #tpu.memory_space<vmem>>, vector<8x32xf32>
    %cst_158 = arith.constant dense<0.000000e+00> : vector<32x32xf32>
    %323 = tpu.matmul %319, %322, %cst_158 {dimension_numbers = #tpu.dot_dimension_numbers<[1], [0], [0], [1], [0, 0, 1, 1], [], []>} : vector<32x8xf32>, vector<8x32xf32>, vector<32x32xf32> -> vector<32x32xf32>
    %324 = arith.addf %321, %323 : vector<32x32xf32>
    %c536 = arith.constant 536 : index
    %c0_159 = arith.constant 0 : index
    %325 = vector.load %arg5[%c536, %c0_159] : memref<824x128xf32, #tpu.memory_space<vmem>>, vector<16x32xf32>
    %cst_160 = arith.constant dense<0.000000e+00> : vector<32x32xf32>
    %326 = tpu.matmul %317, %325, %cst_160 {dimension_numbers = #tpu.dot_dimension_numbers<[1], [0], [0], [1], [0, 0, 1, 1], [], []>} : vector<32x16xf32>, vector<16x32xf32>, vector<32x32xf32> -> vector<32x32xf32>
    %327 = arith.addf %324, %326 : vector<32x32xf32>
    %c552 = arith.constant 552 : index
    %c0_161 = arith.constant 0 : index
    %328 = vector.load %arg5[%c552, %c0_161] : memref<824x128xf32, #tpu.memory_space<vmem>>, vector<1x32xf32>
    %329 = vector.broadcast %328 : vector<1x32xf32> to vector<32x32xf32>
    %330 = arith.addf %327, %329 : vector<32x32xf32>
    %331 = vector.extract_strided_slice %330 {offsets = [0, 0], sizes = [32, 16], strides = [1, 1]} : vector<32x32xf32> to vector<32x16xf32>
    %cst_162 = arith.constant 0.000000e+00 : f32
    %332 = vector.broadcast %cst_162 : f32 to vector<32x16xf32>
    %333 = arith.maximumf %331, %332 : vector<32x16xf32>
    %334 = vector.extract_strided_slice %330 {offsets = [0, 16], sizes = [32, 16], strides = [1, 1]} : vector<32x32xf32> to vector<32x16xf32>
    %335 = math.tanh %334 : vector<32x16xf32>
    %c616 = arith.constant 616 : index
    %c0_163 = arith.constant 0 : index
    %336 = vector.load %arg5[%c616, %c0_163] : memref<824x128xf32, #tpu.memory_space<vmem>>, vector<16x16xf32>
    %cst_164 = arith.constant dense<0.000000e+00> : vector<32x16xf32>
    %337 = tpu.matmul %333, %336, %cst_164 {dimension_numbers = #tpu.dot_dimension_numbers<[1], [0], [0], [1], [0, 0, 1, 1], [], []>} : vector<32x16xf32>, vector<16x16xf32>, vector<32x16xf32> -> vector<32x16xf32>
    %c632 = arith.constant 632 : index
    %c0_165 = arith.constant 0 : index
    %338 = vector.load %arg5[%c632, %c0_165] : memref<824x128xf32, #tpu.memory_space<vmem>>, vector<1x16xf32>
    %339 = vector.broadcast %338 : vector<1x16xf32> to vector<32x16xf32>
    %340 = arith.addf %337, %339 : vector<32x16xf32>
    %341 = math.tanh %340 : vector<32x16xf32>
    %342 = arith.mulf %335, %341 : vector<32x16xf32>
    %c640 = arith.constant 640 : index
    %c0_166 = arith.constant 0 : index
    %343 = vector.load %arg5[%c640, %c0_166] : memref<824x128xf32, #tpu.memory_space<vmem>>, vector<16x1xf32>
    %cst_167 = arith.constant dense<0.000000e+00> : vector<32x1xf32>
    %344 = tpu.matmul %342, %343, %cst_167 {dimension_numbers = #tpu.dot_dimension_numbers<[1], [0], [0], [1], [0, 0, 1, 1], [], []>} : vector<32x16xf32>, vector<16x1xf32>, vector<32x1xf32> -> vector<32x1xf32>
    %c656 = arith.constant 656 : index
    %c0_168 = arith.constant 0 : index
    %345 = vector.load %arg5[%c656, %c0_168] : memref<824x128xf32, #tpu.memory_space<vmem>>, vector<1x1xf32>
    %346 = vector.broadcast %345 : vector<1x1xf32> to vector<32x1xf32>
    %347 = arith.addf %344, %346 : vector<32x1xf32>
    %cst_169 = arith.constant 0.000000e+00 : f32
    %348 = vector.broadcast %cst_169 : f32 to vector<32x16xf32>
    %349 = arith.cmpf ogt, %1, %348 : vector<32x16xf32>
    %cst_170 = arith.constant -1.000000e+30 : f32
    %350 = vector.shape_cast %347 : vector<32x1xf32> to vector<32x1xf32>
    %351 = vector.broadcast %350 : vector<32x1xf32> to vector<32x16xf32>
    %352 = vector.broadcast %cst_170 : f32 to vector<32x16xf32>
    %353 = arith.select %349, %351, %352 : vector<32x16xi1>, vector<32x16xf32>
    %cst_171 = arith.constant dense<0xFF800000> : vector<16xf32>
    %354 = vector.multi_reduction <maximumf>, %353, %cst_171 [0] : vector<32x16xf32> to vector<16xf32>
    %355 = vector.shape_cast %354 : vector<16xf32> to vector<1x16xf32>
    %cst_172 = arith.constant dense<0.000000e+00> : vector<32x1xf32>
    %356 = tpu.matmul %1, %355, %cst_172 {dimension_numbers = #tpu.dot_dimension_numbers<[1], [1], [0], [0], [0, 0, 1, 0], [], []>} : vector<32x16xf32>, vector<1x16xf32>, vector<32x1xf32> -> vector<32x1xf32>
    %357 = arith.subf %347, %356 : vector<32x1xf32>
    %358 = math.exp %357 : vector<32x1xf32>
    %cst_173 = arith.constant dense<0.000000e+00> : vector<16x1xf32>
    %359 = tpu.matmul %4, %358, %cst_173 {dimension_numbers = #tpu.dot_dimension_numbers<[1], [0], [0], [1], [0, 0, 1, 1], [], []>} : vector<16x32xf32>, vector<32x1xf32>, vector<16x1xf32> -> vector<16x1xf32>
    %cst_174 = arith.constant dense<0.000000e+00> : vector<32x1xf32>
    %360 = tpu.matmul %1, %359, %cst_174 {dimension_numbers = #tpu.dot_dimension_numbers<[1], [0], [0], [1], [0, 0, 1, 1], [], []>} : vector<32x16xf32>, vector<16x1xf32>, vector<32x1xf32> -> vector<32x1xf32>
    %cst_175 = arith.constant 1.000000e-16 : f32
    %361 = vector.broadcast %cst_175 : f32 to vector<32x1xf32>
    %362 = arith.addf %360, %361 : vector<32x1xf32>
    %363 = tpu.reciprocal %362 {approx = true} : vector<32x1xf32> -> vector<32x1xf32>
    %364 = arith.mulf %358, %363 : vector<32x1xf32>
    %365 = vector.broadcast %364 : vector<32x1xf32> to vector<32x16xf32>
    %366 = arith.mulf %333, %365 : vector<32x16xf32>
    %cst_176 = arith.constant dense<0.000000e+00> : vector<16x16xf32>
    %367 = tpu.matmul %5, %366, %cst_176 {dimension_numbers = #tpu.dot_dimension_numbers<[1], [0], [0], [1], [0, 0, 1, 1], [], []>} : vector<16x32xf32>, vector<32x16xf32>, vector<16x16xf32> -> vector<16x16xf32>
    %c560 = arith.constant 560 : index
    %c0_177 = arith.constant 0 : index
    %368 = vector.load %arg5[%c560, %c0_177] : memref<824x128xf32, #tpu.memory_space<vmem>>, vector<8x16xf32>
    %cst_178 = arith.constant dense<0.000000e+00> : vector<16x16xf32>
    %369 = tpu.matmul %305, %368, %cst_178 {dimension_numbers = #tpu.dot_dimension_numbers<[1], [0], [0], [1], [0, 0, 1, 1], [], []>} : vector<16x8xf32>, vector<8x16xf32>, vector<16x16xf32> -> vector<16x16xf32>
    %c568 = arith.constant 568 : index
    %c0_179 = arith.constant 0 : index
    %370 = vector.load %arg5[%c568, %c0_179] : memref<824x128xf32, #tpu.memory_space<vmem>>, vector<1x16xf32>
    %371 = vector.broadcast %370 : vector<1x16xf32> to vector<16x16xf32>
    %372 = arith.addf %369, %371 : vector<16x16xf32>
    %cst_180 = arith.constant 0.000000e+00 : f32
    %373 = vector.broadcast %cst_180 : f32 to vector<16x16xf32>
    %374 = arith.maximumf %372, %373 : vector<16x16xf32>
    %c576 = arith.constant 576 : index
    %c0_181 = arith.constant 0 : index
    %375 = vector.load %arg5[%c576, %c0_181] : memref<824x128xf32, #tpu.memory_space<vmem>>, vector<16x2xf32>
    %cst_182 = arith.constant dense<0.000000e+00> : vector<16x2xf32>
    %376 = tpu.matmul %374, %375, %cst_182 {dimension_numbers = #tpu.dot_dimension_numbers<[1], [0], [0], [1], [0, 0, 1, 1], [], []>} : vector<16x16xf32>, vector<16x2xf32>, vector<16x2xf32> -> vector<16x2xf32>
    %c592 = arith.constant 592 : index
    %c0_183 = arith.constant 0 : index
    %377 = vector.load %arg5[%c592, %c0_183] : memref<824x128xf32, #tpu.memory_space<vmem>>, vector<16x2xf32>
    %cst_184 = arith.constant dense<0.000000e+00> : vector<16x2xf32>
    %378 = tpu.matmul %367, %377, %cst_184 {dimension_numbers = #tpu.dot_dimension_numbers<[1], [0], [0], [1], [0, 0, 1, 1], [], []>} : vector<16x16xf32>, vector<16x2xf32>, vector<16x2xf32> -> vector<16x2xf32>
    %379 = arith.addf %376, %378 : vector<16x2xf32>
    %c608 = arith.constant 608 : index
    %c0_185 = arith.constant 0 : index
    %380 = vector.load %arg5[%c608, %c0_185] : memref<824x128xf32, #tpu.memory_space<vmem>>, vector<1x2xf32>
    %381 = vector.broadcast %380 : vector<1x2xf32> to vector<16x2xf32>
    %382 = arith.addf %379, %381 : vector<16x2xf32>
    %383 = arith.negf %382 : vector<16x2xf32>
    %384 = math.exp %383 : vector<16x2xf32>
    %cst_186 = arith.constant 1.000000e+00 : f32
    %385 = vector.broadcast %cst_186 : f32 to vector<16x2xf32>
    %386 = arith.addf %385, %384 : vector<16x2xf32>
    %387 = arith.divf %385, %386 : vector<16x2xf32>
    %388 = vector.extract_strided_slice %387 {offsets = [0, 0], sizes = [16, 1], strides = [1, 1]} : vector<16x2xf32> to vector<16x1xf32>
    %389 = vector.broadcast %388 : vector<16x1xf32> to vector<16x16xf32>
    %390 = arith.mulf %389, %367 : vector<16x16xf32>
    %391 = vector.extract_strided_slice %387 {offsets = [0, 1], sizes = [16, 1], strides = [1, 1]} : vector<16x2xf32> to vector<16x1xf32>
    %392 = vector.broadcast %391 : vector<16x1xf32> to vector<16x16xf32>
    %393 = arith.mulf %392, %374 : vector<16x16xf32>
    %394 = arith.addf %390, %393 : vector<16x16xf32>
    %cst_187 = arith.constant 0.000000e+00 : f32
    %395 = vector.broadcast %cst_187 : f32 to vector<16x16xf32>
    %396 = arith.maximumf %394, %395 : vector<16x16xf32>
    %c680 = arith.constant 680 : index
    %c0_188 = arith.constant 0 : index
    %397 = vector.load %arg5[%c680, %c0_188] : memref<824x128xf32, #tpu.memory_space<vmem>>, vector<16x1xf32>
    %cst_189 = arith.constant dense<0.000000e+00> : vector<16x1xf32>
    %398 = tpu.matmul %396, %397, %cst_189 {dimension_numbers = #tpu.dot_dimension_numbers<[1], [0], [0], [1], [0, 0, 1, 1], [], []>} : vector<16x16xf32>, vector<16x1xf32>, vector<16x1xf32> -> vector<16x1xf32>
    %c696 = arith.constant 696 : index
    %c0_190 = arith.constant 0 : index
    %399 = vector.load %arg5[%c696, %c0_190] : memref<824x128xf32, #tpu.memory_space<vmem>>, vector<1x1xf32>
    %400 = vector.broadcast %399 : vector<1x1xf32> to vector<16x1xf32>
    %401 = arith.addf %398, %400 : vector<16x1xf32>
    %cst_191 = arith.constant 0.000000e+00 : f32
    %402 = vector.broadcast %cst_191 : f32 to vector<16x2xf32>
    %403 = arith.cmpf ogt, %3, %402 : vector<16x2xf32>
    %cst_192 = arith.constant -1.000000e+30 : f32
    %404 = vector.shape_cast %401 : vector<16x1xf32> to vector<16x1xf32>
    %405 = vector.broadcast %404 : vector<16x1xf32> to vector<16x2xf32>
    %406 = vector.broadcast %cst_192 : f32 to vector<16x2xf32>
    %407 = arith.select %403, %405, %406 : vector<16x2xi1>, vector<16x2xf32>
    %cst_193 = arith.constant dense<0xFF800000> : vector<2xf32>
    %408 = vector.multi_reduction <maximumf>, %407, %cst_193 [0] : vector<16x2xf32> to vector<2xf32>
    %409 = vector.shape_cast %408 : vector<2xf32> to vector<1x2xf32>
    %cst_194 = arith.constant dense<0.000000e+00> : vector<16x1xf32>
    %410 = tpu.matmul %3, %409, %cst_194 {dimension_numbers = #tpu.dot_dimension_numbers<[1], [1], [0], [0], [0, 0, 1, 0], [], []>} : vector<16x2xf32>, vector<1x2xf32>, vector<16x1xf32> -> vector<16x1xf32>
    %411 = arith.subf %401, %410 : vector<16x1xf32>
    %412 = math.exp %411 : vector<16x1xf32>
    %cst_195 = arith.constant dense<0.000000e+00> : vector<2x1xf32>
    %413 = tpu.matmul %6, %412, %cst_195 {dimension_numbers = #tpu.dot_dimension_numbers<[1], [0], [0], [1], [0, 0, 1, 1], [], []>} : vector<2x16xf32>, vector<16x1xf32>, vector<2x1xf32> -> vector<2x1xf32>
    %cst_196 = arith.constant dense<0.000000e+00> : vector<16x1xf32>
    %414 = tpu.matmul %3, %413, %cst_196 {dimension_numbers = #tpu.dot_dimension_numbers<[1], [0], [0], [1], [0, 0, 1, 1], [], []>} : vector<16x2xf32>, vector<2x1xf32>, vector<16x1xf32> -> vector<16x1xf32>
    %cst_197 = arith.constant 1.000000e-16 : f32
    %415 = vector.broadcast %cst_197 : f32 to vector<16x1xf32>
    %416 = arith.addf %414, %415 : vector<16x1xf32>
    %417 = tpu.reciprocal %416 {approx = true} : vector<16x1xf32> -> vector<16x1xf32>
    %418 = arith.mulf %412, %417 : vector<16x1xf32>
    %419 = vector.broadcast %418 : vector<16x1xf32> to vector<16x16xf32>
    %420 = arith.mulf %419, %396 : vector<16x16xf32>
    %cst_198 = arith.constant dense<0.000000e+00> : vector<2x16xf32>
    %421 = tpu.matmul %6, %420, %cst_198 {dimension_numbers = #tpu.dot_dimension_numbers<[1], [0], [0], [1], [0, 0, 1, 1], [], []>} : vector<2x16xf32>, vector<16x16xf32>, vector<2x16xf32> -> vector<2x16xf32>
    %c704 = arith.constant 704 : index
    %c0_199 = arith.constant 0 : index
    %422 = vector.load %arg5[%c704, %c0_199] : memref<824x128xf32, #tpu.memory_space<vmem>>, vector<8x32xf32>
    %cst_200 = arith.constant dense<0.000000e+00> : vector<2x32xf32>
    %423 = tpu.matmul %214, %422, %cst_200 {dimension_numbers = #tpu.dot_dimension_numbers<[1], [0], [0], [1], [0, 0, 1, 1], [], []>} : vector<2x8xf32>, vector<8x32xf32>, vector<2x32xf32> -> vector<2x32xf32>
    %c712 = arith.constant 712 : index
    %c0_201 = arith.constant 0 : index
    %424 = vector.load %arg5[%c712, %c0_201] : memref<824x128xf32, #tpu.memory_space<vmem>>, vector<16x32xf32>
    %cst_202 = arith.constant dense<0.000000e+00> : vector<2x32xf32>
    %425 = tpu.matmul %421, %424, %cst_202 {dimension_numbers = #tpu.dot_dimension_numbers<[1], [0], [0], [1], [0, 0, 1, 1], [], []>} : vector<2x16xf32>, vector<16x32xf32>, vector<2x32xf32> -> vector<2x32xf32>
    %426 = arith.addf %423, %425 : vector<2x32xf32>
    %c728 = arith.constant 728 : index
    %c0_203 = arith.constant 0 : index
    %427 = vector.load %arg5[%c728, %c0_203] : memref<824x128xf32, #tpu.memory_space<vmem>>, vector<1x32xf32>
    %428 = vector.broadcast %427 : vector<1x32xf32> to vector<2x32xf32>
    %429 = arith.addf %426, %428 : vector<2x32xf32>
    %cst_204 = arith.constant 0.000000e+00 : f32
    %430 = vector.broadcast %cst_204 : f32 to vector<2x32xf32>
    %431 = arith.maximumf %429, %430 : vector<2x32xf32>
    %c736 = arith.constant 736 : index
    %c0_205 = arith.constant 0 : index
    %432 = vector.load %arg5[%c736, %c0_205] : memref<824x128xf32, #tpu.memory_space<vmem>>, vector<32x16xf32>
    %cst_206 = arith.constant dense<0.000000e+00> : vector<2x16xf32>
    %433 = tpu.matmul %431, %432, %cst_206 {dimension_numbers = #tpu.dot_dimension_numbers<[1], [0], [0], [1], [0, 0, 1, 1], [], []>} : vector<2x32xf32>, vector<32x16xf32>, vector<2x16xf32> -> vector<2x16xf32>
    %c768 = arith.constant 768 : index
    %c0_207 = arith.constant 0 : index
    %434 = vector.load %arg5[%c768, %c0_207] : memref<824x128xf32, #tpu.memory_space<vmem>>, vector<1x16xf32>
    %435 = vector.broadcast %434 : vector<1x16xf32> to vector<2x16xf32>
    %436 = arith.addf %433, %435 : vector<2x16xf32>
    %cst_208 = arith.constant 0.000000e+00 : f32
    %437 = vector.broadcast %cst_208 : f32 to vector<2x16xf32>
    %438 = arith.maximumf %436, %437 : vector<2x16xf32>
    %c776 = arith.constant 776 : index
    %c0_209 = arith.constant 0 : index
    %439 = vector.load %arg5[%c776, %c0_209] : memref<824x128xf32, #tpu.memory_space<vmem>>, vector<16x16xf32>
    %cst_210 = arith.constant dense<0.000000e+00> : vector<2x16xf32>
    %440 = tpu.matmul %438, %439, %cst_210 {dimension_numbers = #tpu.dot_dimension_numbers<[1], [0], [0], [1], [0, 0, 1, 1], [], []>} : vector<2x16xf32>, vector<16x16xf32>, vector<2x16xf32> -> vector<2x16xf32>
    %c792 = arith.constant 792 : index
    %c0_211 = arith.constant 0 : index
    %441 = vector.load %arg5[%c792, %c0_211] : memref<824x128xf32, #tpu.memory_space<vmem>>, vector<1x16xf32>
    %442 = vector.broadcast %441 : vector<1x16xf32> to vector<2x16xf32>
    %443 = arith.addf %440, %442 : vector<2x16xf32>
    %cst_212 = arith.constant 0.000000e+00 : f32
    %444 = vector.broadcast %cst_212 : f32 to vector<2x16xf32>
    %445 = arith.maximumf %443, %444 : vector<2x16xf32>
    %c800 = arith.constant 800 : index
    %c0_213 = arith.constant 0 : index
    %446 = vector.load %arg5[%c800, %c0_213] : memref<824x128xf32, #tpu.memory_space<vmem>>, vector<16x1xf32>
    %cst_214 = arith.constant dense<0.000000e+00> : vector<2x1xf32>
    %447 = tpu.matmul %445, %446, %cst_214 {dimension_numbers = #tpu.dot_dimension_numbers<[1], [0], [0], [1], [0, 0, 1, 1], [], []>} : vector<2x16xf32>, vector<16x1xf32>, vector<2x1xf32> -> vector<2x1xf32>
    %c816 = arith.constant 816 : index
    %c0_215 = arith.constant 0 : index
    %448 = vector.load %arg5[%c816, %c0_215] : memref<824x128xf32, #tpu.memory_space<vmem>>, vector<1x1xf32>
    %449 = vector.broadcast %448 : vector<1x1xf32> to vector<2x1xf32>
    %450 = arith.addf %447, %449 : vector<2x1xf32>
    %c0_216 = arith.constant 0 : index
    %c0_217 = arith.constant 0 : index
    %451 = vector.load %arg6[%c0_216, %c0_217] : memref<2x1xf32, #tpu.memory_space<vmem>>, vector<2x1xf32>
    tpu.vector_store %arg6[%c0_216, %c0_217], %450 {strides = array<i32>} : memref<2x1xf32, #tpu.memory_space<vmem>>, vector<2x1xf32>,
    return
  }
}

</mosaic_0001>

<bundles_post_ra>
// kernel: model_gnn_forward.1
= control target key start
LH: loop header
LB: loop body
LE: loop exit
PB: predicated region body
PF: predicated region fallthrough
CT: control target
= control target key end

     0   :  { %vm154_vm0 = vcmask 1042432   ;;  %vm141_vm1 = vcmask 23552   ;;  %vm254_vm2 = vcmask 130048   ;;  %vm561_vm3 = vcmask 1040384   ;;  %s9277_s23 = smov 4   ;;  %s9278_s28 = smov 124   ;;  %s10531_s5 = inlined_call_operand.vmem [shape: f32[824,128], index: 5, kind: input, shape index: {}]   ;;  %s10532_s1 = inlined_call_operand.vmem [shape: f32[32,3], index: 1, kind: input, shape index: {}]   ;;  %s10533_s0 = inlined_call_operand.vmem [shape: f32[16,1], index: 0, kind: input, shape index: {}]   ;;  %s10534_s3 = inlined_call_operand.vmem [shape: f32[32,16], index: 3, kind: input, shape index: {}]   ;;  %s10535_s2 = inlined_call_operand.vmem [shape: f32[32,16], index: 2, kind: input, shape index: {}]   ;;  %s10536_s4 = inlined_call_operand.vmem [shape: f32[16,2], index: 4, kind: input, shape index: {}]   ;;  %s10537_s6 = inlined_call_operand.vmem [shape: f32[2,1], index: 6, kind: output, shape index: {}]  }
   0x1   :  { %v135_v0 = vld [vmem:[%s10531_s5] sm:$0x7]  ;;  %v9334_v2 = vld [vmem:[%s10532_s1 + $0x8] sm:$0xff]  ;;  %v9342_v3 = vld [vmem:[%s10532_s1 + $0x10] sm:$0xff]  ;;  %vm548_vm4 = vcmask 7168   ;;  %vm889_vm5 = vcmask 1043456  }
   0x2   :  { %v9329_v1 = vld [vmem:[%s10532_s1] sm:$0xff]  ;;  %8206 = vmatprep.subr.msk.mxu0 %vm154_vm0, %v135_v0  ;;  %v9352_v4 = vld [vmem:[%s10532_s1 + $0x18] sm:$0xff]  ;;  %v247_v5 = vld [vmem:[%s10531_s5 + $0x10] sm:$0xff]  ;;  %vm876_vm6 = vcmask 31744   ;;  %vm1183_vm11 = vcmask 261120   ;;  %vm2470_vm12 = vcmask 64512  }
   0x3   :  { %8208 = vmatprep.mubr.msk.f32.mxu0 %vm141_vm1, %v9329_v1  ;;  %8207 = vmatpush3.msk.msra.mxu0 %vm154_vm0, %v135_v0  ;;  %v248_v6 = vld [vmem:[%s10531_s5 + $0x18] sm:$0xff]  ;;  %v9365_v8 = vld [vmem:[%s10533_s0] sm:$0xff]  ;;  %v9370_v9 = vld [vmem:[%s10533_s0 + $0x8] sm:$0xff]  ;;  %s9281_s0 = smov 8   ;;  %s9282_s20 = smov 120   ;;  %vm3438_vm13 = vcmask 15360  }
   0x4   :  { %8209 = vmatmul.mubr.msk.f32.vlgmr.msra.gmra.mrb[0].mxu0 %vm141_vm1, %v9334_v2  ;;  %v8815_v7 = vpack.c.bf16 %v248_v6, %v247_v5  ;;  %v8819_v10 = vpack.c.bf16 %v9370_v9, %v9365_v8  ;;  %v9377_v11 = vld [vmem:[%s10534_s3] sm:$0xff]  ;;  %v9382_v12 = vld [vmem:[%s10534_s3 + $0x8] sm:$0xff]  ;;  %v9387_v13 = vld [vmem:[%s10534_s3 + $0x10] sm:$0xff]  ;;  %s9287_s16 = smov 112  }
   0x5   :  { %8211 = vmatprep.mubr.msk.f32.mxu0 %vm141_vm1, %v9342_v3  ;;  %v9398_v14 = vld [vmem:[%s10534_s3 + $0x18] sm:$0xff]  ;;  %v7580_v15 = vld [vmem:[%s10531_s5 + $0x8] ss:$0 sm:$0xff]  ;;  %v9410_v28 = vld [vmem:[%s10535_s2] sm:$0xff] }
   0x6   :  { %8816 = vmatprep.subr.bf16.mxu1 %v8815_v7  ;;  %8820 = vmatprep.subr.bf16.mxu0 %v8819_v10  ;;  %v9419_v29 = vld [vmem:[%s10535_s2 + $0x8] sm:$0xff]  ;;  %v9424_v30 = vld [vmem:[%s10535_s2 + $0x10] sm:$0xff]  ;;  %v9433_v31 = vld [vmem:[%s10535_s2 + $0x18] sm:$0xff]  ;;  %vm1114_vm8 = vcmp.gt.f32.partialorder %v9410_v28, 0.0 }
   0x7   :  { %8818 = vmatpush3.bf16.msra.mxu1 %v8815_v7  ;;  %8822 = vmatpush3.bf16.msra.mxu0 %v8819_v10  ;;  %v547_v32 = vld [vmem:[%s10531_s5 + $0x30] sm:$0x1]  ;;  %v546_v34 = vld [vmem:[%s10531_s5 + $0x28] sm:$0x1]  ;;  %v750_v42 = vld [vmem:[%s10531_s5 + $0x38] sm:$0xff]  ;;  %vm1115_vm7 = vcmp.gt.f32.partialorder %v9419_v29, 0.0 }
   0x8   :  { %8212 = vmatmul.mubr.msk.f32.gmra.mrb[2].mxu0 %vm141_vm1, %v9352_v4  ;;  %8824 = vmatprep.subr.bf16.mxu1 %v8819_v10  ;;  %v751_v43 = vld [vmem:[%s10531_s5 + $0x40] sm:$0xff]  ;;  %v870_v54 = vld [vmem:[%s10531_s5 + $0x78] sm:$0xf]  ;;  %v7613_v55 = vld [vmem:[%s10531_s5 + $0x48] ss:$0 sm:$0xff]  ;;  %vm1117_vm9 = vcmp.gt.f32.partialorder %v9433_v31, 0.0 }
   0x9   :  { %8228 = vmatprep.mubr.msk.f32.mxu0 %vm254_vm2, %v9377_v11  ;;  %8244 = vmatprep.subr.msk.mxu0 %vm561_vm3, %v547_v32  ;;  %v8827_v46 = vpack.c.bf16 %v751_v43, %v750_v42  ;;  %v7586_v49 = vld [vmem:[%s10531_s5 + $0x20] ss:$0 sm:$0xff]  ;;  %vm1116_vm10 = vcmp.gt.f32.partialorder %v9424_v30, 0.0 }
   0xc   :  { %8229 = vmatmul.mubr.msk.f32.vlgmr.msra.gmra.mrb[4].mxu0 %vm254_vm2, %v9382_v12 }
   0xd   :  { %8231 = vmatprep.mubr.msk.f32.mxu0 %vm254_vm2, %v9387_v13  ;;  %8245 = vmatpush3.msk.msra.mxu0 %vm561_vm3, %v547_v32  ;;  %v1003_v32 = vld [vmem:[%s10531_s5 + $0x90] sm:$0xff] }
   0xe   :  { %8252 = vmatprep.subr.msk.mxu0 %vm561_vm3, %v546_v34 }
  0x10   :  { %8232 = vmatmul.mubr.msk.f32.gmra.mrb[6].mxu0 %vm254_vm2, %v9398_v14 }
  0xd7   :  { %v8210_v16 = vpop.f32.mrb[0].mxu0 }
  0xd8   :  { %v230_v17 = vadd.f32 %v8210_v16, %v7580_v15  ;;  %v224_v18 = vpop.f32.mrb[1].mxu0 }
  0xd9   :  { %v225_v19 = vadd.f32 %v7580_v15, %v224_v18 }
  0xda   :  { %v244_v22 = vmax.f32 %v230_v17, 0.0 }
  0xdb   :  { %v243_v20 = vmax.f32 %v225_v19, 0.0  ;;  %v8213_v21 = vpop.f32.mrb[2].mxu0 }
  0xdc   :  { %v240_v23 = vadd.f32 %v8213_v21, %v7580_v15  ;;  %v234_v24 = vpop.f32.mrb[3].mxu0 }
  0xdd   :  { %v235_v25 = vadd.f32 %v7580_v15, %v234_v24  ;;  %8218 = vmatprep.mubr.msk.f32.mxu1 %vm254_vm2, %v243_v20 }
  0xde   :  { %8219 = vmatmul.mubr.msk.f32.vlgmr.msra.gmra.mrb[0].mxu1 %vm254_vm2, %v244_v22  ;;  %v246_v27 = vmax.f32 %v240_v23, 0.0 }
  0xdf   :  { %v245_v26 = vmax.f32 %v235_v25, 0.0  ;;  %8826 = vmatpush3.bf16.msra.mxu1 %v8819_v10  ;;  %v8230_v33 = vpop.f32.mrb[4].mxu0  ;;  %v7614_v10 = vld [vmem:[%s10531_s5 + $0x80] ss:$0 sm:$0xff] }
  0xe0   :  { %v430_v35 = vpop.f32.mrb[5].mxu0  ;;  %8270 = vmatprep.subr.msk.mxu1 %vm889_vm5, %v870_v54 }
  0xe1   :  { %8221 = vmatprep.mubr.msk.f32.mxu1 %vm254_vm2, %v245_v26 }
  0xe2   :  { %8222 = vmatmul.mubr.msk.f32.gmra.mrb[2].mxu1 %vm254_vm2, %v246_v27  ;;  %v1002_v27 = vld [vmem:[%s10531_s5 + $0x88] sm:$0xff] }
  0xe3   :  { %8238 = vmatprep.mubr.msk.f32.mxu1 %vm254_vm2, %v9410_v28  ;;  %v8233_v36 = vpop.f32.mrb[6].mxu0 }
  0xe4   :  { %v440_v37 = vpop.f32.mrb[7].mxu0 }
  0xe6   :  { %8239 = vmatmul.mubr.msk.f32.vlgmr.msra.gmra.mrb[4].mxu1 %vm254_vm2, %v9419_v29 }
  0xe7   :  { %8241 = vmatprep.mubr.msk.f32.mxu1 %vm254_vm2, %v9424_v30  ;;  %8271 = vmatpush3.msk.msra.mxu1 %vm889_vm5, %v870_v54 }
  0xea   :  { %8242 = vmatmul.mubr.msk.f32.gmra.mrb[6].mxu1 %vm254_vm2, %v9433_v31 }
 0x1b1   :  { %v8220_v38 = vpop.f32.mrb[0].mxu1 }
 0x1b2   :  { %v333_v39 = vpop.f32.mrb[1].mxu1  ;;  %v339_v51 = vadd.f32 %v8220_v38, %v7586_v49 }
 0x1b3   :  { %v334_v50 = vadd.f32 %v7586_v49, %v333_v39 }
 0x1b5   :  { %v8223_v40 = vpop.f32.mrb[2].mxu1 }
 0x1b6   :  { %v343_v41 = vpop.f32.mrb[3].mxu1  ;;  %v349_v53 = vadd.f32 %v8223_v40, %v7586_v49 }
 0x1b7   :  { %v344_v52 = vadd.f32 %v7586_v49, %v343_v41 }
 0x1b9   :  { %v8240_v44 = vpop.f32.mrb[4].mxu1 }
 0x1ba   :  { %v527_v45 = vpop.f32.mrb[5].mxu1 }
 0x1bb   :  { %8246 = vmatprep.mubr.msk.f32.mxu0 %vm548_vm4, %v527_v45 }
 0x1bc   :  { %8247 = vmatmul.mubr.msk.f32.vlgmr.msra.gmra.mrb[8].mxu0 %vm548_vm4, %v8240_v44 }
 0x1bd   :  { %v8243_v47 = vpop.f32.mrb[6].mxu1  ;;  %8253 = vmatpush3.msk.msra.mxu0 %vm561_vm3, %v546_v34 }
 0x1be   :  { %v537_v48 = vpop.f32.mrb[7].mxu1  ;;  %8828 = vmatprep.subr.bf16.mxu0 %v8827_v46 }
 0x1bf   :  { %8249 = vmatprep.mubr.msk.f32.mxu0 %vm548_vm4, %v537_v48 }
 0x1c0   :  { %8250 = vmatmul.mubr.msk.f32.gmra.mrb[10].mxu0 %vm548_vm4, %v8243_v47 }
 0x1c1   :  { %8254 = vmatprep.mubr.msk.f32.mxu0 %vm548_vm4, %v430_v35 }
 0x1c4   :  { %8255 = vmatmul.mubr.msk.f32.vlgmr.msra.gmra.mrb[8].mxu0 %vm548_vm4, %v8230_v33  ;;  %v8831_v33 = vpack.c.bf16 %v1003_v32, %v1002_v27 }
 0x1c5   :  { %8257 = vmatprep.mubr.msk.f32.mxu0 %vm548_vm4, %v440_v37  ;;  %8830 = vmatpush3.bf16.msra.mxu0 %v8827_v46 }
 0x1c6   :  { %8832 = vmatprep.subr.bf16.mxu1 %v8831_v33 }
 0x1c8   :  { %8258 = vmatmul.mubr.msk.f32.gmra.mrb[10].mxu0 %vm548_vm4, %v8233_v36 }
 0x1c9   :  { %8264 = vmatprep.mubr.msk.f32.mxu0 %vm254_vm2, %v334_v50  ;;  %v9279_v50 = vmov 0  }
 0x1ca   :  { %9069 = vset.pattern.permute.xlu1 %v9279_v50  ;;  %9070 = vset.pattern.permute.xlu0 %v9279_v50 }
 0x1cc   :  { %8265 = vmatmul.mubr.msk.f32.vlgmr.msra.gmra.mrb[8].mxu0 %vm254_vm2, %v339_v51  ;;  %v7620_v51 = vld [vmem:[%s10531_s5 + $0x98] ss:$0 sm:$0xff] }
 0x1cd   :  { %8267 = vmatprep.mubr.msk.f32.mxu0 %vm254_vm2, %v344_v52 }
 0x1d0   :  { %8268 = vmatmul.mubr.msk.f32.gmra.mrb[10].mxu0 %vm254_vm2, %v349_v53 }
 0x29f   :  { %v8266_v56 = vpop.f32.mrb[8].mxu0 }
 0x2a0   :  { %v9476_v57 = vadd.f32 %v8266_v56, %v7613_v55  ;;  %v830_v58 = vpop.f32.mrb[9].mxu0 }
 0x2a1   :  { %v9478_v59 = vadd.f32 %v7613_v55, %v830_v58 }
 0x2a2   :  { %v863_v62 = vmax.f32 %v9476_v57, 0.0 }
 0x2a3   :  { %v862_v60 = vmax.f32 %v9478_v59, 0.0  ;;  %v8269_v61 = vpop.f32.mrb[10].mxu0 }
 0x2a4   :  { %v9482_v63 = vadd.f32 %v8269_v61, %v7613_v55  ;;  %v840_v0 = vpop.f32.mrb[11].mxu0 }
 0x2a5   :  { %v9484_v5 = vadd.f32 %v7613_v55, %v840_v0  ;;  %8272 = vmatprep.mubr.msk.f32.mxu1 %vm876_vm6, %v862_v60 }
 0x2a6   :  { %8273 = vmatmul.mubr.msk.f32.vlgmr.msra.gmra.mrb[8].mxu1 %vm876_vm6, %v863_v62  ;;  %v865_v7 = vmax.f32 %v9482_v63, 0.0 }
 0x2a7   :  { %v864_v6 = vmax.f32 %v9484_v5, 0.0  ;;  %8834 = vmatpush3.bf16.msra.mxu1 %v8831_v33 }
 0x2a9   :  { %8275 = vmatprep.mubr.msk.f32.mxu1 %vm876_vm6, %v864_v6 }
 0x2aa   :  { %8276 = vmatmul.mubr.msk.f32.gmra.mrb[10].mxu1 %vm876_vm6, %v865_v7 }
 0x379   :  { %v8274_v15 = vpop.f32.mrb[8].mxu1 }
 0x37a   :  { %v959_v16 = vpop.f32.mrb[9].mxu1  ;;  %v965_v18 = vadd.f32 %v8274_v15, %v7614_v10 }
 0x37b   :  { %v960_v17 = vadd.f32 %v7614_v10, %v959_v16 }
 0x37d   :  { %9083 = vtanh.f32 %v960_v17  ;;  %v8277_v19 = vpop.f32.mrb[10].mxu1 }
 0x37e   :  { %v969_v20 = vpop.f32.mrb[11].mxu1  ;;  %9085 = vtanh.f32 %v965_v18  ;;  %v975_v22 = vadd.f32 %v8277_v19, %v7614_v10 }
 0x37f   :  { %v970_v21 = vadd.f32 %v7614_v10, %v969_v20 }
 0x381   :  { %9087 = vtanh.f32 %v970_v21 }
 0x382   :  { %9089 = vtanh.f32 %v975_v22 }
 0x383   :  { %9091 = vtanh.f32 %v9478_v59 }
 0x384   :  { %9093 = vtanh.f32 %v9476_v57  ;;  %v1463_v57 = vld [vmem:[%s10531_s5 + $0x50] sm:$0x1] }
 0x385   :  { %9095 = vtanh.f32 %v9484_v5 }
 0x386   :  { %9097 = vtanh.f32 %v9482_v63  ;;  %v1770_v63 = vld [vmem:[%s10531_s5 + $0xa0] sm:$0x7] }
 0x387   :  { %v9084_v23 = vpop.eup %9083 }
 0x388   :  { %986 = vrot.lane.b32.xlu0 %v9084_v23, %s9277_s23  ;;  %v9086_v24 = vpop.eup %9085 }
 0x38b   :  { %v9088_v25 = vpop.eup %9087 }
 0x38c   :  { %988 = vrot.lane.b32.xlu0 %v9086_v24, %s9277_s23  ;;  %990 = vrot.lane.b32.xlu1 %v9088_v25, %s9277_s23  ;;  %v9090_v26 = vpop.eup %9089 }
 0x38d   :  { %v9092_v34 = vpop.eup %9091 }
 0x38e   :  { %v9094_v37 = vpop.eup %9093 }
 0x38f   :  { %v9096_v38 = vpop.eup %9095 }
 0x390   :  { %992 = vrot.lane.b32.xlu1 %v9090_v26, %s9277_s23  ;;  %v9098_v43 = vpop.eup %9097 }
 0x3fa   :  { %v987_v35 = vpop.permute.xlu0 %986 }
 0x3fb   :  { %v998_v36 = vmul.f32 %v9092_v34, %v987_v35 }
 0x3fd   :  { %1013 = vrot.lane.b32.xlu0 %v998_v36, %s9278_s28 }
 0x3fe   :  { %v989_v39 = vpop.permute.xlu0 %988  ;;  %v991_v40 = vpop.permute.xlu1 %990 }
 0x3ff   :  { %v999_v41 = vmul.f32 %v9094_v37, %v989_v39  ;;  %v1000_v42 = vmul.f32 %v9096_v38, %v991_v40 }
 0x401   :  { %1015 = vrot.lane.b32.xlu1 %v999_v41, %s9278_s28  ;;  %1017 = vrot.lane.b32.xlu0 %v1000_v42, %s9278_s28 }
 0x402   :  { %v993_v44 = vpop.permute.xlu1 %992 }
 0x403   :  { %v1001_v45 = vmul.f32 %v9098_v43, %v993_v44 }
 0x405   :  { %1019 = vrot.lane.b32.xlu1 %v1001_v45, %s9278_s28 }
 0x46f   :  { %v1014_v46 = vpop.permute.xlu0 %1013 }
 0x470   :  { %8282 = vmatprep.mubr.msk.f32.mxu1 %vm254_vm2, %v1014_v46 }
 0x473   :  { %v1018_v47 = vpop.permute.xlu0 %1017  ;;  %v1016_v48 = vpop.permute.xlu1 %1015 }
 0x474   :  { %8283 = vmatmul.mubr.msk.f32.vlgmr.msra.gmra.mrb[12].mxu1 %vm254_vm2, %v1016_v48 }
 0x475   :  { %8285 = vmatprep.mubr.msk.f32.mxu1 %vm254_vm2, %v1018_v47 }
 0x477   :  { %v1020_v49 = vpop.permute.xlu1 %1019 }
 0x478   :  { %8286 = vmatmul.mubr.msk.f32.gmra.mrb[14].mxu1 %vm254_vm2, %v1020_v49 }
 0x547   :  { %v8284_v52 = vpop.f32.mrb[12].mxu1 }
 0x548   :  { %v1101_v53 = vadd.f32 %v8284_v52, %v7620_v51  ;;  %v1095_v54 = vpop.f32.mrb[13].mxu1 }
 0x549   :  { %v1096_v55 = vadd.f32 %v7620_v51, %v1095_v54 }
 0x54a   :  { %1125 = vperm.xlu1 %9069, %v1101_v53  }
 0x54b   :  { %1120 = vperm.xlu0 %9070, %v1096_v55   ;;  %v8287_v56 = vpop.f32.mrb[14].mxu1 }
 0x54c   :  { %v1111_v58 = vadd.f32 %v8287_v56, %v7620_v51  ;;  %v1105_v61 = vpop.f32.mrb[15].mxu1 }
 0x54d   :  { %v1106_v0 = vadd.f32 %v7620_v51, %v1105_v61 }
 0x54f   :  { %1135 = vperm.xlu0 %9070, %v1111_v58   ;;  %1130 = vperm.xlu1 %9069, %v1106_v0  }
 0x5c9   :  { %v1126_v10 = vpop.permute.xlu1 %1125 }
 0x5ca   :  { %v1121_v15 = vpop.permute.xlu0 %1120  ;;  %v1139_v16 = vsel %vm1115_vm7, %v1126_v10, -1e+30 }
 0x5cb   :  { %v1138_v17 = vsel %vm1114_vm8, %v1121_v15, -1e+30  ;;  %v1143_v18 = vsel %vm254_vm2, %v1139_v16, -inf }
 0x5cc   :  { %v1142_v19 = vsel %vm254_vm2, %v1138_v17, -inf }
 0x5cd   :  { %v1146_v26 = vmax.f32 %v1142_v19, %v1143_v18 }
 0x5ce   :  { %v1136_v20 = vpop.permute.xlu0 %1135  ;;  %v1131_v21 = vpop.permute.xlu1 %1130 }
 0x5cf   :  { %v1141_v22 = vsel %vm1117_vm9, %v1136_v20, -1e+30  ;;  %v1140_v23 = vsel %vm1116_vm10, %v1131_v21, -1e+30 }
 0x5d0   :  { %v1145_v24 = vsel %vm254_vm2, %v1141_v22, -inf  ;;  %v1144_v25 = vsel %vm254_vm2, %v1140_v23, -inf }
 0x5d1   :  { %v1147_v27 = vmax.f32 %v1144_v25, %v1145_v24 }
 0x5d3   :  { %v1148_v32 = vmax.f32 %v1146_v26, %v1147_v27 }
 0x5d5   :  { %v1149_v33 = vrot.slane %v1148_v32, 4 }
 0x5d7   :  { %v1150_v34 = vmax.f32 %v1148_v32, %v1149_v33 }
 0x5d9   :  { %v1151_v35 = vrot.slane %v1150_v34, 2 }
 0x5db   :  { %v1152_v36 = vmax.f32 %v1150_v34, %v1151_v35 }
 0x5dd   :  { %v1153_v37 = vrot.slane %v1152_v36, 1 }
 0x5df   :  { %v1154_v38 = vmax.f32 %v1152_v36, %v1153_v37 }
 0x5e1   :  { %v1156_v39 = vmul.f32 %v1154_v38, %v9419_v29  ;;  %v1155_v40 = vmul.f32 %v1154_v38, %v9410_v28  ;;  %v1157_v43 = vmul.f32 %v1154_v38, %v9424_v30  ;;  %v1158_v44 = vmul.f32 %v1154_v38, %v9433_v31 }
 0x5e3   :  { %v1162_v41 = vsel %vm254_vm2, %v1156_v39, 0.0  ;;  %v1159_v42 = vsel %vm254_vm2, %v1155_v40, 0.0  ;;  %v1165_v45 = vsel %vm254_vm2, %v1157_v43, 0.0  ;;  %v1168_v46 = vsel %vm254_vm2, %v1158_v44, 0.0 }
 0x5e4   :  { %1163 = vadd.xlane.f32.xlu0 %v1162_v41  ;;  %1160 = vadd.xlane.f32.xlu1 %v1159_v42 }
 0x5e8   :  { %1166 = vadd.xlane.f32.xlu0 %v1165_v45  ;;  %1169 = vadd.xlane.f32.xlu1 %v1168_v46  ;;  %v1556_v45 = vld [vmem:[%s10531_s5 + $0x68] sm:$0xf] }
 0x615   :  { %37 = vxpose.xlu0.b32.start [1/4] (short) (narrow) %v9410_v28, 16 }
 0x619   :  { %38 = vxpose.xlu0.b32.cont [2/4] (short) (narrow) %v9419_v29, 16 }
 0x61d   :  { %39 = vxpose.xlu0.b32.cont [3/4] (short) (narrow) %v9424_v30, 16 }
 0x621   :  { %40 = vxpose.xlu0.b32.end [4/4] (short) (narrow) %v9433_v31, 16 }
 0x671   :  { %v1164_v47 = vpop.xlane.xlu0 %1163  ;;  %v1161_v48 = vpop.xlane.xlu1 %1160 }
 0x672   :  { %v1172_v49 = vsub.f32 %v1101_v53, %v1164_v47  ;;  %v1171_v51 = vsub.f32 %v1096_v55, %v1161_v48 }
 0x674   :  { %v1177_v52 = vmul.f32 1.442695, %v1172_v49  ;;  %v1175_v54 = vmul.f32 1.442695, %v1171_v51 }
 0x675   :  { %v1167_v56 = vpop.xlane.xlu0 %1166  ;;  %v1170_v61 = vpop.xlane.xlu1 %1169 }
 0x676   :  { %9099 = vpow2.f32 %v1177_v52  ;;  %v1173_v10 = vsub.f32 %v1106_v0, %v1167_v56  ;;  %v1174_v15 = vsub.f32 %v1111_v58, %v1170_v61 }
 0x677   :  { %9101 = vpow2.f32 %v1175_v54 }
 0x678   :  { %v1179_v16 = vmul.f32 1.442695, %v1173_v10  ;;  %v1181_v17 = vmul.f32 1.442695, %v1174_v15 }
 0x67a   :  { %9103 = vpow2.f32 %v1179_v16 }
 0x67b   :  { %9105 = vpow2.f32 %v1181_v17 }
 0x680   :  { %v9100_v18 = vpop.eup %9099 }
 0x681   :  { %v9102_v19 = vpop.eup %9101 }
 0x682   :  { %v8835_v20 = vpack.c.bf16 %v9100_v18, %v9102_v19 }
 0x684   :  { %v9104_v21 = vpop.eup %9103  ;;  %8836 = vmatprep.subr.bf16.mxu1 %v8835_v20 }
 0x685   :  { %v9106_v22 = vpop.eup %9105  ;;  %8838 = vmatpush3.bf16.msra.mxu1 %v8835_v20 }
 0x686   :  { %v8839_v53 = vpack.c.bf16 %v9106_v22, %v9104_v21 }
 0x688   :  { %8840 = vmatprep.subr.bf16.mxu1 %v8839_v53 }
 0x689   :  { %8842 = vmatpush3.bf16.msra.mxu1 %v8839_v53 }
 0x695   :  { %v9550_v55 = vpop.trf.xlu0 }
 0x696   :  { %8296 = vmatprep.mubr.msk.f32.mxu1 %vm1183_vm11, %v9550_v55 }
 0x699   :  { %v9554_v58 = vpop.trf.xlu0 }
 0x69a   :  { %8297 = vmatmul.mubr.msk.f32.vlgmr.msra.gmra.mrb[16].mxu1 %vm1183_vm11, %v9554_v58 }
 0x69b   :  { %8303 = vmatprep.mubr.msk.f32.mxu1 %vm254_vm2, %v9410_v28 }
 0x76d   :  { %v8298_v0 = vpop.f32.mrb[16].mxu1 }
 0x76e   :  { %v1256_v23 = vpop.f32.mrb[17].mxu1 }
 0x76f   :  { %v8843_v24 = vpack.c.bf16 %v8298_v0, %v1256_v23 }
 0x771   :  { %8844 = vmatprep.subr.bf16.mxu1 %v8843_v24 }
 0x772   :  { %8846 = vmatpush3.bf16.msra.mxu1 %v8843_v24 }
 0x773   :  { %8325 = vmatprep.subr.msk.mxu1 %vm889_vm5, %v1556_v45 }
 0x775   :  { %8304 = vmatmul.mubr.msk.f32.vlgmr.msra.gmra.mrb[18].mxu1 %vm254_vm2, %v9419_v29 }
 0x776   :  { %8306 = vmatprep.mubr.msk.f32.mxu1 %vm254_vm2, %v9424_v30  ;;  %8326 = vmatpush3.msk.msra.mxu1 %vm889_vm5, %v1556_v45 }
 0x779   :  { %8307 = vmatmul.mubr.msk.f32.gmra.mrb[20].mxu1 %vm254_vm2, %v9433_v31 }
 0x848   :  { %v8305_v25 = vpop.f32.mrb[18].mxu1 }
 0x849   :  { %v1337_v26 = vadd.f32 1e-16, %v8305_v25  ;;  %v1331_v27 = vpop.f32.mrb[19].mxu1 }
 0x84a   :  { %v1332_v32 = vadd.f32 1e-16, %v1331_v27 }
 0x84b   :  { %9107 = vrcp.f32 %v1337_v26  ;;  %v7646_v26 = vld [vmem:[%s10531_s5 + $0xa8] ss:$0 sm:$0xff] }
 0x84c   :  { %v8308_v33 = vpop.f32.mrb[20].mxu1  ;;  %9109 = vrcp.f32 %v1332_v32 }
 0x84d   :  { %v1347_v34 = vadd.f32 1e-16, %v8308_v33  ;;  %v1341_v35 = vpop.f32.mrb[21].mxu1 }
 0x84e   :  { %v1342_v36 = vadd.f32 1e-16, %v1341_v35 }
 0x84f   :  { %9111 = vrcp.f32 %v1347_v34  ;;  %v9280_v34 = vmov 1  }
 0x850   :  { %9113 = vrcp.f32 %v1342_v36  ;;  %v1868_v36 = vld [vmem:[%s10531_s5 + $0xb0] sm:$0xff] }
 0x855   :  { %v9108_v37 = vpop.eup %9107 }
 0x856   :  { %v1355_v38 = vmul.f32 %v9108_v37, %v9100_v18  ;;  %v9110_v39 = vpop.eup %9109  ;;  %v1869_v37 = vld [vmem:[%s10531_s5 + $0xb8] sm:$0xff] }
 0x857   :  { %v1354_v40 = vmul.f32 %v9110_v39, %v9102_v19 }
 0x858   :  { %1365 = vperm.xlu1 %9069, %v1355_v38   ;;  %v8855_v38 = vpack.c.bf16 %v1869_v37, %v1868_v36 }
 0x859   :  { %v9112_v41 = vpop.eup %9111 }
 0x85a   :  { %v1357_v42 = vmul.f32 %v9112_v41, %v9106_v22  ;;  %v9114_v43 = vpop.eup %9113 }
 0x85b   :  { %v1356_v44 = vmul.f32 %v9114_v43, %v9104_v21 }
 0x85c   :  { %1360 = vperm.xlu1 %9069, %v1354_v40  }
 0x860   :  { %1375 = vperm.xlu1 %9069, %v1357_v42  }
 0x864   :  { %1370 = vperm.xlu1 %9069, %v1356_v44  }
 0x88d   :  { %69 = vxpose.xlu1.b32.start [1/4] (short) (narrow) %v9377_v11, 16 }
 0x891   :  { %70 = vxpose.xlu1.b32.cont [2/4] (short) (narrow) %v9382_v12, 16 }
 0x895   :  { %71 = vxpose.xlu1.b32.cont [3/4] (short) (narrow) %v9387_v13, 16 }
 0x899   :  { %72 = vxpose.xlu1.b32.end [4/4] (short) (narrow) %v9398_v14, 16 }
 0x8d7   :  { %v1366_v46 = vpop.permute.xlu1 %1365 }
 0x8d8   :  { %v1379_v48 = vmul.f32 %v1366_v46, %v863_v62  ;;  %v1555_v62 = vld [vmem:[%s10531_s5 + $0x60] sm:$0xf] }
 0x8d9   :  { %8330 = vmatprep.subr.msk.mxu1 %vm889_vm5, %v1555_v62 }
 0x8db   :  { %v1361_v47 = vpop.permute.xlu1 %1360 }
 0x8dc   :  { %v1378_v49 = vmul.f32 %v1361_v47, %v862_v60 }
 0x8de   :  { %v8847_v51 = vpack.c.bf16 %v1379_v48, %v1378_v49 }
 0x8df   :  { %v1376_v52 = vpop.permute.xlu1 %1375 }
 0x8e0   :  { %8848 = vmatprep.subr.bf16.mxu0 %v8847_v51  ;;  %v1381_v56 = vmul.f32 %v1376_v52, %v865_v7  ;;  %v7643_v7 = vld [vmem:[%s10531_s5 + $0x70] ss:$0 sm:$0xff] }
 0x8e1   :  { %8850 = vmatpush3.bf16.msra.mxu0 %v8847_v51 }
 0x8e3   :  { %v1371_v54 = vpop.permute.xlu1 %1370 }
 0x8e4   :  { %v1380_v61 = vmul.f32 %v1371_v54, %v864_v6 }
 0x8e6   :  { %v8851_v10 = vpack.c.bf16 %v1381_v56, %v1380_v61 }
 0x8e8   :  { %8852 = vmatprep.subr.bf16.mxu0 %v8851_v10 }
 0x8e9   :  { %8854 = vmatpush3.bf16.msra.mxu0 %v8851_v10 }
 0x8ea   :  { %8320 = vmatprep.subr.msk.mxu0 %vm561_vm3, %v1463_v57 }
 0x90d   :  { %v9587_v59 = vpop.trf.xlu1 }
 0x90e   :  { %8317 = vmatprep.mubr.msk.f32.mxu0 %vm1183_vm11, %v9587_v59 }
 0x911   :  { %v9591_v60 = vpop.trf.xlu1 }
 0x912   :  { %8318 = vmatmul.mubr.msk.f32.vlgmr.msra.gmra.mrb[12].mxu0 %vm1183_vm11, %v9591_v60 }
 0x913   :  { %8321 = vmatpush3.msk.msra.mxu0 %vm561_vm3, %v1463_v57  ;;  %8322 = vmatprep.mubr.msk.f32.mxu0 %vm548_vm4, %v9365_v8  ;;  %vm9284_vm3 = vmmov 0  }
 0x914   :  { %8335 = vmatprep.subr.msk.mxu0 %vm154_vm0, %v1770_v63 }
 0x916   :  { %8323 = vmatmul.mubr.msk.f32.vlgmr.msra.gmra.mrb[14].mxu0 %vm548_vm4, %v9370_v9  ;;  %vm3541_vm4 = vcmask 1041408  }
 0x917   :  { %8337 = vmatprep.mubr.msk.f32.mxu0 %vm141_vm1, %v9329_v1  ;;  %8336 = vmatpush3.msk.msra.mxu0 %vm154_vm0, %v1770_v63 }
 0x91a   :  { %8338 = vmatmul.mubr.msk.f32.vlgmr.msra.gmra.mrb[16].mxu0 %vm141_vm1, %v9334_v2  ;;  %v7633_v2 = vld [vmem:[%s10531_s5 + $0x58] ss:$0 sm:$0xff] }
 0x91b   :  { %8340 = vmatprep.mubr.msk.f32.mxu0 %vm141_vm1, %v9342_v3 }
 0x91e   :  { %8341 = vmatmul.mubr.msk.f32.gmra.mrb[18].mxu0 %vm141_vm1, %v9352_v4 }
 0x91f   :  { %8357 = vmatprep.mubr.msk.f32.mxu0 %vm254_vm2, %v9377_v11 }
 0x9e5   :  { %v9619_v1 = vpop.f32.mrb[12].mxu0 }
 0x9e6   :  { %v9621_v8 = vpop.f32.mrb[13].mxu0 }
 0x9e7   :  { %8327 = vmatprep.mubr.msk.f32.mxu1 %vm876_vm6, %v9621_v8 }
 0x9e8   :  { %8328 = vmatmul.mubr.msk.f32.vlgmr.msra.gmra.mrb[22].mxu1 %vm876_vm6, %v9619_v1 }
 0x9e9   :  { %v8324_v3 = vpop.f32.mrb[14].mxu0  ;;  %8331 = vmatpush3.msk.msra.mxu1 %vm889_vm5, %v1555_v62 }
 0x9ea   :  { %v9631_v4 = vadd.f32 %v8324_v3, %v7633_v2  ;;  %v1544_v9 = vpop.f32.mrb[15].mxu0  ;;  %8856 = vmatprep.subr.bf16.mxu1 %v8855_v38 }
 0x9eb   :  { %v1545_v11 = vadd.f32 %v7633_v2, %v1544_v9  ;;  %v2345_v9 = vld [vmem:[%s10531_s5 + $0xe0] sm:$0xff] }
 0x9ec   :  { %v1554_v6 = vmax.f32 %v9631_v4, 0.0 }
 0x9ed   :  { %v1553_v5 = vmax.f32 %v1545_v11, 0.0  ;;  %v8339_v25 = vpop.f32.mrb[16].mxu0 }
 0x9ee   :  { %v1845_v27 = vpop.f32.mrb[17].mxu0  ;;  %v1851_v33 = vadd.f32 %v8339_v25, %v7646_v26 }
 0x9ef   :  { %8332 = vmatprep.mubr.msk.f32.mxu1 %vm876_vm6, %v1553_v5  ;;  %v1846_v32 = vadd.f32 %v7646_v26, %v1845_v27 }
 0x9f0   :  { %8333 = vmatmul.mubr.msk.f32.vlgmr.msra.gmra.mrb[22].mxu1 %vm876_vm6, %v1554_v6  ;;  %v1865_v39 = vmax.f32 %v1851_v33, 0.0 }
 0x9f1   :  { %v1864_v35 = vmax.f32 %v1846_v32, 0.0  ;;  %v8342_v40 = vpop.f32.mrb[18].mxu0  ;;  %8858 = vmatpush3.bf16.msra.mxu1 %v8855_v38 }
 0x9f2   :  { %v1861_v41 = vadd.f32 %v8342_v40, %v7646_v26  ;;  %v1855_v42 = vpop.f32.mrb[19].mxu0 }
 0x9f3   :  { %8347 = vmatprep.mubr.msk.f32.mxu1 %vm254_vm2, %v1864_v35  ;;  %v1856_v43 = vadd.f32 %v7646_v26, %v1855_v42 }
 0x9f4   :  { %v1867_v44 = vmax.f32 %v1861_v41, 0.0  ;;  %8348 = vmatmul.mubr.msk.f32.vlgmr.msra.gmra.mrb[24].mxu1 %vm254_vm2, %v1865_v39  ;;  %v7680_v41 = vld [vmem:[%s10531_s5 + $0x120] ss:$0 sm:$0xff] }
 0x9f5   :  { %v1866_v45 = vmax.f32 %v1856_v43, 0.0 }
 0x9f7   :  { %8350 = vmatprep.mubr.msk.f32.mxu1 %vm254_vm2, %v1866_v45 }
 0x9f8   :  { %8351 = vmatmul.mubr.msk.f32.gmra.mrb[26].mxu1 %vm254_vm2, %v1867_v44 }
 0x9f9   :  { %8367 = vmatprep.mubr.msk.f32.mxu1 %vm254_vm2, %v9410_v28 }
 0xac3   :  { %v8334_v15 = vpop.f32.mrb[22].mxu1 }
 0xac4   :  { %v1731_v16 = vadd.f32 %v8334_v15, %v7643_v7  ;;  %v1716_v17 = vpop.f32.mrb[23].mxu1 }
 0xac5   :  { %v1730_v18 = vadd.f32 %v7643_v7, %v1716_v17 }
 0xac6   :  { %v7645_v19 = vmul.f32 -1.442695, %v1731_v16 }
 0xac7   :  { %v7644_v20 = vmul.f32 -1.442695, %v1730_v18 }
 0xac8   :  { %9115 = vpow2.f32 %v7645_v19  ;;  %v7652_v19 = vld [vmem:[%s10531_s5 + $0xc0] ss:$0 sm:$0xff] }
 0xac9   :  { %9117 = vpow2.f32 %v7644_v20 }
 0xad2   :  { %v9116_v21 = vpop.eup %9115 }
 0xad3   :  { %v9118_v22 = vpop.eup %9117  ;;  %v1739_v53 = vadd.f32 1.0, %v9116_v21 }
 0xad4   :  { %v1738_v0 = vadd.f32 1.0, %v9118_v22 }
 0xad5   :  { %9119 = vrcp.f32 %v1739_v53 }
 0xad6   :  { %9121 = vrcp.f32 %v1738_v0  ;;  %v2464_v0 = vld [vmem:[%s10531_s5 + $0x118] sm:$0xff] }
 0xadf   :  { %v9120_v23 = vpop.eup %9119 }
 0xae0   :  { %v9122_v24 = vpop.eup %9121  ;;  %1751 = vperm.xlu1 %9069, %v9120_v23  }
 0xae1   :  { %1746 = vperm.xlu0 %9070, %v9122_v24  }
 0xae5   :  { %9071 = vset.pattern.permute.xlu0 %v9280_v34 }
 0xae6   :  { %1757 = vperm.xlu0 %9071, %v9122_v24  }
 0xaea   :  { %1761 = vperm.xlu0 %9071, %v9120_v23   ;;  %v7679_v23 = vld [vmem:[%s10531_s5 + $0xe8] ss:$0 sm:$0xff] }
 0xaee   :  { %9072 = vset.pattern.permute.xlu0 %v9279_v50 }
 0xb5f   :  { %v1752_v49 = vpop.permute.xlu1 %1751 }
 0xb60   :  { %v1747_v46 = vpop.permute.xlu0 %1746  ;;  %v1755_v54 = vmul.f32 %v9619_v1, %v1752_v49  ;;  %v8349_v1 = vpop.f32.mrb[24].mxu1 }
 0xb61   :  { %v1754_v51 = vmul.f32 %v1747_v46, %v9621_v8  ;;  %v2143_v8 = vld [vmem:[%s10531_s5 + $0xd0] sm:$0xf]  ;;  %v1953_v2 = vpop.f32.mrb[25].mxu1  ;;  %v1959_v21 = vadd.f32 %v8349_v1, %v7652_v19 }
 0xb62   :  { %v8352_v3 = vpop.f32.mrb[26].mxu1  ;;  %v1954_v20 = vadd.f32 %v7652_v19, %v1953_v2 }
 0xb63   :  { %v1963_v4 = vpop.f32.mrb[27].mxu1  ;;  %v1969_v53 = vadd.f32 %v8352_v3, %v7652_v19 }
 0xb64   :  { %v1964_v22 = vadd.f32 %v7652_v19, %v1963_v4 }
 0xb65   :  { %v1758_v47 = vpop.permute.xlu0 %1757 }
 0xb66   :  { %v1764_v48 = vmul.f32 %v1758_v47, %v1553_v5 }
 0xb68   :  { %v9658_v56 = vadd.f32 %v1764_v48, %v1754_v51  ;;  %v2592_v51 = vld [vmem:[%s10531_s5 + $0x128] sm:$0xff] }
 0xb69   :  { %v1762_v52 = vpop.permute.xlu0 %1761 }
 0xb6a   :  { %v1765_v61 = vmul.f32 %v1762_v52, %v1554_v6  ;;  %v1768_v57 = vmax.f32 %v9658_v56, 0.0  ;;  %v2593_v52 = vld [vmem:[%s10531_s5 + $0x130] sm:$0xff] }
 0xb6c   :  { %v9660_v10 = vadd.f32 %v1765_v61, %v1755_v54  ;;  %v8871_v54 = vpack.c.bf16 %v2593_v52, %v2592_v51 }
 0xb6e   :  { %v1769_v62 = vmax.f32 %v9660_v10, 0.0 }
 0xb70   :  { %v8859_v63 = vpack.c.bf16 %v1769_v62, %v1768_v57 }
 0xb72   :  { %8860 = vmatprep.subr.bf16.mxu0 %v8859_v63  ;;  %8864 = vmatprep.subr.bf16.mxu1 %v8859_v63 }
 0xb73   :  { %8862 = vmatpush3.bf16.msra.mxu0 %v8859_v63  ;;  %8866 = vmatpush3.bf16.msra.mxu1 %v8859_v63 }
 0xb74   :  { %8373 = vmatprep.subr.msk.mxu0 %vm889_vm5, %v2143_v8  ;;  %8399 = vmatprep.subr.mxu1 %v2464_v0 }
 0xb76   :  { %8368 = vmatmul.mubr.msk.f32.vlgmr.msra.gmra.mrb[28].mxu1 %vm254_vm2, %v9419_v29  ;;  %8358 = vmatmul.mubr.msk.f32.vlgmr.msra.gmra.mrb[20].mxu0 %vm254_vm2, %v9382_v12  ;;  %v2142_v12 = vld [vmem:[%s10531_s5 + $0xc8] sm:$0xf] }
 0xb77   :  { %8370 = vmatprep.mubr.msk.f32.mxu1 %vm254_vm2, %v9424_v30  ;;  %8360 = vmatprep.mubr.msk.f32.mxu0 %vm254_vm2, %v9387_v13  ;;  %v2344_v13 = vld [vmem:[%s10531_s5 + $0xd8] sm:$0xff] }
 0xb78   :  { %8374 = vmatpush3.msk.msra.mxu0 %vm889_vm5, %v2143_v8  ;;  %v8867_v7 = vpack.c.bf16 %v2345_v9, %v2344_v13  ;;  %8400 = vmatpush3.msra.mxu1 %v2464_v0 }
 0xb79   :  { %8381 = vmatprep.subr.msk.mxu0 %vm889_vm5, %v2142_v12  ;;  %8872 = vmatprep.subr.bf16.mxu1 %v8871_v54 }
 0xb7a   :  { %8371 = vmatmul.mubr.msk.f32.gmra.mrb[30].mxu1 %vm254_vm2, %v9433_v31  ;;  %8361 = vmatmul.mubr.msk.f32.gmra.mrb[22].mxu0 %vm254_vm2, %v9398_v14 }
 0xc49   :  { %v8369_v11 = vpop.f32.mrb[28].mxu1  ;;  %v8359_v14 = vpop.f32.mrb[20].mxu0 }
 0xc4a   :  { %v2123_v5 = vpop.f32.mrb[29].mxu1  ;;  %v2038_v6 = vpop.f32.mrb[21].mxu0 }
 0xc4b   :  { %8375 = vmatprep.mubr.msk.f32.mxu0 %vm876_vm6, %v2123_v5 }
 0xc4c   :  { %8376 = vmatmul.mubr.msk.f32.vlgmr.msra.gmra.mrb[24].mxu0 %vm876_vm6, %v8369_v11 }
 0xc4d   :  { %v8372_v15 = vpop.f32.mrb[30].mxu1  ;;  %8382 = vmatpush3.msk.msra.mxu0 %vm889_vm5, %v2142_v12  ;;  %v8362_v16 = vpop.f32.mrb[22].mxu0 }
 0xc4e   :  { %v2133_v17 = vpop.f32.mrb[31].mxu1  ;;  %v2048_v18 = vpop.f32.mrb[23].mxu0  ;;  %8868 = vmatprep.subr.bf16.mxu0 %v8867_v7 }
 0xc4f   :  { %8378 = vmatprep.mubr.msk.f32.mxu0 %vm876_vm6, %v2133_v17 }
 0xc50   :  { %8379 = vmatmul.mubr.msk.f32.gmra.mrb[26].mxu0 %vm876_vm6, %v8372_v15 }
 0xc51   :  { %8383 = vmatprep.mubr.msk.f32.mxu0 %vm876_vm6, %v2038_v6 }
 0xc54   :  { %8384 = vmatmul.mubr.msk.f32.vlgmr.msra.gmra.mrb[24].mxu0 %vm876_vm6, %v8359_v14 }
 0xc55   :  { %8386 = vmatprep.mubr.msk.f32.mxu0 %vm876_vm6, %v2048_v18  ;;  %8870 = vmatpush3.bf16.msra.mxu0 %v8867_v7 }
 0xc58   :  { %8387 = vmatmul.mubr.msk.f32.gmra.mrb[26].mxu0 %vm876_vm6, %v8362_v16 }
 0xc59   :  { %8393 = vmatprep.mubr.msk.f32.mxu0 %vm254_vm2, %v1954_v20  ;;  %v7685_v20 = vld [vmem:[%s10531_s5 + $0x138] ss:$0 sm:$0xff] }
 0xc5c   :  { %8394 = vmatmul.mubr.msk.f32.vlgmr.msra.gmra.mrb[24].mxu0 %vm254_vm2, %v1959_v21 }
 0xc5d   :  { %8396 = vmatprep.mubr.msk.f32.mxu0 %vm254_vm2, %v1964_v22 }
 0xc60   :  { %8397 = vmatmul.mubr.msk.f32.gmra.mrb[26].mxu0 %vm254_vm2, %v1969_v53 }
 0xc61   :  { %8432 = vmatprep.mubr.msk.f32.mxu0 %vm254_vm2, %v9410_v28 }
 0xd2f   :  { %v8395_v24 = vpop.f32.mrb[24].mxu0 }
 0xd30   :  { %v9719_v25 = vadd.f32 %v8395_v24, %v7679_v23  ;;  %v2424_v26 = vpop.f32.mrb[25].mxu0 }
 0xd31   :  { %v9721_v27 = vadd.f32 %v7679_v23, %v2424_v26 }
 0xd32   :  { %v2457_v35 = vmax.f32 %v9719_v25, 0.0 }
 0xd33   :  { %v2456_v32 = vmax.f32 %v9721_v27, 0.0  ;;  %v8398_v33 = vpop.f32.mrb[26].mxu0 }
 0xd34   :  { %v9725_v36 = vadd.f32 %v8398_v33, %v7679_v23  ;;  %v2434_v37 = vpop.f32.mrb[27].mxu0 }
 0xd35   :  { %v9727_v38 = vadd.f32 %v7679_v23, %v2434_v37  ;;  %8401 = vmatprep.mubr.msk.f32.mxu1 %vm2470_vm12, %v2456_v32 }
 0xd36   :  { %8402 = vmatmul.mubr.msk.f32.vlgmr.msra.gmra.mrb[32].mxu1 %vm2470_vm12, %v2457_v35  ;;  %v2459_v40 = vmax.f32 %v9725_v36, 0.0 }
 0xd37   :  { %v2458_v39 = vmax.f32 %v9727_v38, 0.0  ;;  %8874 = vmatpush3.bf16.msra.mxu1 %v8871_v54 }
 0xd39   :  { %8404 = vmatprep.mubr.msk.f32.mxu1 %vm2470_vm12, %v2458_v39 }
 0xd3a   :  { %8405 = vmatmul.mubr.msk.f32.gmra.mrb[34].mxu1 %vm2470_vm12, %v2459_v40 }
 0xe09   :  { %v8403_v42 = vpop.f32.mrb[32].mxu1 }
 0xe0a   :  { %v2555_v43 = vadd.f32 %v8403_v42, %v7680_v41  ;;  %v2549_v44 = vpop.f32.mrb[33].mxu1 }
 0xe0b   :  { %v2550_v45 = vadd.f32 %v7680_v41, %v2549_v44 }
 0xe0c   :  { %9123 = vtanh.f32 %v2555_v43 }
 0xe0d   :  { %9125 = vtanh.f32 %v2550_v45  ;;  %v8406_v46 = vpop.f32.mrb[34].mxu1 }
 0xe0e   :  { %v2565_v47 = vadd.f32 %v8406_v46, %v7680_v41  ;;  %v2559_v48 = vpop.f32.mrb[35].mxu1 }
 0xe0f   :  { %v2560_v49 = vadd.f32 %v7680_v41, %v2559_v48 }
 0xe10   :  { %9127 = vtanh.f32 %v2565_v47 }
 0xe11   :  { %9129 = vtanh.f32 %v2560_v49 }
 0xe12   :  { %9131 = vtanh.f32 %v9719_v25  ;;  %v3129_v25 = vld [vmem:[%s10531_s5 + $0x108] sm:$0xff] }
 0xe13   :  { %9133 = vtanh.f32 %v9721_v27  ;;  %v3128_v27 = vld [vmem:[%s10531_s5 + $0x100] sm:$0xff] }
 0xe14   :  { %9135 = vtanh.f32 %v9725_v36 }
 0xe15   :  { %9137 = vtanh.f32 %v9727_v38 }
 0xe16   :  { %v9124_v61 = vpop.eup %9123 }
 0xe17   :  { %v9126_v63 = vpop.eup %9125  ;;  %2578 = vrot.lane.b32.xlu1 %v9124_v61, %s9281_s0 }
 0xe18   :  { %2576 = vrot.lane.b32.xlu0 %v9126_v63, %s9281_s0 }
 0xe1a   :  { %v9128_v8 = vpop.eup %9127 }
 0xe1b   :  { %v9130_v1 = vpop.eup %9129  ;;  %2582 = vrot.lane.b32.xlu1 %v9128_v8, %s9281_s0 }
 0xe1c   :  { %2580 = vrot.lane.b32.xlu0 %v9130_v1, %s9281_s0  ;;  %v9132_v2 = vpop.eup %9131 }
 0xe1d   :  { %v9134_v4 = vpop.eup %9133 }
 0xe1e   :  { %v9136_v11 = vpop.eup %9135 }
 0xe1f   :  { %v9138_v5 = vpop.eup %9137 }
 0xe89   :  { %v2579_v3 = vpop.permute.xlu1 %2578 }
 0xe8a   :  { %v2589_v12 = vmul.f32 %v9132_v2, %v2579_v3  ;;  %v2577_v13 = vpop.permute.xlu0 %2576 }
 0xe8b   :  { %v2588_v9 = vmul.f32 %v9134_v4, %v2577_v13  ;;  %v9788_v13 = vld [vmem:[%s10535_s2 + $0x8] sm:$0xff] }
 0xe8c   :  { %2605 = vrot.lane.b32.xlu1 %v2589_v12, %s9282_s20 }
 0xe8d   :  { %v2583_v14 = vpop.permute.xlu1 %2582  ;;  %2603 = vrot.lane.b32.xlu0 %v2588_v9, %s9282_s20 }
 0xe8e   :  { %v2591_v6 = vmul.f32 %v9136_v11, %v2583_v14  ;;  %v2581_v7 = vpop.permute.xlu0 %2580  ;;  %v9794_v11 = vld [vmem:[%s10535_s2] sm:$0xff] }
 0xe8f   :  { %v2590_v15 = vmul.f32 %v9138_v5, %v2581_v7  ;;  %v9802_v7 = vld [vmem:[%s10535_s2 + $0x10] sm:$0xff] }
 0xe90   :  { %2609 = vrot.lane.b32.xlu1 %v2591_v6, %s9282_s20 }
 0xe91   :  { %2607 = vrot.lane.b32.xlu0 %v2590_v15, %s9282_s20 }
 0xefe   :  { %v2606_v16 = vpop.permute.xlu1 %2605 }
 0xeff   :  { %v2604_v17 = vpop.permute.xlu0 %2603 }
 0xf00   :  { %8411 = vmatprep.mubr.msk.f32.mxu1 %vm254_vm2, %v2604_v17  ;;  %v9809_v17 = vld [vmem:[%s10535_s2 + $0x18] sm:$0xff] }
 0xf01   :  { %8412 = vmatmul.mubr.msk.f32.vlgmr.msra.gmra.mrb[36].mxu1 %vm254_vm2, %v2606_v16 }
 0xf02   :  { %v2610_v19 = vpop.permute.xlu1 %2609 }
 0xf03   :  { %v2608_v18 = vpop.permute.xlu0 %2607 }
 0xf04   :  { %8414 = vmatprep.mubr.msk.f32.mxu1 %vm254_vm2, %v2608_v18 }
 0xf05   :  { %8415 = vmatmul.mubr.msk.f32.gmra.mrb[38].mxu1 %vm254_vm2, %v2610_v19 }
 0xf06   :  { %8425 = vmatprep.mubr.msk.f32.mxu1 %vm1183_vm11, %v9550_v55 }
 0xfd4   :  { %v8413_v21 = vpop.f32.mrb[36].mxu1 }
 0xfd5   :  { %v2691_v22 = vadd.f32 %v8413_v21, %v7685_v20  ;;  %v2685_v53 = vpop.f32.mrb[37].mxu1 }
 0xfd6   :  { %v2686_v0 = vadd.f32 %v7685_v20, %v2685_v53 }
 0xfd7   :  { %2711 = vperm.xlu1 %9069, %v2691_v22  }
 0xfd8   :  { %2706 = vperm.xlu0 %9072, %v2686_v0   ;;  %v8416_v23 = vpop.f32.mrb[38].mxu1 }
 0xfd9   :  { %v2701_v24 = vadd.f32 %v8416_v23, %v7685_v20  ;;  %v2695_v26 = vpop.f32.mrb[39].mxu1 }
 0xfda   :  { %v2696_v33 = vadd.f32 %v7685_v20, %v2695_v26 }
 0xfdc   :  { %2721 = vperm.xlu0 %9072, %v2701_v24   ;;  %2716 = vperm.xlu1 %9069, %v2696_v33  }
0x1056   :  { %v2712_v37 = vpop.permute.xlu1 %2711 }
0x1057   :  { %v2707_v41 = vpop.permute.xlu0 %2706  ;;  %v2725_v42 = vsel %vm1115_vm7, %v2712_v37, -1e+30 }
0x1058   :  { %v2724_v43 = vsel %vm1114_vm8, %v2707_v41, -1e+30  ;;  %v2729_v44 = vsel %vm254_vm2, %v2725_v42, -inf }
0x1059   :  { %v2728_v45 = vsel %vm254_vm2, %v2724_v43, -inf }
0x105a   :  { %v2732_v54 = vmax.f32 %v2728_v45, %v2729_v44 }
0x105b   :  { %v2717_v46 = vpop.permute.xlu1 %2716  ;;  %v2722_v47 = vpop.permute.xlu0 %2721 }
0x105c   :  { %v2726_v48 = vsel %vm1116_vm10, %v2717_v46, -1e+30  ;;  %v2727_v49 = vsel %vm1117_vm9, %v2722_v47, -1e+30 }
0x105d   :  { %v2730_v51 = vsel %vm254_vm2, %v2726_v48, -inf  ;;  %v2731_v52 = vsel %vm254_vm2, %v2727_v49, -inf }
0x105e   :  { %v2733_v61 = vmax.f32 %v2730_v51, %v2731_v52 }
0x1060   :  { %v2734_v63 = vmax.f32 %v2732_v54, %v2733_v61  ;;  %v3036_v54 = vld [vmem:[%s10531_s5 + $0xf0] sm:$0xf] }
0x1062   :  { %v2735_v8 = vrot.slane %v2734_v63, 4 }
0x1064   :  { %v2736_v1 = vmax.f32 %v2734_v63, %v2735_v8 }
0x1066   :  { %v2737_v2 = vrot.slane %v2736_v1, 2 }
0x1068   :  { %v2738_v3 = vmax.f32 %v2736_v1, %v2737_v2 }
0x106a   :  { %v2739_v4 = vrot.slane %v2738_v3, 1 }
0x106c   :  { %v2740_v12 = vmax.f32 %v2738_v3, %v2739_v4 }
0x106e   :  { %v2742_v9 = vmul.f32 %v9788_v13, %v2740_v12  ;;  %v2741_v14 = vmul.f32 %v9794_v11, %v2740_v12  ;;  %v2743_v15 = vmul.f32 %v9802_v7, %v2740_v12  ;;  %v2744_v18 = vmul.f32 %v9809_v17, %v2740_v12 }
0x1070   :  { %v2748_v5 = vsel %vm254_vm2, %v2742_v9, 0.0  ;;  %v2745_v6 = vsel %vm254_vm2, %v2741_v14, 0.0  ;;  %v2751_v16 = vsel %vm254_vm2, %v2743_v15, 0.0  ;;  %v2754_v19 = vsel %vm254_vm2, %v2744_v18, 0.0 }
0x1071   :  { %2749 = vadd.xlane.f32.xlu0 %v2748_v5  ;;  %2746 = vadd.xlane.f32.xlu1 %v2745_v6 }
0x1075   :  { %2752 = vadd.xlane.f32.xlu0 %v2751_v16 }
0x1079   :  { %2755 = vadd.xlane.f32.xlu0 %v2754_v19 }
0x10fe   :  { %v2750_v20 = vpop.xlane.xlu0 %2749  ;;  %v2747_v21 = vpop.xlane.xlu1 %2746 }
0x10ff   :  { %v2758_v53 = vsub.f32 %v2691_v22, %v2750_v20  ;;  %v2757_v23 = vsub.f32 %v2686_v0, %v2747_v21 }
0x1101   :  { %v2763_v26 = vmul.f32 1.442695, %v2758_v53  ;;  %v2761_v37 = vmul.f32 1.442695, %v2757_v23 }
0x1102   :  { %v2753_v41 = vpop.xlane.xlu0 %2752 }
0x1103   :  { %9139 = vpow2.f32 %v2763_v26  ;;  %v2759_v42 = vsub.f32 %v2696_v33, %v2753_v41 }
0x1104   :  { %9141 = vpow2.f32 %v2761_v37 }
0x1105   :  { %v2765_v43 = vmul.f32 1.442695, %v2759_v42 }
0x1106   :  { %v2756_v44 = vpop.xlane.xlu0 %2755 }
0x1107   :  { %v2760_v45 = vsub.f32 %v2701_v24, %v2756_v44  ;;  %9143 = vpow2.f32 %v2765_v43  ;;  %v7706_v44 = vld [vmem:[%s10531_s5 + $0x110] ss:$0 sm:$0xff] }
0x1109   :  { %v2767_v46 = vmul.f32 1.442695, %v2760_v45 }
0x110b   :  { %9145 = vpow2.f32 %v2767_v46 }
0x110d   :  { %v9140_v47 = vpop.eup %9139 }
0x110e   :  { %v9142_v48 = vpop.eup %9141 }
0x110f   :  { %v8875_v49 = vpack.c.bf16 %v9140_v47, %v9142_v48 }
0x1111   :  { %8876 = vmatprep.subr.bf16.mxu1 %v8875_v49  ;;  %v9144_v51 = vpop.eup %9143 }
0x1112   :  { %8878 = vmatpush3.bf16.msra.mxu1 %v8875_v49 }
0x1115   :  { %v9146_v22 = vpop.eup %9145 }
0x1116   :  { %v8879_v0 = vpack.c.bf16 %v9146_v22, %v9144_v51 }
0x1118   :  { %8880 = vmatprep.subr.bf16.mxu1 %v8879_v0 }
0x1119   :  { %8882 = vmatpush3.bf16.msra.mxu1 %v8879_v0 }
0x111c   :  { %8426 = vmatmul.mubr.msk.f32.vlgmr.msra.gmra.mrb[40].mxu1 %vm1183_vm11, %v9554_v58 }
0x111d   :  { %8446 = vmatprep.mubr.msk.f32.mxu1 %vm1183_vm11, %v9587_v59 }
0x11ef   :  { %v8427_v24 = vpop.f32.mrb[40].mxu1 }
0x11f0   :  { %v2835_v33 = vpop.f32.mrb[41].mxu1 }
0x11f1   :  { %v8883_v52 = vpack.c.bf16 %v8427_v24, %v2835_v33 }
0x11f3   :  { %8884 = vmatprep.subr.bf16.mxu0 %v8883_v52 }
0x11f4   :  { %8886 = vmatpush3.bf16.msra.mxu0 %v8883_v52 }
0x11f5   :  { %8449 = vmatprep.subr.msk.mxu0 %vm889_vm5, %v3036_v54 }
0x11f7   :  { %8433 = vmatmul.mubr.msk.f32.vlgmr.msra.gmra.mrb[28].mxu0 %vm254_vm2, %v9788_v13 }
0x11f8   :  { %8435 = vmatprep.mubr.msk.f32.mxu0 %vm254_vm2, %v9802_v7  ;;  %8450 = vmatpush3.msk.msra.mxu0 %vm889_vm5, %v3036_v54 }
0x11fb   :  { %8436 = vmatmul.mubr.msk.f32.gmra.mrb[30].mxu0 %vm254_vm2, %v9809_v17 }
0x11fc   :  { %8451 = vmatprep.mubr.msk.f32.mxu0 %vm876_vm6, %v1768_v57 }
0x11ff   :  { %8452 = vmatmul.mubr.msk.f32.vlgmr.msra.gmra.mrb[32].mxu0 %vm876_vm6, %v1769_v62 }
0x12ca   :  { %v8434_v61 = vpop.f32.mrb[28].mxu0 }
0x12cb   :  { %v2916_v63 = vadd.f32 1e-16, %v8434_v61  ;;  %v2910_v8 = vpop.f32.mrb[29].mxu0  ;;  %v3337_v61 = vld [vmem:[%s10531_s5 + $0x298] sm:$0xff] }
0x12cc   :  { %v2911_v1 = vadd.f32 1e-16, %v2910_v8  ;;  %8464 = vmatprep.subr.mxu0 %v3337_v61 }
0x12cd   :  { %9147 = vrcp.f32 %v2916_v63  ;;  %8465 = vmatpush3.msra.mxu0 %v3337_v61  ;;  %v3706_v61 = vld [vmem:[%s10531_s5 + $0x140] sm:$0x7] }
0x12ce   :  { %9149 = vrcp.f32 %v2911_v1  ;;  %v8437_v2 = vpop.f32.mrb[30].mxu0 }
0x12cf   :  { %v2920_v3 = vpop.f32.mrb[31].mxu0  ;;  %v2926_v4 = vadd.f32 1e-16, %v8437_v2 }
0x12d0   :  { %v2921_v12 = vadd.f32 1e-16, %v2920_v3 }
0x12d2   :  { %9151 = vrcp.f32 %v2921_v12  ;;  %v8453_v9 = vpop.f32.mrb[32].mxu0 }
0x12d3   :  { %v3117_v14 = vpop.f32.mrb[33].mxu0  ;;  %9153 = vrcp.f32 %v2926_v4 }
0x12d7   :  { %v9148_v56 = vpop.eup %9147 }
0x12d8   :  { %v9150_v57 = vpop.eup %9149  ;;  %v2934_v5 = vmul.f32 %v9148_v56, %v9140_v47 }
0x12d9   :  { %v2933_v10 = vmul.f32 %v9150_v57, %v9142_v48 }
0x12da   :  { %2944 = vperm.xlu0 %9072, %v2934_v5  }
0x12db   :  { %2939 = vperm.xlu1 %9069, %v2933_v10   ;;  %v7709_v10 = vld [vmem:[%s10531_s5 + $0x2a0] ss:$0 sm:$0xff] }
0x12dc   :  { %v9152_v62 = vpop.eup %9151 }
0x12dd   :  { %v2935_v6 = vmul.f32 %v9152_v62, %v9144_v51  ;;  %v9154_v15 = vpop.eup %9153 }
0x12de   :  { %9073 = vset.pattern.permute.xlu0 %v9280_v34  ;;  %v2936_v16 = vmul.f32 %v9154_v15, %v9146_v22 }
0x12df   :  { %2949 = vperm.xlu1 %9069, %v2935_v6  }
0x12e3   :  { %2954 = vperm.xlu1 %9069, %v2936_v16  }
0x1359   :  { %v2945_v18 = vpop.permute.xlu0 %2944 }
0x135a   :  { %v2958_v19 = vmul.f32 %v2945_v18, %v2457_v35  ;;  %v2940_v20 = vpop.permute.xlu1 %2939  ;;  %v9881_v18 = vld [vmem:[%s10536_s4] sm:$0xff] }
0x135b   :  { %v2957_v21 = vmul.f32 %v2940_v20, %v2456_v32  ;;  %v7698_v32 = vld [vmem:[%s10531_s5 + $0xf8] ss:$0 sm:$0xff]  ;;  %vm3424_vm15 = vcmp.gt.f32.partialorder %v9881_v18, 0.0 }
0x135c   :  { %v3118_v35 = vadd.f32 %v7698_v32, %v3117_v14 }
0x135d   :  { %v8887_v53 = vpack.c.bf16 %v2958_v19, %v2957_v21  ;;  %v9888_v19 = vld [vmem:[%s10536_s4 + $0x8] sm:$0xff] }
0x135e   :  { %v2950_v23 = vpop.permute.xlu1 %2949  ;;  %vm3425_vm14 = vcmp.gt.f32.partialorder %v9888_v19, 0.0 }
0x135f   :  { %8888 = vmatprep.subr.bf16.mxu1 %v8887_v53  ;;  %v2959_v37 = vmul.f32 %v2950_v23, %v2458_v39  ;;  %v3126_v39 = vmax.f32 %v3118_v35, 0.0 }
0x1360   :  { %8890 = vmatpush3.bf16.msra.mxu1 %v8887_v53 }
0x1362   :  { %v2955_v26 = vpop.permute.xlu1 %2954 }
0x1363   :  { %v2960_v41 = vmul.f32 %v2955_v26, %v2459_v40  ;;  %v3123_v40 = vadd.f32 %v8453_v9, %v7698_v32 }
0x1365   :  { %v8891_v42 = vpack.c.bf16 %v2960_v41, %v2959_v37  ;;  %v3127_v43 = vmax.f32 %v3123_v40, 0.0 }
0x1367   :  { %8892 = vmatprep.subr.bf16.mxu1 %v8891_v42 }
0x1368   :  { %8894 = vmatpush3.bf16.msra.mxu1 %v8891_v42 }
0x1369   :  { %8454 = vmatprep.subr.mxu1 %v3129_v25 }
0x136b   :  { %8447 = vmatmul.mubr.msk.f32.vlgmr.msra.gmra.mrb[42].mxu1 %vm1183_vm11, %v9591_v60 }
0x136c   :  { %8455 = vmatpush3.msra.mxu1 %v3129_v25 }
0x136d   :  { %8459 = vmatprep.subr.mxu1 %v3128_v27 }
0x143e   :  { %v8448_v36 = vpop.f32.mrb[42].mxu1 }
0x143f   :  { %v3027_v38 = vpop.f32.mrb[43].mxu1 }
0x1440   :  { %8456 = vmatprep.mubr.msk.f32.mxu1 %vm2470_vm12, %v3027_v38 }
0x1441   :  { %8457 = vmatmul.mubr.msk.f32.vlgmr.msra.gmra.mrb[44].mxu1 %vm2470_vm12, %v8448_v36 }
0x1442   :  { %8461 = vmatprep.mubr.msk.f32.mxu1 %vm2470_vm12, %v3126_v39  ;;  %8460 = vmatpush3.msra.mxu1 %v3128_v27 }
0x1449   :  { %8462 = vmatmul.mubr.msk.f32.vlgmr.msra.gmra.mrb[44].mxu1 %vm2470_vm12, %v3127_v43 }
0x144a   :  { %8478 = vmatprep.mubr.msk.f32.mxu1 %vm3438_vm13, %v9881_v18 }
0x151c   :  { %v8463_v45 = vpop.f32.mrb[44].mxu1 }
0x151d   :  { %v3298_v46 = vadd.f32 %v8463_v45, %v7706_v44  ;;  %v3283_v47 = vpop.f32.mrb[45].mxu1  ;;  %v9285_v45 = vmov 0.0  }
0x151e   :  { %v3297_v48 = vadd.f32 %v7706_v44, %v3283_v47  ;;  %v9283_v44 = vmov 0.0|0.0  }
0x151f   :  { %v7708_v49 = vmul.f32 -1.442695, %v3298_v46  ;;  %8895 = vmatprep.subr.bf16.mxu0 %v9283_v44 }
0x1520   :  { %v7707_v51 = vmul.f32 -1.442695, %v3297_v48 }
0x1521   :  { %9155 = vpow2.f32 %v7708_v49 }
0x1522   :  { %9157 = vpow2.f32 %v7707_v51 }
0x152b   :  { %v9156_v22 = vpop.eup %9155 }
0x152c   :  { %v9158_v0 = vpop.eup %9157  ;;  %v3306_v33 = vadd.f32 1.0, %v9156_v22 }
0x152d   :  { %v3305_v24 = vadd.f32 1.0, %v9158_v0 }
0x152f   :  { %9159 = vrcp.f32 %v3305_v24 }
0x1530   :  { %9161 = vrcp.f32 %v3306_v33 }
0x1539   :  { %v9160_v52 = vpop.eup %9159 }
0x153a   :  { %3324 = vperm.xlu0 %9073, %v9160_v52   ;;  %3313 = vperm.xlu1 %9069, %v9160_v52   ;;  %v9162_v54 = vpop.eup %9161 }
0x153e   :  { %3318 = vperm.xlu1 %9069, %v9162_v54   ;;  %9075 = vset.pattern.permute.xlu0 %v9279_v50 }
0x1542   :  { %9074 = vset.pattern.permute.xlu1 %v9280_v34 }
0x1543   :  { %3328 = vperm.xlu1 %9074, %v9162_v54  }
0x1547   :  { %9076 = vset.pattern.permute.xlu1 %v9279_v50 }
0x15b9   :  { %v3325_v63 = vpop.permute.xlu0 %3324  ;;  %v3314_v8 = vpop.permute.xlu1 %3313 }
0x15ba   :  { %v3331_v1 = vmul.f32 %v3325_v63, %v3126_v39  ;;  %v3321_v2 = vmul.f32 %v3314_v8, %v3027_v38 }
0x15bc   :  { %v3333_v3 = vadd.f32 %v3331_v1, %v3321_v2  ;;  %v9928_v1 = vld [vmem:[%s10532_s1] sm:$0xff]  ;;  %v9935_v2 = vld [vmem:[%s10532_s1 + $0x8] sm:$0xff] }
0x15bd   :  { %v3319_v4 = vpop.permute.xlu1 %3318 }
0x15be   :  { %v9867_v12 = vmax.f32 %v3333_v3, 0.0  ;;  %v3322_v14 = vmul.f32 %v8448_v36, %v3319_v4  ;;  %v9942_v3 = vld [vmem:[%s10532_s1 + $0x10] sm:$0xff]  ;;  %v9949_v4 = vld [vmem:[%s10532_s1 + $0x18] sm:$0xff]  ;;  %s9286_s1 = smov 16  }
0x15c0   :  { %8466 = vmatprep.mubr.msk.f32.mxu0 %vm2470_vm12, %v9867_v12 }
0x15c2   :  { %v3329_v9 = vpop.permute.xlu1 %3328 }
0x15c3   :  { %v3332_v56 = vmul.f32 %v3329_v9, %v3127_v43  ;;  %v9956_v9 = vld [vmem:[%s10534_s3] sm:$0xff] }
0x15c5   :  { %v3334_v57 = vadd.f32 %v3332_v56, %v3322_v14  ;;  %v9963_v14 = vld [vmem:[%s10534_s3 + $0x8] sm:$0xff]  ;;  %v9970_v56 = vld [vmem:[%s10534_s3 + $0x10] sm:$0xff] }
0x15c7   :  { %v9871_v5 = vmax.f32 %v3334_v57, 0.0  ;;  %v9977_v57 = vld [vmem:[%s10534_s3 + $0x18] sm:$0xff] }
0x15c9   :  { %8467 = vmatmul.mubr.msk.f32.vlgmr.msra.gmra.mrb[34].mxu0 %vm2470_vm12, %v9871_v5  ;;  %v8905_v8 = vpack.c.bf16 %v9871_v5, %v9867_v12 }
0x15ca   :  { %8473 = vmatprep.mubr.msk.f32.mxu0 %vm9284_vm3, %v9285_v45 }
0x169c   :  { %v8468_v62 = vpop.f32.mrb[34].mxu0 }
0x169d   :  { %v3421_v6 = vadd.f32 %v8468_v62, %v7709_v10  ;;  %v3415_v15 = vpop.f32.mrb[35].mxu0 }
0x169e   :  { %v3416_v16 = vadd.f32 %v7709_v10, %v3415_v15 }
0x169f   :  { %3433 = vperm.xlu1 %9076, %v3421_v6  }
0x16a0   :  { %3428 = vperm.xlu0 %9075, %v3416_v16  }
0x171e   :  { %v3434_v20 = vpop.permute.xlu1 %3433 }
0x171f   :  { %v3437_v21 = vsel %vm3425_vm14, %v3434_v20, -1e+30  ;;  %v3429_v53 = vpop.permute.xlu0 %3428 }
0x1720   :  { %v3440_v23 = vsel %vm3438_vm13, %v3437_v21, -inf  ;;  %v3436_v26 = vsel %vm3424_vm15, %v3429_v53, -1e+30 }
0x1721   :  { %v3439_v37 = vsel %vm3438_vm13, %v3436_v26, -inf }
0x1722   :  { %v3441_v41 = vmax.f32 %v3439_v37, %v3440_v23 }
0x1724   :  { %v3442_v42 = vrot.slane %v3441_v41, 4 }
0x1726   :  { %v3443_v25 = vmax.f32 %v3441_v41, %v3442_v42 }
0x1728   :  { %v3444_v27 = vrot.slane %v3443_v25, 2 }
0x172a   :  { %v3445_v32 = vmax.f32 %v3443_v25, %v3444_v27  ;;  %v7717_v25 = vld [vmem:[%s10531_s5 + $0x148] ss:$0 sm:$0xff]  ;;  %v3804_v27 = vld [vmem:[%s10531_s5 + $0x150] sm:$0xff] }
0x172c   :  { %v3446_v35 = vrot.slane %v3445_v32, 1 }
0x172e   :  { %v3447_v36 = vmax.f32 %v3445_v32, %v3446_v35  ;;  %v3805_v32 = vld [vmem:[%s10531_s5 + $0x158] sm:$0xff] }
0x1730   :  { %v3449_v38 = vmul.f32 %v3447_v36, %v9888_v19  ;;  %v3448_v39 = vmul.f32 %v3447_v36, %v9881_v18 }
0x1732   :  { %v3453_v40 = vsel %vm3438_vm13, %v3449_v38, 0.0  ;;  %v3450_v43 = vsel %vm3438_vm13, %v3448_v39, 0.0 }
0x1733   :  { %3454 = vadd.xlane.f32.xlu0 %v3453_v40  ;;  %3451 = vadd.xlane.f32.xlu1 %v3450_v43  ;;  %v8901_v40 = vpack.c.bf16 %v3805_v32, %v3804_v27 }
0x1760   :  { %101 = vxpose.xlu0.b32.start [1/2] (short) (narrow) %v9881_v18, 8 }
0x1764   :  { %102 = vxpose.xlu0.b32.end [2/2] (short) (narrow) %v9888_v19, 8 }
0x17c0   :  { %v3455_v46 = vpop.xlane.xlu0 %3454  ;;  %v3452_v47 = vpop.xlane.xlu1 %3451 }
0x17c1   :  { %v3457_v48 = vsub.f32 %v3421_v6, %v3455_v46  ;;  %v3456_v49 = vsub.f32 %v3416_v16, %v3452_v47 }
0x17c3   :  { %v3460_v51 = vmul.f32 1.442695, %v3457_v48  ;;  %v3458_v22 = vmul.f32 1.442695, %v3456_v49 }
0x17c5   :  { %9163 = vpow2.f32 %v3460_v51 }
0x17c6   :  { %9165 = vpow2.f32 %v3458_v22 }
0x17cf   :  { %v9164_v0 = vpop.eup %9163 }
0x17d0   :  { %v9166_v24 = vpop.eup %9165 }
0x17d1   :  { %v8896_v33 = vpack.c.bf16 %v9164_v0, %v9166_v24 }
0x17d3   :  { %8897 = vmatpush3.bf16.msra.mxu0 %v8896_v33 }
0x17d4   :  { %8898 = vmatprep.subr.bf16.mxu0 %v9283_v44 }
0x17e0   :  { %v9908_v52 = vpop.trf.xlu0 }
0x17e1   :  { %8474 = vmatmul.mubr.msk.f32.vlgmr.msra.gmra.mrb[36].mxu0 %vm254_vm2, %v9908_v52 }
0x17e2   :  { %8485 = vmatprep.mubr.msk.f32.mxu0 %vm9284_vm3, %v9285_v45 }
0x18b4   :  { %v3531_v54 = vpop.f32.mrb[36].mxu0 }
0x18b5   :  { %v8475_v63 = vpop.f32.mrb[37].mxu0  ;;  %8476 = vmatprep.subr.msk.mxu1 %vm3541_vm4, %v3531_v54 }
0x18b6   :  { %8477 = vmatpush3.msk.msra.mxu1 %vm3541_vm4, %v3531_v54  ;;  %v4078_v54 = vld [vmem:[%s10531_s5 + $0x168] sm:$0xff] }
0x18b7   :  { %8479 = vmatmul.mubr.msk.f32.vlgmr.msra.gmra.mrb[46].mxu1 %vm3438_vm13, %v9888_v19  ;;  %8488 = vmatprep.subr.msk.mxu1 %vm154_vm0, %v3706_v61  ;;  %v9276_v19 = vld [vmem:[%s10536_s4 + $0x8] sm:$0xff] }
0x18b8   :  { %8489 = vmatpush3.msk.msra.mxu1 %vm154_vm0, %v3706_v61  ;;  %8490 = vmatprep.mubr.msk.f32.mxu1 %vm141_vm1, %v9928_v1 }
0x18b9   :  { %8906 = vmatprep.subr.bf16.mxu1 %v8905_v8 }
0x18bb   :  { %8491 = vmatmul.mubr.msk.f32.vlgmr.msra.gmra.mrb[48].mxu1 %vm141_vm1, %v9935_v2 }
0x18bc   :  { %8908 = vmatpush3.bf16.msra.mxu1 %v8905_v8  ;;  %8493 = vmatprep.mubr.msk.f32.mxu1 %vm141_vm1, %v9942_v3 }
0x18bf   :  { %8494 = vmatmul.mubr.msk.f32.gmra.mrb[50].mxu1 %vm141_vm1, %v9949_v4 }
0x18c0   :  { %8510 = vmatprep.mubr.msk.f32.mxu1 %vm254_vm2, %v9956_v9 }
0x18c3   :  { %8511 = vmatmul.mubr.msk.f32.vlgmr.msra.gmra.mrb[52].mxu1 %vm254_vm2, %v9963_v14 }
0x18c4   :  { %8513 = vmatprep.mubr.msk.f32.mxu1 %vm254_vm2, %v9970_v56 }
0x18c7   :  { %8514 = vmatmul.mubr.msk.f32.gmra.mrb[54].mxu1 %vm254_vm2, %v9977_v57 }
0x198a   :  { %v8480_v10 = vpop.f32.mrb[46].mxu1 }
0x198b   :  { %v3611_v62 = vpop.f32.mrb[47].mxu1  ;;  %v3617_v6 = vadd.f32 1e-16, %v8480_v10 }
0x198c   :  { %v3612_v15 = vadd.f32 1e-16, %v3611_v62 }
0x198e   :  { %9167 = vrcp.f32 %v3612_v15  ;;  %v8492_v23 = vpop.f32.mrb[48].mxu1 }
0x198f   :  { %9169 = vrcp.f32 %v3617_v6  ;;  %v3781_v26 = vpop.f32.mrb[49].mxu1  ;;  %v3787_v48 = vadd.f32 %v8492_v23, %v7717_v25 }
0x1990   :  { %v3782_v39 = vadd.f32 %v7717_v25, %v3781_v26 }
0x1991   :  { %v3801_v51 = vmax.f32 %v3787_v48, 0.0 }
0x1992   :  { %v8495_v37 = vpop.f32.mrb[50].mxu1  ;;  %v3800_v46 = vmax.f32 %v3782_v39, 0.0  ;;  %v7748_v39 = vld [vmem:[%s10531_s5 + $0x188] ss:$0 sm:$0xff] }
0x1993   :  { %v3791_v41 = vpop.f32.mrb[51].mxu1  ;;  %v3797_v22 = vadd.f32 %v8495_v37, %v7717_v25 }
0x1994   :  { %v3792_v47 = vadd.f32 %v7717_v25, %v3791_v41  ;;  %v7723_v25 = vld [vmem:[%s10531_s5 + $0x160] ss:$0 sm:$0xff] }
0x1996   :  { %v3802_v49 = vmax.f32 %v3792_v47, 0.0  ;;  %v8512_v33 = vpop.f32.mrb[52].mxu1 }
0x1997   :  { %v3974_v61 = vpop.f32.mrb[53].mxu1 }
0x1998   :  { %v9168_v16 = vpop.eup %9167 }
0x1999   :  { %v3622_v20 = vmul.f32 %v9168_v16, %v9166_v24  ;;  %v9170_v21 = vpop.eup %9169  ;;  %v4079_v24 = vld [vmem:[%s10531_s5 + $0x170] sm:$0xff] }
0x199a   :  { %v3623_v53 = vmul.f32 %v9170_v21, %v9164_v0  ;;  %v3803_v0 = vmax.f32 %v3797_v22, 0.0  ;;  %8526 = vmatprep.subr.mxu1 %v4079_v24  ;;  %v8515_v63 = vpop.f32.mrb[54].mxu1  ;;  %v4274_v21 = vld [vmem:[%s10531_s5 + $0x178] sm:$0xff] }
0x199b   :  { %3626 = vperm.xlu1 %9076, %v3622_v20   ;;  %8527 = vmatpush3.msra.mxu1 %v4079_v24 }
0x199c   :  { %8534 = vmatprep.subr.mxu1 %v4078_v54 }
0x199f   :  { %3631 = vperm.xlu1 %9076, %v3623_v53   ;;  %v4275_v53 = vld [vmem:[%s10531_s5 + $0x180] sm:$0xff] }
0x19a0   :  { %v8913_v37 = vpack.c.bf16 %v4275_v53, %v4274_v21 }
0x1a1a   :  { %v3627_v42 = vpop.permute.xlu1 %3626 }
0x1a1b   :  { %v3634_v36 = vmul.f32 %v3627_v42, %v9867_v12 }
0x1a1e   :  { %v3632_v35 = vpop.permute.xlu1 %3631 }
0x1a1f   :  { %v3635_v38 = vmul.f32 %v3632_v35, %v9871_v5 }
0x1a21   :  { %v8899_v43 = vpack.c.bf16 %v3635_v38, %v3634_v36  ;;  %v4394_v38 = vld [vmem:[%s10531_s5 + $0x1b8] sm:$0xff] }
0x1a23   :  { %8900 = vmatpush3.bf16.msra.mxu0 %v8899_v43 }
0x1a24   :  { %8902 = vmatprep.subr.bf16.mxu0 %v8901_v40 }
0x1a26   :  { %8486 = vmatmul.mubr.msk.f32.vlgmr.msra.gmra.mrb[38].mxu0 %vm254_vm2, %v9908_v52 }
0x1a27   :  { %8904 = vmatpush3.bf16.msra.mxu0 %v8901_v40  ;;  %8500 = vmatprep.mubr.msk.f32.mxu0 %vm254_vm2, %v3800_v46 }
0x1a28   :  { %8910 = vmatprep.subr.bf16.mxu0 %v8905_v8 }
0x1a2a   :  { %8501 = vmatmul.mubr.msk.f32.vlgmr.msra.gmra.mrb[40].mxu0 %vm254_vm2, %v3801_v51 }
0x1a2b   :  { %8912 = vmatpush3.bf16.msra.mxu0 %v8905_v8  ;;  %8503 = vmatprep.mubr.msk.f32.mxu0 %vm254_vm2, %v3802_v49  ;;  %v3984_v8 = vpop.f32.mrb[55].mxu1 }
0x1a2c   :  { %8552 = vmatprep.subr.mxu0 %v4394_v38 }
0x1a2e   :  { %8504 = vmatmul.mubr.msk.f32.gmra.mrb[42].mxu0 %vm254_vm2, %v3803_v0 }
0x1a2f   :  { %8520 = vmatprep.mubr.msk.f32.mxu0 %vm254_vm2, %v9794_v11 }
0x1a32   :  { %8521 = vmatmul.mubr.msk.f32.vlgmr.msra.gmra.mrb[44].mxu0 %vm254_vm2, %v9788_v13 }
0x1a33   :  { %8523 = vmatprep.mubr.msk.f32.mxu0 %vm254_vm2, %v9802_v7  ;;  %8553 = vmatpush3.msra.mxu0 %v4394_v38 }
0x1a36   :  { %8524 = vmatmul.mubr.msk.f32.gmra.mrb[46].mxu0 %vm254_vm2, %v9809_v17 }
0x1af9   :  { %v10012_v10 = vpop.f32.mrb[38].mxu0 }
0x1afa   :  { %v8487_v62 = vpop.f32.mrb[39].mxu0 }
0x1afd   :  { %v8502_v6 = vpop.f32.mrb[40].mxu0 }
0x1afe   :  { %v3889_v15 = vpop.f32.mrb[41].mxu0  ;;  %v3895_v32 = vadd.f32 %v8502_v6, %v7723_v25 }
0x1aff   :  { %v3890_v27 = vadd.f32 %v7723_v25, %v3889_v15 }
0x1b01   :  { %v8505_v16 = vpop.f32.mrb[42].mxu0 }
0x1b02   :  { %v3899_v20 = vpop.f32.mrb[43].mxu0  ;;  %v3905_v36 = vadd.f32 %v8505_v16, %v7723_v25 }
0x1b03   :  { %v3900_v35 = vadd.f32 %v7723_v25, %v3899_v20 }
0x1b05   :  { %v8522_v23 = vpop.f32.mrb[44].mxu0 }
0x1b06   :  { %v4059_v26 = vpop.f32.mrb[45].mxu0 }
0x1b07   :  { %8528 = vmatprep.mubr.msk.f32.mxu1 %vm2470_vm12, %v4059_v26 }
0x1b08   :  { %8529 = vmatmul.mubr.msk.f32.vlgmr.msra.gmra.mrb[56].mxu1 %vm2470_vm12, %v8522_v23 }
0x1b09   :  { %v8525_v41 = vpop.f32.mrb[46].mxu0  ;;  %8535 = vmatpush3.msra.mxu1 %v4078_v54 }
0x1b0a   :  { %v4069_v42 = vpop.f32.mrb[47].mxu0  ;;  %8914 = vmatprep.subr.bf16.mxu1 %v8913_v37 }
0x1b0b   :  { %8531 = vmatprep.mubr.msk.f32.mxu1 %vm2470_vm12, %v4069_v42  ;;  %v4522_v42 = vld [vmem:[%s10531_s5 + $0x1d0] sm:$0xff] }
0x1b0c   :  { %8532 = vmatmul.mubr.msk.f32.gmra.mrb[58].mxu1 %vm2470_vm12, %v8525_v41  ;;  %v4521_v41 = vld [vmem:[%s10531_s5 + $0x1c8] sm:$0xff] }
0x1b0d   :  { %8536 = vmatprep.mubr.msk.f32.mxu1 %vm2470_vm12, %v3974_v61  ;;  %v7749_v61 = vld [vmem:[%s10531_s5 + $0x1c0] ss:$0 sm:$0xff]  ;;  %v8917_v25 = vpack.c.bf16 %v4522_v42, %v4521_v41 }
0x1b0f   :  { %8918 = vmatprep.subr.bf16.mxu0 %v8917_v25 }
0x1b10   :  { %8537 = vmatmul.mubr.msk.f32.vlgmr.msra.gmra.mrb[56].mxu1 %vm2470_vm12, %v8512_v33 }
0x1b11   :  { %8539 = vmatprep.mubr.msk.f32.mxu1 %vm2470_vm12, %v3984_v8  ;;  %8916 = vmatpush3.bf16.msra.mxu1 %v8913_v37 }
0x1b14   :  { %8540 = vmatmul.mubr.msk.f32.gmra.mrb[58].mxu1 %vm2470_vm12, %v8515_v63 }
0x1b15   :  { %8546 = vmatprep.mubr.msk.f32.mxu1 %vm254_vm2, %v3890_v27 }
0x1b18   :  { %8547 = vmatmul.mubr.msk.f32.vlgmr.msra.gmra.mrb[56].mxu1 %vm254_vm2, %v3895_v32 }
0x1b19   :  { %8549 = vmatprep.mubr.msk.f32.mxu1 %vm254_vm2, %v3900_v35 }
0x1b1c   :  { %8550 = vmatmul.mubr.msk.f32.gmra.mrb[58].mxu1 %vm254_vm2, %v3905_v36 }
0x1b1d   :  { %8599 = vmatprep.mubr.msk.f32.mxu1 %vm1183_vm11, %v9587_v59 }
0x1beb   :  { %v8548_v40 = vpop.f32.mrb[56].mxu1 }
0x1bec   :  { %v10043_v43 = vadd.f32 %v8548_v40, %v7748_v39  ;;  %v4354_v46 = vpop.f32.mrb[57].mxu1 }
0x1bed   :  { %v10045_v47 = vadd.f32 %v7748_v39, %v4354_v46 }
0x1bee   :  { %v4387_v51 = vmax.f32 %v10043_v43, 0.0 }
0x1bef   :  { %v4386_v48 = vmax.f32 %v10045_v47, 0.0  ;;  %v8551_v49 = vpop.f32.mrb[58].mxu1 }
0x1bf0   :  { %v10049_v22 = vadd.f32 %v8551_v49, %v7748_v39  ;;  %v4364_v0 = vpop.f32.mrb[59].mxu1 }
0x1bf1   :  { %v10051_v24 = vadd.f32 %v7748_v39, %v4364_v0  ;;  %8554 = vmatprep.mubr.msk.f32.mxu0 %vm2470_vm12, %v4386_v48 }
0x1bf2   :  { %8555 = vmatmul.mubr.msk.f32.vlgmr.msra.gmra.mrb[48].mxu0 %vm2470_vm12, %v4387_v51  ;;  %v4389_v54 = vmax.f32 %v10049_v22, 0.0 }
0x1bf3   :  { %v4388_v33 = vmax.f32 %v10051_v24, 0.0  ;;  %8920 = vmatpush3.bf16.msra.mxu0 %v8917_v25 }
0x1bf5   :  { %8557 = vmatprep.mubr.msk.f32.mxu0 %vm2470_vm12, %v4388_v33 }
0x1bf6   :  { %8558 = vmatmul.mubr.msk.f32.gmra.mrb[50].mxu0 %vm2470_vm12, %v4389_v54 }
0x1cc5   :  { %v8556_v63 = vpop.f32.mrb[48].mxu0 }
0x1cc6   :  { %v4484_v8 = vadd.f32 %v8556_v63, %v7749_v61  ;;  %v4478_v62 = vpop.f32.mrb[49].mxu0 }
0x1cc7   :  { %v4479_v6 = vadd.f32 %v7749_v61, %v4478_v62 }
0x1cc8   :  { %9171 = vtanh.f32 %v4484_v8 }
0x1cc9   :  { %v8559_v15 = vpop.f32.mrb[50].mxu0  ;;  %9173 = vtanh.f32 %v4479_v6 }
0x1cca   :  { %v4488_v16 = vpop.f32.mrb[51].mxu0  ;;  %v4494_v21 = vadd.f32 %v8559_v15, %v7749_v61 }
0x1ccb   :  { %v4489_v20 = vadd.f32 %v7749_v61, %v4488_v16  ;;  %v7754_v16 = vld [vmem:[%s10531_s5 + $0x1d8] ss:$0 sm:$0xff] }
0x1ccd   :  { %9175 = vtanh.f32 %v4489_v20 }
0x1cce   :  { %9177 = vtanh.f32 %v4494_v21 }
0x1ccf   :  { %9179 = vtanh.f32 %v10045_v47  ;;  %v5048_v47 = vld [vmem:[%s10531_s5 + $0x1a0] sm:$0xff] }
0x1cd0   :  { %9181 = vtanh.f32 %v10043_v43  ;;  %v4965_v43 = vld [vmem:[%s10531_s5 + $0x190] sm:$0xff] }
0x1cd1   :  { %9183 = vtanh.f32 %v10051_v24  ;;  %v7774_v24 = vld [vmem:[%s10531_s5 + $0x1b0] ss:$0 sm:$0xff] }
0x1cd2   :  { %v9172_v53 = vpop.eup %9171  ;;  %9185 = vtanh.f32 %v10049_v22 }
0x1cd3   :  { %4507 = vrot.lane.b32.xlu1 %v9172_v53, %s9281_s0  ;;  %v9174_v23 = vpop.eup %9173 }
0x1cd7   :  { %4505 = vrot.lane.b32.xlu1 %v9174_v23, %s9281_s0  ;;  %v9176_v26 = vpop.eup %9175 }
0x1cd8   :  { %v9178_v37 = vpop.eup %9177 }
0x1cd9   :  { %v9180_v32 = vpop.eup %9179 }
0x1cda   :  { %v9182_v38 = vpop.eup %9181 }
0x1cdb   :  { %4509 = vrot.lane.b32.xlu1 %v9176_v26, %s9281_s0  ;;  %v9184_v39 = vpop.eup %9183 }
0x1cdc   :  { %v9186_v0 = vpop.eup %9185 }
0x1cdf   :  { %4511 = vrot.lane.b32.xlu1 %v9178_v37, %s9281_s0 }
0x1d45   :  { %v4508_v27 = vpop.permute.xlu1 %4507 }
0x1d46   :  { %v4518_v46 = vmul.f32 %v9182_v38, %v4508_v27 }
0x1d49   :  { %v4506_v35 = vpop.permute.xlu1 %4505 }
0x1d4a   :  { %v4517_v36 = vmul.f32 %v9180_v32, %v4506_v35 }
0x1d4c   :  { %4532 = vrot.lane.b32.xlu1 %v4517_v36, %s9282_s20 }
0x1d4d   :  { %v4510_v40 = vpop.permute.xlu1 %4509 }
0x1d4e   :  { %v4519_v49 = vmul.f32 %v9184_v39, %v4510_v40 }
0x1d50   :  { %4534 = vrot.lane.b32.xlu1 %v4518_v46, %s9282_s20  ;;  %4536 = vrot.lane.b32.xlu0 %v4519_v49, %s9282_s20 }
0x1d51   :  { %v4512_v61 = vpop.permute.xlu1 %4511 }
0x1d52   :  { %v4520_v63 = vmul.f32 %v9186_v0, %v4512_v61 }
0x1d54   :  { %4538 = vrot.lane.b32.xlu1 %v4520_v63, %s9282_s20 }
0x1dbe   :  { %v4533_v8 = vpop.permute.xlu1 %4532 }
0x1dbf   :  { %8564 = vmatprep.mubr.msk.f32.mxu0 %vm254_vm2, %v4533_v8 }
0x1dc2   :  { %v4537_v62 = vpop.permute.xlu0 %4536  ;;  %v4535_v6 = vpop.permute.xlu1 %4534 }
0x1dc3   :  { %8565 = vmatmul.mubr.msk.f32.vlgmr.msra.gmra.mrb[52].mxu0 %vm254_vm2, %v4535_v6 }
0x1dc4   :  { %8567 = vmatprep.mubr.msk.f32.mxu0 %vm254_vm2, %v4537_v62 }
0x1dc6   :  { %v4539_v15 = vpop.permute.xlu1 %4538 }
0x1dc7   :  { %8568 = vmatmul.mubr.msk.f32.gmra.mrb[54].mxu0 %vm254_vm2, %v4539_v15 }
0x1dc8   :  { %8578 = vmatprep.mubr.msk.f32.mxu0 %vm1183_vm11, %v9550_v55 }
0x1e96   :  { %v8566_v20 = vpop.f32.mrb[52].mxu0 }
0x1e97   :  { %v4620_v21 = vadd.f32 %v8566_v20, %v7754_v16  ;;  %v4614_v53 = vpop.f32.mrb[53].mxu0 }
0x1e98   :  { %v4615_v26 = vadd.f32 %v7754_v16, %v4614_v53 }
0x1e99   :  { %4640 = vperm.xlu1 %9076, %v4620_v21  }
0x1e9a   :  { %v8569_v23 = vpop.f32.mrb[54].mxu0 }
0x1e9b   :  { %v4624_v37 = vpop.f32.mrb[55].mxu0  ;;  %v4630_v42 = vadd.f32 %v8569_v23, %v7754_v16 }
0x1e9c   :  { %v4625_v41 = vadd.f32 %v7754_v16, %v4624_v37 }
0x1e9d   :  { %4635 = vperm.xlu1 %9076, %v4615_v26  }
0x1ea1   :  { %4645 = vperm.xlu1 %9076, %v4625_v41  }
0x1ea5   :  { %4650 = vperm.xlu1 %9076, %v4630_v42  }
0x1f18   :  { %v4641_v25 = vpop.permute.xlu1 %4640 }
0x1f19   :  { %v4654_v36 = vsel %vm1115_vm7, %v4641_v25, -1e+30 }
0x1f1a   :  { %v4658_v49 = vsel %vm254_vm2, %v4654_v36, -inf }
0x1f1c   :  { %v4636_v27 = vpop.permute.xlu1 %4635 }
0x1f1d   :  { %v4653_v35 = vsel %vm1114_vm8, %v4636_v27, -1e+30 }
0x1f1e   :  { %v4657_v39 = vsel %vm254_vm2, %v4653_v35, -inf }
0x1f1f   :  { %v4661_v63 = vmax.f32 %v4657_v39, %v4658_v49 }
0x1f20   :  { %v4646_v32 = vpop.permute.xlu1 %4645 }
0x1f21   :  { %v4655_v38 = vsel %vm1116_vm10, %v4646_v32, -1e+30 }
0x1f22   :  { %v4659_v0 = vsel %vm254_vm2, %v4655_v38, -inf }
0x1f24   :  { %v4651_v40 = vpop.permute.xlu1 %4650 }
0x1f25   :  { %v4656_v46 = vsel %vm1117_vm9, %v4651_v40, -1e+30 }
0x1f26   :  { %v4660_v61 = vsel %vm254_vm2, %v4656_v46, -inf }
0x1f27   :  { %v4662_v8 = vmax.f32 %v4659_v0, %v4660_v61 }
0x1f29   :  { %v4663_v62 = vmax.f32 %v4661_v63, %v4662_v8 }
0x1f2b   :  { %v4664_v6 = vrot.slane %v4663_v62, 4 }
0x1f2d   :  { %v4665_v15 = vmax.f32 %v4663_v62, %v4664_v6 }
0x1f2f   :  { %v4666_v16 = vrot.slane %v4665_v15, 2 }
0x1f31   :  { %v4667_v20 = vmax.f32 %v4665_v15, %v4666_v16 }
0x1f33   :  { %v4668_v53 = vrot.slane %v4667_v20, 1 }
0x1f35   :  { %v4669_v23 = vmax.f32 %v4667_v20, %v4668_v53 }
0x1f37   :  { %v4671_v37 = vmul.f32 %v9788_v13, %v4669_v23  ;;  %v4670_v25 = vmul.f32 %v9794_v11, %v4669_v23  ;;  %v4672_v35 = vmul.f32 %v9802_v7, %v4669_v23  ;;  %v4673_v38 = vmul.f32 %v9809_v17, %v4669_v23 }
0x1f39   :  { %v4677_v27 = vsel %vm254_vm2, %v4671_v37, 0.0  ;;  %v4674_v32 = vsel %vm254_vm2, %v4670_v25, 0.0  ;;  %v4680_v36 = vsel %vm254_vm2, %v4672_v35, 0.0  ;;  %v4683_v39 = vsel %vm254_vm2, %v4673_v38, 0.0 }
0x1f3a   :  { %4678 = vadd.xlane.f32.xlu0 %v4677_v27  ;;  %4675 = vadd.xlane.f32.xlu1 %v4674_v32 }
0x1f3e   :  { %4681 = vadd.xlane.f32.xlu1 %v4680_v36 }
0x1f42   :  { %4684 = vadd.xlane.f32.xlu1 %v4683_v39 }
0x1fc7   :  { %v4679_v40 = vpop.xlane.xlu0 %4678  ;;  %v4676_v46 = vpop.xlane.xlu1 %4675 }
0x1fc8   :  { %v4687_v49 = vsub.f32 %v4620_v21, %v4679_v40  ;;  %v4686_v0 = vsub.f32 %v4615_v26, %v4676_v46 }
0x1fca   :  { %v4692_v61 = vmul.f32 1.442695, %v4687_v49  ;;  %v4690_v63 = vmul.f32 1.442695, %v4686_v0 }
0x1fcb   :  { %v4682_v8 = vpop.xlane.xlu1 %4681 }
0x1fcc   :  { %9187 = vpow2.f32 %v4692_v61  ;;  %v4688_v62 = vsub.f32 %v4625_v41, %v4682_v8 }
0x1fcd   :  { %9189 = vpow2.f32 %v4690_v63 }
0x1fce   :  { %v4694_v6 = vmul.f32 1.442695, %v4688_v62  ;;  %v5049_v62 = vld [vmem:[%s10531_s5 + $0x1a8] sm:$0xff] }
0x1fcf   :  { %v4685_v15 = vpop.xlane.xlu1 %4684 }
0x1fd0   :  { %v4689_v16 = vsub.f32 %v4630_v42, %v4685_v15  ;;  %9191 = vpow2.f32 %v4694_v6 }
0x1fd2   :  { %v4696_v20 = vmul.f32 1.442695, %v4689_v16 }
0x1fd4   :  { %9193 = vpow2.f32 %v4696_v20 }
0x1fd6   :  { %v9188_v53 = vpop.eup %9187 }
0x1fd7   :  { %v9190_v23 = vpop.eup %9189 }
0x1fd8   :  { %v8921_v37 = vpack.c.bf16 %v9188_v53, %v9190_v23 }
0x1fda   :  { %8922 = vmatprep.subr.bf16.mxu0 %v8921_v37  ;;  %v9192_v25 = vpop.eup %9191 }
0x1fdb   :  { %8924 = vmatpush3.bf16.msra.mxu0 %v8921_v37 }
0x1fde   :  { %v9194_v21 = vpop.eup %9193 }
0x1fdf   :  { %v8925_v26 = vpack.c.bf16 %v9194_v21, %v9192_v25 }
0x1fe1   :  { %8926 = vmatprep.subr.bf16.mxu0 %v8925_v26 }
0x1fe2   :  { %8928 = vmatpush3.bf16.msra.mxu0 %v8925_v26 }
0x1fe5   :  { %8579 = vmatmul.mubr.msk.f32.vlgmr.msra.gmra.mrb[56].mxu0 %vm1183_vm11, %v9554_v58 }
0x1fe6   :  { %8585 = vmatprep.mubr.msk.f32.mxu0 %vm254_vm2, %v9794_v11 }
0x20b8   :  { %v8580_v41 = vpop.f32.mrb[56].mxu0 }
0x20b9   :  { %v4764_v42 = vpop.f32.mrb[57].mxu0 }
0x20ba   :  { %v8929_v27 = vpack.c.bf16 %v8580_v41, %v4764_v42 }
0x20bc   :  { %8930 = vmatprep.subr.bf16.mxu0 %v8929_v27 }
0x20bd   :  { %8932 = vmatpush3.bf16.msra.mxu0 %v8929_v27 }
0x20be   :  { %8607 = vmatprep.subr.mxu0 %v5049_v62 }
0x20c0   :  { %8586 = vmatmul.mubr.msk.f32.vlgmr.msra.gmra.mrb[58].mxu0 %vm254_vm2, %v9788_v13 }
0x20c1   :  { %8588 = vmatprep.mubr.msk.f32.mxu0 %vm254_vm2, %v9802_v7  ;;  %8608 = vmatpush3.msra.mxu0 %v5049_v62 }
0x20c2   :  { %8612 = vmatprep.subr.mxu0 %v5048_v47 }
0x20c4   :  { %8589 = vmatmul.mubr.msk.f32.gmra.mrb[60].mxu0 %vm254_vm2, %v9809_v17 }
0x2193   :  { %v8587_v32 = vpop.f32.mrb[58].mxu0 }
0x2194   :  { %v4845_v35 = vadd.f32 1e-16, %v8587_v32  ;;  %v4839_v36 = vpop.f32.mrb[59].mxu0 }
0x2195   :  { %v4840_v38 = vadd.f32 1e-16, %v4839_v36 }
0x2196   :  { %9195 = vrcp.f32 %v4845_v35 }
0x2197   :  { %9197 = vrcp.f32 %v4840_v38  ;;  %v8590_v11 = vpop.f32.mrb[60].mxu0 }
0x2198   :  { %v4849_v39 = vpop.f32.mrb[61].mxu0  ;;  %v4855_v40 = vadd.f32 1e-16, %v8590_v11 }
0x2199   :  { %v4850_v46 = vadd.f32 1e-16, %v4849_v39 }
0x219b   :  { %9199 = vrcp.f32 %v4850_v46 }
0x219c   :  { %9201 = vrcp.f32 %v4855_v40 }
0x21a0   :  { %v9196_v49 = vpop.eup %9195 }
0x21a1   :  { %v9198_v13 = vpop.eup %9197  ;;  %v4863_v0 = vmul.f32 %v9196_v49, %v9188_v53  ;;  %v7777_v49 = vld [vmem:[%s10531_s5 + $0x1e8] ss:$0 sm:$0xff] }
0x21a2   :  { %v4862_v61 = vmul.f32 %v9198_v13, %v9190_v23 }
0x21a3   :  { %4873 = vperm.xlu0 %9075, %v4863_v0   ;;  %v5355_v0 = vld [vmem:[%s10531_s5 + $0x1f0] sm:$0xff] }
0x21a4   :  { %4868 = vperm.xlu1 %9076, %v4862_v61   ;;  %v5356_v61 = vld [vmem:[%s10531_s5 + $0x1f8] sm:$0xff] }
0x21a5   :  { %v9200_v7 = vpop.eup %9199 }
0x21a6   :  { %v4864_v17 = vmul.f32 %v9200_v7, %v9192_v25  ;;  %v9202_v63 = vpop.eup %9201 }
0x21a7   :  { %9077 = vset.pattern.permute.xlu0 %v9280_v34  ;;  %v4865_v8 = vmul.f32 %v9202_v63, %v9194_v21 }
0x21a8   :  { %4878 = vperm.xlu1 %9076, %v4864_v17   ;;  %v8941_v17 = vpack.c.bf16 %v5356_v61, %v5355_v0 }
0x21ac   :  { %4883 = vperm.xlu1 %9076, %v4865_v8  }
0x2222   :  { %v4874_v6 = vpop.permute.xlu0 %4873 }
0x2223   :  { %v4887_v15 = vmul.f32 %v4874_v6, %v4387_v51  ;;  %v4869_v16 = vpop.permute.xlu1 %4868 }
0x2224   :  { %v4886_v20 = vmul.f32 %v4869_v16, %v4386_v48  ;;  %v5257_v48 = vld [vmem:[%s10531_s5 + $0x1e0] sm:$0x7] }
0x2226   :  { %v8933_v53 = vpack.c.bf16 %v4887_v15, %v4886_v20 }
0x2227   :  { %v4879_v23 = vpop.permute.xlu1 %4878 }
0x2228   :  { %8934 = vmatprep.subr.bf16.mxu1 %v8933_v53  ;;  %v4888_v25 = vmul.f32 %v4879_v23, %v4388_v33 }
0x2229   :  { %8936 = vmatpush3.bf16.msra.mxu1 %v8933_v53 }
0x222b   :  { %v4884_v37 = vpop.permute.xlu1 %4883 }
0x222c   :  { %v4889_v21 = vmul.f32 %v4884_v37, %v4389_v54  ;;  %v10204_v37 = vld [vmem:[%s10535_s2] sm:$0xff] }
0x222e   :  { %v8937_v26 = vpack.c.bf16 %v4889_v21, %v4888_v25 }
0x2230   :  { %8938 = vmatprep.subr.bf16.mxu1 %v8937_v26 }
0x2231   :  { %8940 = vmatpush3.bf16.msra.mxu1 %v8937_v26 }
0x2232   :  { %8602 = vmatprep.subr.mxu1 %v4965_v43 }
0x2234   :  { %8600 = vmatmul.mubr.msk.f32.vlgmr.msra.gmra.mrb[60].mxu1 %vm1183_vm11, %v9591_v60 }
0x2235   :  { %8604 = vmatprep.mubr.msk.f32.mxu1 %vm2470_vm12, %v9867_v12  ;;  %8603 = vmatpush3.msra.mxu1 %v4965_v43 }
0x2236   :  { %8617 = vmatprep.subr.msk.mxu1 %vm154_vm0, %v5257_v48 }
0x2238   :  { %8605 = vmatmul.mubr.msk.f32.vlgmr.msra.gmra.mrb[62].mxu1 %vm2470_vm12, %v9871_v5 }
0x2239   :  { %8619 = vmatprep.mubr.msk.f32.mxu1 %vm141_vm1, %v9928_v1  ;;  %8618 = vmatpush3.msk.msra.mxu1 %vm154_vm0, %v5257_v48  ;;  %v7767_v1 = vld [vmem:[%s10531_s5 + $0x198] ss:$0 sm:$0xff]  ;;  %vm7574_vm0 = vcmask 1024  }
0x223c   :  { %8620 = vmatmul.mubr.msk.f32.vlgmr.msra.gmra.mrb[64].mxu1 %vm141_vm1, %v9935_v2 }
0x223d   :  { %8622 = vmatprep.mubr.msk.f32.mxu1 %vm141_vm1, %v9942_v3 }
0x2240   :  { %8623 = vmatmul.mubr.msk.f32.gmra.mrb[66].mxu1 %vm141_vm1, %v9949_v4 }
0x2241   :  { %8639 = vmatprep.mubr.msk.f32.mxu1 %vm254_vm2, %v9956_v9 }
0x2307   :  { %v10166_v12 = vpop.f32.mrb[60].mxu1 }
0x2308   :  { %v10168_v5 = vpop.f32.mrb[61].mxu1 }
0x2309   :  { %8609 = vmatprep.mubr.msk.f32.mxu0 %vm2470_vm12, %v10168_v5 }
0x230a   :  { %8610 = vmatmul.mubr.msk.f32.vlgmr.msra.gmra.mrb[62].mxu0 %vm2470_vm12, %v10166_v12 }
0x230b   :  { %v8606_v2 = vpop.f32.mrb[62].mxu1  ;;  %8613 = vmatpush3.msra.mxu0 %v5048_v47 }
0x230c   :  { %v10177_v3 = vadd.f32 %v8606_v2, %v7767_v1  ;;  %v5037_v4 = vpop.f32.mrb[63].mxu1  ;;  %8942 = vmatprep.subr.bf16.mxu0 %v8941_v17 }
0x230d   :  { %v5038_v9 = vadd.f32 %v7767_v1, %v5037_v4 }
0x230e   :  { %v5047_v22 = vmax.f32 %v10177_v3, 0.0 }
0x230f   :  { %v5046_v51 = vmax.f32 %v5038_v9, 0.0  ;;  %v8621_v46 = vpop.f32.mrb[64].mxu1 }
0x2310   :  { %v5338_v13 = vadd.f32 %v8621_v46, %v7777_v49  ;;  %v5332_v7 = vpop.f32.mrb[65].mxu1 }
0x2311   :  { %8614 = vmatprep.mubr.msk.f32.mxu0 %vm2470_vm12, %v5046_v51  ;;  %v5333_v63 = vadd.f32 %v7777_v49, %v5332_v7 }
0x2312   :  { %8615 = vmatmul.mubr.msk.f32.vlgmr.msra.gmra.mrb[62].mxu0 %vm2470_vm12, %v5047_v22  ;;  %v5352_v8 = vmax.f32 %v5338_v13, 0.0  ;;  %v7783_v13 = vld [vmem:[%s10531_s5 + $0x200] ss:$0 sm:$0xff] }
0x2313   :  { %v5351_v62 = vmax.f32 %v5333_v63, 0.0  ;;  %v8624_v6 = vpop.f32.mrb[66].mxu1  ;;  %8944 = vmatpush3.bf16.msra.mxu0 %v8941_v17  ;;  %v5945_v63 = vld [vmem:[%s10531_s5 + $0x268] sm:$0xff] }
0x2314   :  { %v5348_v15 = vadd.f32 %v8624_v6, %v7777_v49  ;;  %v5342_v16 = vpop.f32.mrb[67].mxu1  ;;  %v7808_v6 = vld [vmem:[%s10531_s5 + $0x228] ss:$0 sm:$0xff] }
0x2315   :  { %v5343_v20 = vadd.f32 %v7777_v49, %v5342_v16  ;;  %8629 = vmatprep.mubr.msk.f32.mxu0 %vm254_vm2, %v5351_v62 }
0x2316   :  { %v5354_v53 = vmax.f32 %v5348_v15, 0.0  ;;  %8630 = vmatmul.mubr.msk.f32.vlgmr.msra.gmra.mrb[64].mxu0 %vm254_vm2, %v5352_v8  ;;  %v5946_v8 = vld [vmem:[%s10531_s5 + $0x270] sm:$0xff] }
0x2317   :  { %v5353_v23 = vmax.f32 %v5343_v20, 0.0  ;;  %v8957_v62 = vpack.c.bf16 %v5946_v8, %v5945_v63 }
0x2319   :  { %8632 = vmatprep.mubr.msk.f32.mxu0 %vm254_vm2, %v5353_v23 }
0x231a   :  { %8633 = vmatmul.mubr.msk.f32.gmra.mrb[66].mxu0 %vm254_vm2, %v5354_v53 }
0x231b   :  { %8649 = vmatprep.mubr.msk.f32.mxu0 %vm254_vm2, %v10204_v37 }
0x23e5   :  { %v8616_v33 = vpop.f32.mrb[62].mxu0 }
0x23e6   :  { %v5218_v54 = vadd.f32 %v8616_v33, %v7774_v24  ;;  %v5203_v41 = vpop.f32.mrb[63].mxu0 }
0x23e7   :  { %v5217_v42 = vadd.f32 %v7774_v24, %v5203_v41 }
0x23e8   :  { %v7776_v27 = vmul.f32 -1.442695, %v5218_v54 }
0x23e9   :  { %v7775_v32 = vmul.f32 -1.442695, %v5217_v42 }
0x23ea   :  { %9203 = vpow2.f32 %v7776_v27  ;;  %v5825_v27 = vld [vmem:[%s10531_s5 + $0x218] sm:$0xff] }
0x23eb   :  { %9205 = vpow2.f32 %v7775_v32  ;;  %v5826_v32 = vld [vmem:[%s10531_s5 + $0x220] sm:$0xff] }
0x23f4   :  { %v9204_v35 = vpop.eup %9203 }
0x23f5   :  { %v9206_v36 = vpop.eup %9205  ;;  %v5226_v38 = vadd.f32 1.0, %v9204_v35 }
0x23f6   :  { %v5225_v11 = vadd.f32 1.0, %v9206_v36 }
0x23f7   :  { %9207 = vrcp.f32 %v5226_v38 }
0x23f8   :  { %9209 = vrcp.f32 %v5225_v11  ;;  %v8953_v11 = vpack.c.bf16 %v5826_v32, %v5825_v27  ;;  %v6073_v32 = vld [vmem:[%s10531_s5 + $0x280] sm:$0xff] }
0x2401   :  { %v9208_v39 = vpop.eup %9207 }
0x2402   :  { %v9210_v40 = vpop.eup %9209  ;;  %5238 = vperm.xlu1 %9076, %v9208_v39  }
0x2403   :  { %5244 = vperm.xlu0 %9077, %v9210_v40  }
0x2406   :  { %5233 = vperm.xlu1 %9076, %v9210_v40  }
0x2407   :  { %9079 = vset.pattern.permute.xlu0 %v9279_v50 }
0x240a   :  { %9078 = vset.pattern.permute.xlu1 %v9280_v34 }
0x240b   :  { %5248 = vperm.xlu1 %9078, %v9208_v39  }
0x240f   :  { %9080 = vset.pattern.permute.xlu1 %v9279_v50 }
0x2481   :  { %v5239_v25 = vpop.permute.xlu1 %5238 }
0x2482   :  { %v5245_v26 = vpop.permute.xlu0 %5244  ;;  %v5242_v1 = vmul.f32 %v10166_v12, %v5239_v25  ;;  %v10226_v12 = vld [vmem:[%s10535_s2 + $0x8] sm:$0xff] }
0x2483   :  { %v5251_v47 = vmul.f32 %v5245_v26, %v5046_v51  ;;  %v10235_v51 = vld [vmem:[%s10535_s2 + $0x10] sm:$0xff] }
0x2485   :  { %v5234_v21 = vpop.permute.xlu1 %5233 }
0x2486   :  { %v5241_v43 = vmul.f32 %v5234_v21, %v10168_v5  ;;  %v5630_v5 = vld [vmem:[%s10531_s5 + $0x210] sm:$0xff] }
0x2488   :  { %v10210_v2 = vadd.f32 %v5251_v47, %v5241_v43 }
0x248a   :  { %v5249_v48 = vpop.permute.xlu1 %5248  ;;  %v5255_v9 = vmax.f32 %v10210_v2, 0.0 }
0x248b   :  { %v5252_v3 = vmul.f32 %v5249_v48, %v5047_v22  ;;  %v10244_v22 = vld [vmem:[%s10535_s2 + $0x18] sm:$0xff] }
0x248d   :  { %v10212_v4 = vadd.f32 %v5252_v3, %v5242_v1  ;;  %v7809_v3 = vld [vmem:[%s10531_s5 + $0x278] ss:$0 sm:$0xff] }
0x248f   :  { %v5256_v24 = vmax.f32 %v10212_v4, 0.0 }
0x2491   :  { %v8945_v33 = vpack.c.bf16 %v5256_v24, %v5255_v9 }
0x2493   :  { %8946 = vmatprep.subr.bf16.mxu1 %v8945_v33  ;;  %8950 = vmatprep.subr.bf16.mxu0 %v8945_v33 }
0x2494   :  { %8948 = vmatpush3.bf16.msra.mxu1 %v8945_v33  ;;  %8952 = vmatpush3.bf16.msra.mxu0 %v8945_v33 }
0x2495   :  { %8655 = vmatprep.subr.mxu1 %v5630_v5  ;;  %8958 = vmatprep.subr.bf16.mxu0 %v8957_v62 }
0x2497   :  { %8650 = vmatmul.mubr.msk.f32.vlgmr.msra.gmra.mrb[68].mxu0 %vm254_vm2, %v10226_v12  ;;  %8640 = vmatmul.mubr.msk.f32.vlgmr.msra.gmra.mrb[68].mxu1 %vm254_vm2, %v9963_v14  ;;  %v8631_v14 = vpop.f32.mrb[64].mxu0 }
0x2498   :  { %8652 = vmatprep.mubr.msk.f32.mxu0 %vm254_vm2, %v10235_v51  ;;  %8642 = vmatprep.mubr.msk.f32.mxu1 %vm254_vm2, %v9970_v56  ;;  %v5440_v54 = vpop.f32.mrb[65].mxu0  ;;  %v5629_v56 = vld [vmem:[%s10531_s5 + $0x208] sm:$0xff]  ;;  %v5446_v61 = vadd.f32 %v8631_v14, %v7783_v13 }
0x2499   :  { %8656 = vmatpush3.msra.mxu1 %v5630_v5  ;;  %v8634_v41 = vpop.f32.mrb[66].mxu0  ;;  %v5441_v0 = vadd.f32 %v7783_v13, %v5440_v54  ;;  %8960 = vmatpush3.bf16.msra.mxu0 %v8957_v62 }
0x249a   :  { %v5450_v42 = vpop.f32.mrb[67].mxu0  ;;  %8663 = vmatprep.subr.mxu1 %v5629_v56  ;;  %v5456_v17 = vadd.f32 %v8634_v41, %v7783_v13 }
0x249b   :  { %8653 = vmatmul.mubr.msk.f32.gmra.mrb[70].mxu0 %vm254_vm2, %v10244_v22  ;;  %8643 = vmatmul.mubr.msk.f32.gmra.mrb[70].mxu1 %vm254_vm2, %v9977_v57  ;;  %v5451_v7 = vadd.f32 %v7783_v13, %v5450_v42 }
0x256a   :  { %v8651_v35 = vpop.f32.mrb[68].mxu0  ;;  %v8641_v36 = vpop.f32.mrb[68].mxu1 }
0x256b   :  { %v5610_v57 = vpop.f32.mrb[69].mxu0  ;;  %v5525_v38 = vpop.f32.mrb[69].mxu1 }
0x256c   :  { %8657 = vmatprep.mubr.msk.f32.mxu1 %vm2470_vm12, %v5610_v57 }
0x256d   :  { %8658 = vmatmul.mubr.msk.f32.vlgmr.msra.gmra.mrb[72].mxu1 %vm2470_vm12, %v8651_v35  ;;  %v6074_v35 = vld [vmem:[%s10531_s5 + $0x288] sm:$0xff] }
0x256e   :  { %v8654_v39 = vpop.f32.mrb[70].mxu0  ;;  %8664 = vmatpush3.msra.mxu1 %v5629_v56  ;;  %v8644_v40 = vpop.f32.mrb[70].mxu1 }
0x256f   :  { %v5620_v46 = vpop.f32.mrb[71].mxu0  ;;  %v5535_v49 = vpop.f32.mrb[71].mxu1  ;;  %8954 = vmatprep.subr.bf16.mxu1 %v8953_v11 }
0x2570   :  { %8660 = vmatprep.mubr.msk.f32.mxu1 %vm2470_vm12, %v5620_v46 }
0x2571   :  { %8661 = vmatmul.mubr.msk.f32.gmra.mrb[74].mxu1 %vm2470_vm12, %v8654_v39 }
0x2572   :  { %8665 = vmatprep.mubr.msk.f32.mxu1 %vm2470_vm12, %v5525_v38 }
0x2575   :  { %8666 = vmatmul.mubr.msk.f32.vlgmr.msra.gmra.mrb[72].mxu1 %vm2470_vm12, %v8641_v36  ;;  %v8961_v36 = vpack.c.bf16 %v6074_v35, %v6073_v32 }
0x2576   :  { %8668 = vmatprep.mubr.msk.f32.mxu1 %vm2470_vm12, %v5535_v49  ;;  %8956 = vmatpush3.bf16.msra.mxu1 %v8953_v11 }
0x2577   :  { %8962 = vmatprep.subr.bf16.mxu0 %v8961_v36 }
0x2579   :  { %8669 = vmatmul.mubr.msk.f32.gmra.mrb[74].mxu1 %vm2470_vm12, %v8644_v40 }
0x257a   :  { %8675 = vmatprep.mubr.msk.f32.mxu1 %vm254_vm2, %v5441_v0 }
0x257d   :  { %8676 = vmatmul.mubr.msk.f32.vlgmr.msra.gmra.mrb[72].mxu1 %vm254_vm2, %v5446_v61 }
0x257e   :  { %8678 = vmatprep.mubr.msk.f32.mxu1 %vm254_vm2, %v5451_v7 }
0x2581   :  { %8679 = vmatmul.mubr.msk.f32.gmra.mrb[74].mxu1 %vm254_vm2, %v5456_v17 }
0x2582   :  { %8716 = vmatprep.mubr.msk.f32.mxu1 %vm254_vm2, %v10204_v37 }
0x2650   :  { %v8677_v15 = vpop.f32.mrb[72].mxu1 }
0x2651   :  { %v10285_v16 = vadd.f32 %v8677_v15, %v7808_v6  ;;  %v5905_v20 = vpop.f32.mrb[73].mxu1 }
0x2652   :  { %v10287_v53 = vadd.f32 %v7808_v6, %v5905_v20 }
0x2653   :  { %v5938_v21 = vmax.f32 %v10285_v16, 0.0 }
0x2654   :  { %v5937_v23 = vmax.f32 %v10287_v53, 0.0  ;;  %v8680_v25 = vpop.f32.mrb[74].mxu1 }
0x2655   :  { %v10291_v26 = vadd.f32 %v8680_v25, %v7808_v6  ;;  %v5915_v43 = vpop.f32.mrb[75].mxu1 }
0x2656   :  { %v10293_v47 = vadd.f32 %v7808_v6, %v5915_v43  ;;  %8685 = vmatprep.mubr.msk.f32.mxu0 %vm254_vm2, %v5937_v23 }
0x2657   :  { %8686 = vmatmul.mubr.msk.f32.vlgmr.msra.gmra.mrb[72].mxu0 %vm254_vm2, %v5938_v21  ;;  %v5940_v1 = vmax.f32 %v10291_v26, 0.0 }
0x2658   :  { %v5939_v48 = vmax.f32 %v10293_v47, 0.0  ;;  %8964 = vmatpush3.bf16.msra.mxu0 %v8961_v36 }
0x265a   :  { %8688 = vmatprep.mubr.msk.f32.mxu0 %vm254_vm2, %v5939_v48 }
0x265b   :  { %8689 = vmatmul.mubr.msk.f32.gmra.mrb[74].mxu0 %vm254_vm2, %v5940_v1 }
0x272a   :  { %v8687_v33 = vpop.f32.mrb[72].mxu0 }
0x272b   :  { %v6036_v5 = vadd.f32 %v8687_v33, %v7809_v3  ;;  %v6030_v14 = vpop.f32.mrb[73].mxu0 }
0x272c   :  { %v6031_v54 = vadd.f32 %v7809_v3, %v6030_v14 }
0x272d   :  { %9211 = vtanh.f32 %v6036_v5 }
0x272e   :  { %9213 = vtanh.f32 %v6031_v54  ;;  %v8690_v41 = vpop.f32.mrb[74].mxu0 }
0x272f   :  { %v6046_v42 = vadd.f32 %v8690_v41, %v7809_v3  ;;  %v6040_v56 = vpop.f32.mrb[75].mxu0 }
0x2730   :  { %v6041_v27 = vadd.f32 %v7809_v3, %v6040_v56  ;;  %v7814_v3 = vld [vmem:[%s10531_s5 + $0x290] ss:$0 sm:$0xff] }
0x2731   :  { %9215 = vtanh.f32 %v6046_v42 }
0x2732   :  { %9217 = vtanh.f32 %v6041_v27 }
0x2733   :  { %9219 = vtanh.f32 %v10285_v16 }
0x2734   :  { %9221 = vtanh.f32 %v10287_v53 }
0x2735   :  { %9223 = vtanh.f32 %v10291_v26  ;;  %v7827_v26 = vld [vmem:[%s10531_s5 + $0x238] ss:$0 sm:$0xff] }
0x2736   :  { %9225 = vtanh.f32 %v10293_v47  ;;  %v6607_v47 = vld [vmem:[%s10531_s5 + $0x248] sm:$0xff] }
0x2737   :  { %v9212_v57 = vpop.eup %9211 }
0x2738   :  { %v9214_v38 = vpop.eup %9213  ;;  %6059 = vrot.lane.b32.xlu0 %v9212_v57, %s9286_s1 }
0x2739   :  { %6057 = vrot.lane.b32.xlu1 %v9214_v38, %s9286_s1 }
0x273b   :  { %v9216_v11 = vpop.eup %9215 }
0x273c   :  { %v9218_v39 = vpop.eup %9217  ;;  %6063 = vrot.lane.b32.xlu0 %v9216_v11, %s9286_s1 }
0x273d   :  { %6061 = vrot.lane.b32.xlu1 %v9218_v39, %s9286_s1  ;;  %v9220_v40 = vpop.eup %9219 }
0x273e   :  { %v9222_v49 = vpop.eup %9221 }
0x273f   :  { %v9224_v7 = vpop.eup %9223 }
0x2740   :  { %v9226_v63 = vpop.eup %9225 }
0x27aa   :  { %v6060_v46 = vpop.permute.xlu0 %6059 }
0x27ab   :  { %v6070_v13 = vmul.f32 %v9220_v40, %v6060_v46  ;;  %v6058_v0 = vpop.permute.xlu1 %6057 }
0x27ac   :  { %v6069_v61 = vmul.f32 %v9222_v49, %v6058_v0 }
0x27ad   :  { %6086 = vrot.lane.b32.xlu0 %v6070_v13, %s9287_s16 }
0x27ae   :  { %v6064_v17 = vpop.permute.xlu0 %6063  ;;  %6084 = vrot.lane.b32.xlu1 %v6069_v61, %s9287_s16 }
0x27af   :  { %v6072_v8 = vmul.f32 %v9224_v7, %v6064_v17  ;;  %v6062_v62 = vpop.permute.xlu1 %6061 }
0x27b0   :  { %v6071_v6 = vmul.f32 %v9226_v63, %v6062_v62 }
0x27b1   :  { %6090 = vrot.lane.b32.xlu0 %v6072_v8, %s9287_s16 }
0x27b2   :  { %6088 = vrot.lane.b32.xlu1 %v6071_v6, %s9287_s16 }
0x281f   :  { %v6087_v15 = vpop.permute.xlu0 %6086 }
0x2820   :  { %v6085_v20 = vpop.permute.xlu1 %6084 }
0x2821   :  { %8695 = vmatprep.mubr.msk.f32.mxu0 %vm254_vm2, %v6085_v20 }
0x2822   :  { %8696 = vmatmul.mubr.msk.f32.vlgmr.msra.gmra.mrb[76].mxu0 %vm254_vm2, %v6087_v15 }
0x2823   :  { %v6091_v43 = vpop.permute.xlu0 %6090 }
0x2824   :  { %v6089_v25 = vpop.permute.xlu1 %6088 }
0x2825   :  { %8698 = vmatprep.mubr.msk.f32.mxu0 %vm254_vm2, %v6089_v25 }
0x2826   :  { %8699 = vmatmul.mubr.msk.f32.gmra.mrb[78].mxu0 %vm254_vm2, %v6091_v43 }
0x2827   :  { %8709 = vmatprep.mubr.msk.f32.mxu0 %vm1183_vm11, %v9550_v55 }
0x28f5   :  { %v8697_v33 = vpop.f32.mrb[76].mxu0 }
0x28f6   :  { %v6172_v5 = vadd.f32 %v8697_v33, %v7814_v3  ;;  %v6166_v14 = vpop.f32.mrb[77].mxu0 }
0x28f7   :  { %v6167_v54 = vadd.f32 %v7814_v3, %v6166_v14 }
0x28f8   :  { %6192 = vperm.xlu0 %9079, %v6172_v5  }
0x28f9   :  { %6187 = vperm.xlu1 %9080, %v6167_v54   ;;  %v8700_v41 = vpop.f32.mrb[78].mxu0 }
0x28fa   :  { %v6176_v42 = vpop.f32.mrb[79].mxu0  ;;  %v6182_v27 = vadd.f32 %v8700_v41, %v7814_v3 }
0x28fb   :  { %v6177_v56 = vadd.f32 %v7814_v3, %v6176_v42 }
0x28fd   :  { %6197 = vperm.xlu1 %9080, %v6177_v56  }
0x2901   :  { %6202 = vperm.xlu1 %9080, %v6182_v27  }
0x2977   :  { %v6193_v35 = vpop.permute.xlu0 %6192 }
0x2978   :  { %v6188_v32 = vpop.permute.xlu1 %6187  ;;  %v6206_v55 = vsel %vm1115_vm7, %v6193_v35, -1e+30 }
0x2979   :  { %v6205_v57 = vsel %vm1114_vm8, %v6188_v32, -1e+30  ;;  %v6210_v11 = vsel %vm254_vm2, %v6206_v55, -inf }
0x297a   :  { %v6209_v39 = vsel %vm254_vm2, %v6205_v57, -inf }
0x297b   :  { %v6213_v29 = vmax.f32 %v6209_v39, %v6210_v11 }
0x297c   :  { %v6198_v36 = vpop.permute.xlu1 %6197 }
0x297d   :  { %v6207_v38 = vsel %vm1116_vm10, %v6198_v36, -1e+30 }
0x297e   :  { %v6211_v49 = vsel %vm254_vm2, %v6207_v38, -inf }
0x2980   :  { %v6203_v40 = vpop.permute.xlu1 %6202 }
0x2981   :  { %v6208_v46 = vsel %vm1117_vm9, %v6203_v40, -1e+30 }
0x2982   :  { %v6212_v13 = vsel %vm254_vm2, %v6208_v46, -inf }
0x2983   :  { %v6214_v0 = vmax.f32 %v6211_v49, %v6212_v13 }
0x2985   :  { %v6215_v61 = vmax.f32 %v6213_v29, %v6214_v0  ;;  %v6517_v29 = vld [vmem:[%s10531_s5 + $0x230] sm:$0xff] }
0x2987   :  { %v6216_v28 = vrot.slane %v6215_v61, 4 }
0x2989   :  { %v6217_v7 = vmax.f32 %v6215_v61, %v6216_v28 }
0x298b   :  { %v6218_v17 = vrot.slane %v6217_v7, 2 }
0x298d   :  { %v6219_v30 = vmax.f32 %v6217_v7, %v6218_v17 }
0x298f   :  { %v6220_v63 = vrot.slane %v6219_v30, 1 }
0x2991   :  { %v6221_v8 = vmax.f32 %v6219_v30, %v6220_v63 }
0x2993   :  { %v6223_v62 = vmul.f32 %v10226_v12, %v6221_v8  ;;  %v6222_v6 = vmul.f32 %v10204_v37, %v6221_v8  ;;  %v6224_v20 = vmul.f32 %v10235_v51, %v6221_v8  ;;  %v6225_v43 = vmul.f32 %v10244_v22, %v6221_v8 }
0x2995   :  { %v6229_v31 = vsel %vm254_vm2, %v6223_v62, 0.0  ;;  %v6226_v15 = vsel %vm254_vm2, %v6222_v6, 0.0  ;;  %v6232_v25 = vsel %vm254_vm2, %v6224_v20, 0.0  ;;  %v6235_v3 = vsel %vm254_vm2, %v6225_v43, 0.0 }
0x2996   :  { %6230 = vadd.xlane.f32.xlu1 %v6229_v31  ;;  %6227 = vadd.xlane.f32.xlu0 %v6226_v15 }
0x299a   :  { %6233 = vadd.xlane.f32.xlu0 %v6232_v25 }
0x299e   :  { %6236 = vadd.xlane.f32.xlu0 %v6235_v3 }
0x2a23   :  { %v6231_v33 = vpop.xlane.xlu1 %6230  ;;  %v6228_v14 = vpop.xlane.xlu0 %6227 }
0x2a24   :  { %v6239_v41 = vsub.f32 %v6172_v5, %v6231_v33  ;;  %v6238_v37 = vsub.f32 %v6167_v54, %v6228_v14  ;;  %v6608_v33 = vld [vmem:[%s10531_s5 + $0x250] sm:$0xff]  ;;  %v6606_v14 = vld [vmem:[%s10531_s5 + $0x240] sm:$0xff] }
0x2a26   :  { %v6244_v42 = vmul.f32 1.442695, %v6239_v41  ;;  %v6242_v32 = vmul.f32 1.442695, %v6238_v37 }
0x2a27   :  { %v6234_v35 = vpop.xlane.xlu0 %6233 }
0x2a28   :  { %9227 = vpow2.f32 %v6244_v42  ;;  %v6240_v36 = vsub.f32 %v6177_v56, %v6234_v35  ;;  %v10403_v35 = vld [vmem:[%s10536_s4] sm:$0xff] }
0x2a29   :  { %9229 = vpow2.f32 %v6242_v32 }
0x2a2a   :  { %v6246_v55 = vmul.f32 1.442695, %v6240_v36  ;;  %v7834_v36 = vld [vmem:[%s10531_s5 + $0x260] ss:$0 sm:$0xff] }
0x2a2b   :  { %v6237_v57 = vpop.xlane.xlu0 %6236 }
0x2a2c   :  { %v6241_v38 = vsub.f32 %v6182_v27, %v6237_v57  ;;  %9231 = vpow2.f32 %v6246_v55 }
0x2a2e   :  { %v6248_v11 = vmul.f32 1.442695, %v6241_v38 }
0x2a30   :  { %9233 = vpow2.f32 %v6248_v11 }
0x2a32   :  { %v9228_v39 = vpop.eup %9227 }
0x2a33   :  { %v9230_v40 = vpop.eup %9229 }
0x2a34   :  { %v8965_v46 = vpack.c.bf16 %v9228_v39, %v9230_v40 }
0x2a36   :  { %8966 = vmatprep.subr.bf16.mxu0 %v8965_v46  ;;  %v9232_v49 = vpop.eup %9231 }
0x2a37   :  { %8968 = vmatpush3.bf16.msra.mxu0 %v8965_v46 }
0x2a3a   :  { %v9234_v5 = vpop.eup %9233 }
0x2a3b   :  { %v8969_v54 = vpack.c.bf16 %v9234_v5, %v9232_v49 }
0x2a3d   :  { %8970 = vmatprep.subr.bf16.mxu0 %v8969_v54 }
0x2a3e   :  { %8972 = vmatpush3.bf16.msra.mxu0 %v8969_v54 }
0x2a41   :  { %8710 = vmatmul.mubr.msk.f32.vlgmr.msra.gmra.mrb[80].mxu0 %vm1183_vm11, %v9554_v58 }
0x2a42   :  { %8730 = vmatprep.mubr.msk.f32.mxu0 %vm1183_vm11, %v9587_v59 }
0x2b14   :  { %v8711_v56 = vpop.f32.mrb[80].mxu0 }
0x2b15   :  { %v6316_v27 = vpop.f32.mrb[81].mxu0 }
0x2b16   :  { %v8973_v13 = vpack.c.bf16 %v8711_v56, %v6316_v27 }
0x2b18   :  { %8974 = vmatprep.subr.bf16.mxu1 %v8973_v13 }
0x2b19   :  { %8976 = vmatpush3.bf16.msra.mxu1 %v8973_v13  ;;  %v6817_v13 = vld [vmem:[%s10531_s5 + $0x2a8] sm:$0xff] }
0x2b1a   :  { %8733 = vmatprep.subr.mxu1 %v6517_v29 }
0x2b1c   :  { %8717 = vmatmul.mubr.msk.f32.vlgmr.msra.gmra.mrb[76].mxu1 %vm254_vm2, %v10226_v12 }
0x2b1d   :  { %8719 = vmatprep.mubr.msk.f32.mxu1 %vm254_vm2, %v10235_v51  ;;  %8734 = vmatpush3.msra.mxu1 %v6517_v29  ;;  %v6818_v29 = vld [vmem:[%s10531_s5 + $0x2b0] sm:$0xff] }
0x2b20   :  { %8720 = vmatmul.mubr.msk.f32.gmra.mrb[78].mxu1 %vm254_vm2, %v10244_v22 }
0x2b21   :  { %8735 = vmatprep.mubr.msk.f32.mxu1 %vm2470_vm12, %v5255_v9 }
0x2b24   :  { %8736 = vmatmul.mubr.msk.f32.vlgmr.msra.gmra.mrb[80].mxu1 %vm2470_vm12, %v5256_v24 }
0x2bef   :  { %v8718_v58 = vpop.f32.mrb[76].mxu1 }
0x2bf0   :  { %v6397_v59 = vadd.f32 1e-16, %v8718_v58  ;;  %v6391_v0 = vpop.f32.mrb[77].mxu1  ;;  %v8993_v58 = vpack.c.bf16 %v6818_v29, %v6817_v13 }
0x2bf1   :  { %v6392_v61 = vadd.f32 1e-16, %v6391_v0 }
0x2bf2   :  { %9235 = vrcp.f32 %v6397_v59  ;;  %8994 = vmatprep.subr.bf16.mxu1 %v8993_v58 }
0x2bf3   :  { %9237 = vrcp.f32 %v6392_v61  ;;  %v8721_v12 = vpop.f32.mrb[78].mxu1  ;;  %8996 = vmatpush3.bf16.msra.mxu1 %v8993_v58 }
0x2bf4   :  { %v6401_v51 = vpop.f32.mrb[79].mxu1  ;;  %v6407_v28 = vadd.f32 1e-16, %v8721_v12  ;;  %8997 = vmatprep.subr.bf16.mxu1 %v9283_v44 }
0x2bf5   :  { %v6402_v7 = vadd.f32 1e-16, %v6401_v51 }
0x2bf7   :  { %9239 = vrcp.f32 %v6402_v7  ;;  %v8737_v22 = vpop.f32.mrb[80].mxu1 }
0x2bf8   :  { %v6595_v17 = vpop.f32.mrb[81].mxu1  ;;  %9241 = vrcp.f32 %v6407_v28 }
0x2bfc   :  { %v9236_v2 = vpop.eup %9235 }
0x2bfd   :  { %v9238_v9 = vpop.eup %9237  ;;  %v6415_v30 = vmul.f32 %v9236_v2, %v9228_v39 }
0x2bfe   :  { %v6414_v4 = vmul.f32 %v9238_v9, %v9230_v40 }
0x2bff   :  { %6425 = vperm.xlu1 %9080, %v6415_v30   ;;  %v7837_v30 = vld [vmem:[%s10531_s5 + $0x2b8] ss:$0 sm:$0xff] }
0x2c00   :  { %6420 = vperm.xlu0 %9079, %v6414_v4  }
0x2c01   :  { %v9240_v24 = vpop.eup %9239 }
0x2c02   :  { %v6416_v63 = vmul.f32 %v9240_v24, %v9232_v49  ;;  %v9242_v8 = vpop.eup %9241 }
0x2c03   :  { %v6417_v62 = vmul.f32 %v9242_v8, %v9234_v5 }
0x2c04   :  { %6430 = vperm.xlu1 %9080, %v6416_v63  }
0x2c08   :  { %6435 = vperm.xlu1 %9080, %v6417_v62  }
0x2c0c   :  { %9081 = vset.pattern.permute.xlu1 %v9280_v34  ;;  %v6609_v34 = vld [vmem:[%s10531_s5 + $0x258] sm:$0xff] }
0x2c7e   :  { %v6426_v6 = vpop.permute.xlu1 %6425 }
0x2c7f   :  { %v6439_v31 = vmul.f32 %v6426_v6, %v5938_v21  ;;  %v6421_v15 = vpop.permute.xlu0 %6420  ;;  %v8985_v21 = vpack.c.bf16 %v6609_v34, %v6608_v33 }
0x2c80   :  { %v6438_v20 = vmul.f32 %v6421_v15, %v5937_v23 }
0x2c82   :  { %v8977_v25 = vpack.c.bf16 %v6439_v31, %v6438_v20 }
0x2c83   :  { %v6431_v43 = vpop.permute.xlu1 %6430 }
0x2c84   :  { %8978 = vmatprep.subr.bf16.mxu0 %v8977_v25  ;;  %v6440_v16 = vmul.f32 %v6431_v43, %v5939_v48  ;;  %v8989_v48 = vpack.c.bf16 %v6607_v47, %v6606_v14 }
0x2c85   :  { %8980 = vmatpush3.bf16.msra.mxu0 %v8977_v25 }
0x2c87   :  { %v6436_v3 = vpop.permute.xlu1 %6435 }
0x2c88   :  { %v6441_v53 = vmul.f32 %v6436_v3, %v5940_v1  ;;  %v6596_v1 = vadd.f32 %v7827_v26, %v6595_v17 }
0x2c8a   :  { %v8981_v23 = vpack.c.bf16 %v6441_v53, %v6440_v16  ;;  %v6604_v42 = vmax.f32 %v6596_v1, 0.0 }
0x2c8c   :  { %8982 = vmatprep.subr.bf16.mxu0 %v8981_v23 }
0x2c8d   :  { %8984 = vmatpush3.bf16.msra.mxu0 %v8981_v23 }
0x2c8e   :  { %8986 = vmatprep.subr.bf16.mxu0 %v8985_v21 }
0x2c90   :  { %8731 = vmatmul.mubr.msk.f32.vlgmr.msra.gmra.mrb[82].mxu0 %vm1183_vm11, %v9591_v60  ;;  %v6601_v60 = vadd.f32 %v8737_v22, %v7827_v26 }
0x2c91   :  { %8988 = vmatpush3.bf16.msra.mxu0 %v8985_v21 }
0x2c92   :  { %8990 = vmatprep.subr.bf16.mxu0 %v8989_v48  ;;  %v6605_v32 = vmax.f32 %v6601_v60, 0.0 }
0x2d63   :  { %v8732_v41 = vpop.f32.mrb[82].mxu0 }
0x2d64   :  { %v6508_v37 = vpop.f32.mrb[83].mxu0 }
0x2d65   :  { %8742 = vmatprep.mubr.msk.f32.mxu0 %vm254_vm2, %v6508_v37 }
0x2d66   :  { %8743 = vmatmul.mubr.msk.f32.vlgmr.msra.gmra.mrb[84].mxu0 %vm254_vm2, %v8732_v41 }
0x2d67   :  { %8749 = vmatprep.mubr.msk.f32.mxu0 %vm254_vm2, %v6604_v42  ;;  %8992 = vmatpush3.bf16.msra.mxu0 %v8989_v48 }
0x2d6e   :  { %8750 = vmatmul.mubr.msk.f32.vlgmr.msra.gmra.mrb[84].mxu0 %vm254_vm2, %v6605_v32 }
0x2d6f   :  { %8768 = vmatprep.mubr.msk.f32.mxu0 %vm3438_vm13, %v10403_v35 }
0x2e41   :  { %v8751_v55 = vpop.f32.mrb[84].mxu0 }
0x2e42   :  { %v6778_v57 = vadd.f32 %v8751_v55, %v7834_v36  ;;  %v6763_v38 = vpop.f32.mrb[85].mxu0 }
0x2e43   :  { %v6777_v11 = vadd.f32 %v7834_v36, %v6763_v38 }
0x2e44   :  { %v7836_v39 = vmul.f32 -1.442695, %v6778_v57 }
0x2e45   :  { %v7835_v40 = vmul.f32 -1.442695, %v6777_v11 }
0x2e46   :  { %9243 = vpow2.f32 %v7836_v39 }
0x2e47   :  { %9245 = vpow2.f32 %v7835_v40 }
0x2e50   :  { %v9244_v46 = vpop.eup %9243 }
0x2e51   :  { %v9246_v49 = vpop.eup %9245  ;;  %v6786_v54 = vadd.f32 1.0, %v9244_v46 }
0x2e52   :  { %v6785_v5 = vadd.f32 1.0, %v9246_v49 }
0x2e54   :  { %9247 = vrcp.f32 %v6785_v5 }
0x2e55   :  { %9249 = vrcp.f32 %v6786_v54  ;;  %v7175_v54 = vld [vmem:[%s10531_s5 + $0x2c8] sm:$0xff] }
0x2e5e   :  { %v9248_v56 = vpop.eup %9247 }
0x2e5f   :  { %6804 = vperm.xlu1 %9081, %v9248_v56   ;;  %6793 = vperm.xlu0 %9079, %v9248_v56   ;;  %v9250_v27 = vpop.eup %9249  ;;  %v7176_v56 = vld [vmem:[%s10531_s5 + $0x2d0] sm:$0xff] }
0x2e63   :  { %6808 = vperm.xlu1 %9081, %v9250_v27   ;;  %6798 = vperm.xlu0 %9079, %v9250_v27   ;;  %v9004_v27 = vpack.c.bf16 %v7176_v56, %v7175_v54 }
0x2e67   :  { %9082 = vset.pattern.permute.xlu1 %v9279_v50 }
0x2ede   :  { %v6805_v59 = vpop.permute.xlu1 %6804  ;;  %v6794_v0 = vpop.permute.xlu0 %6793 }
0x2edf   :  { %v6811_v61 = vmul.f32 %v6805_v59, %v6604_v42  ;;  %v6801_v12 = vmul.f32 %v6794_v0, %v6508_v37 }
0x2ee1   :  { %v10418_v51 = vadd.f32 %v6811_v61, %v6801_v12  ;;  %v7174_v61 = vld [vmem:[%s10531_s5 + $0x2c0] sm:$0xff] }
0x2ee2   :  { %v6809_v28 = vpop.permute.xlu1 %6808  ;;  %v6799_v7 = vpop.permute.xlu0 %6798 }
0x2ee3   :  { %v6815_v22 = vmax.f32 %v10418_v51, 0.0  ;;  %v6812_v17 = vmul.f32 %v6809_v28, %v6605_v32  ;;  %v6802_v2 = vmul.f32 %v8732_v41, %v6799_v7  ;;  %v7330_v7 = vld [vmem:[%s10531_s5 + $0x2e0] sm:$0xff] }
0x2ee5   :  { %v10421_v9 = vadd.f32 %v6812_v17, %v6802_v2  ;;  %8756 = vmatprep.mubr.msk.f32.mxu1 %vm254_vm2, %v6815_v22  ;;  %v7332_v17 = vld [vmem:[%s10531_s5 + $0x2f0] sm:$0xff]  ;;  %v7333_v2 = vld [vmem:[%s10531_s5 + $0x2f8] sm:$0xff] }
0x2ee7   :  { %v6816_v50 = vmax.f32 %v10421_v9, 0.0  ;;  %v9010_v9 = vpack.c.bf16 %v7333_v2, %v7332_v17 }
0x2ee9   :  { %8757 = vmatmul.mubr.msk.f32.vlgmr.msra.gmra.mrb[82].mxu1 %vm254_vm2, %v6816_v50 }
0x2eea   :  { %8763 = vmatprep.mubr.msk.f32.mxu1 %vm9284_vm3, %v9285_v45 }
0x2fbc   :  { %v8758_v4 = vpop.f32.mrb[82].mxu1 }
0x2fbd   :  { %v6902_v24 = vadd.f32 %v8758_v4, %v7837_v30  ;;  %v6896_v63 = vpop.f32.mrb[83].mxu1 }
0x2fbe   :  { %v6897_v8 = vadd.f32 %v7837_v30, %v6896_v63  ;;  %v7847_v30 = vld [vmem:[%s10531_s5 + $0x2d8] ss:$0 sm:$0xff] }
0x2fbf   :  { %6912 = vperm.xlu1 %9082, %v6902_v24  }
0x2fc0   :  { %6907 = vperm.xlu0 %9079, %v6897_v8  }
0x303e   :  { %v6913_v62 = vpop.permute.xlu1 %6912 }
0x303f   :  { %v6916_v6 = vsel %vm3425_vm14, %v6913_v62, -1e+30  ;;  %v6908_v31 = vpop.permute.xlu0 %6907  ;;  %v7413_v62 = vld [vmem:[%s10531_s5 + $0x308] sm:$0xff] }
0x3040   :  { %v6918_v15 = vsel %vm3438_vm13, %v6916_v6, -inf  ;;  %v6915_v20 = vsel %vm3424_vm15, %v6908_v31, -1e+30  ;;  %v7414_v6 = vld [vmem:[%s10531_s5 + $0x310] sm:$0xff] }
0x3041   :  { %v6917_v25 = vsel %vm3438_vm13, %v6915_v20, -inf  ;;  %v9013_v31 = vpack.c.bf16 %v7414_v6, %v7413_v62 }
0x3042   :  { %v6919_v43 = vmax.f32 %v6917_v25, %v6918_v15  ;;  %v7848_v15 = vld [vmem:[%s10531_s5 + $0x300] ss:$0 sm:$0xff] }
0x3044   :  { %v6920_v3 = vrot.slane %v6919_v43, 4 }
0x3046   :  { %v6921_v33 = vmax.f32 %v6919_v43, %v6920_v3 }
0x3048   :  { %v6922_v34 = vrot.slane %v6921_v33, 2 }
0x304a   :  { %v6923_v16 = vmax.f32 %v6921_v33, %v6922_v34  ;;  %v7494_v33 = vld [vmem:[%s10531_s5 + $0x320] sm:$0xff] }
0x304c   :  { %v6924_v53 = vrot.slane %v6923_v16, 1 }
0x304e   :  { %v6925_v23 = vmax.f32 %v6923_v16, %v6924_v53  ;;  %v7850_v16 = vld [vmem:[%s10531_s5 + $0x318] ss:$0 sm:$0xff] }
0x3050   :  { %v6927_v21 = vmul.f32 %v9276_v19, %v6925_v23  ;;  %v6926_v14 = vmul.f32 %v10403_v35, %v6925_v23 }
0x3052   :  { %v6931_v47 = vsel %vm3438_vm13, %v6927_v21, 0.0  ;;  %v6928_v18 = vsel %vm3438_vm13, %v6926_v14, 0.0 }
0x3053   :  { %6932 = vadd.xlane.f32.xlu1 %v6931_v47  ;;  %6929 = vadd.xlane.f32.xlu0 %v6928_v18 }
0x30e0   :  { %v6933_v48 = vpop.xlane.xlu1 %6932  ;;  %v6930_v26 = vpop.xlane.xlu0 %6929 }
0x30e1   :  { %v6935_v1 = vsub.f32 %v6902_v24, %v6933_v48  ;;  %v6934_v41 = vsub.f32 %v6897_v8, %v6930_v26 }
0x30e3   :  { %v6938_v37 = vmul.f32 1.442695, %v6935_v1  ;;  %v6936_v42 = vmul.f32 1.442695, %v6934_v41 }
0x30e5   :  { %9251 = vpow2.f32 %v6938_v37 }
0x30e6   :  { %9253 = vpow2.f32 %v6936_v42 }
0x30ef   :  { %v9252_v60 = vpop.eup %9251 }
0x30f0   :  { %v9254_v32 = vpop.eup %9253 }
0x30f1   :  { %v8998_v36 = vpack.c.bf16 %v9252_v60, %v9254_v32 }
0x30f3   :  { %8999 = vmatpush3.bf16.msra.mxu1 %v8998_v36 }
0x30f4   :  { %9000 = vmatprep.subr.bf16.mxu1 %v9283_v44 }
0x30f6   :  { %8764 = vmatmul.mubr.msk.f32.vlgmr.msra.gmra.mrb[84].mxu1 %vm254_vm2, %v9908_v52 }
0x30f7   :  { %8775 = vmatprep.mubr.msk.f32.mxu1 %vm9284_vm3, %v9285_v45 }
0x31c9   :  { %v7006_v35 = vpop.f32.mrb[84].mxu1 }
0x31ca   :  { %v8765_v55 = vpop.f32.mrb[85].mxu1  ;;  %8766 = vmatprep.subr.msk.mxu0 %vm3541_vm4, %v7006_v35 }
0x31cb   :  { %8767 = vmatpush3.msk.msra.mxu0 %vm3541_vm4, %v7006_v35 }
0x31cc   :  { %8769 = vmatmul.mubr.msk.f32.vlgmr.msra.gmra.mrb[86].mxu0 %vm3438_vm13, %v9276_v19  ;;  %9003 = vmatprep.subr.bf16.mxu0 %v9283_v44 }
0x31cd   :  { %8782 = vmatprep.mubr.msk.f32.mxu0 %vm9284_vm3, %v9285_v45  ;;  %9005 = vmatpush3.bf16.msra.mxu0 %v9004_v27 }
0x31ce   :  { %9006 = vmatprep.subr.bf16.mxu0 %v9283_v44 }
0x329f   :  { %v8770_v57 = vpop.f32.mrb[86].mxu0 }
0x32a0   :  { %v7085_v38 = vadd.f32 1e-16, %v8770_v57  ;;  %v7079_v11 = vpop.f32.mrb[87].mxu0 }
0x32a1   :  { %v7080_v39 = vadd.f32 1e-16, %v7079_v11 }
0x32a2   :  { %9255 = vrcp.f32 %v7085_v38 }
0x32a3   :  { %9257 = vrcp.f32 %v7080_v39 }
0x32ac   :  { %v9256_v40 = vpop.eup %9255 }
0x32ad   :  { %v9258_v46 = vpop.eup %9257  ;;  %v7091_v49 = vmul.f32 %v9256_v40, %v9252_v60 }
0x32ae   :  { %v7090_v5 = vmul.f32 %v9258_v46, %v9254_v32 }
0x32af   :  { %7099 = vperm.xlu1 %9082, %v7091_v49  }
0x32b0   :  { %7094 = vperm.xlu0 %9079, %v7090_v5  }
0x332e   :  { %v7100_v13 = vpop.permute.xlu1 %7099 }
0x332f   :  { %v7103_v29 = vmul.f32 %v7100_v13, %v6816_v50  ;;  %v7095_v58 = vpop.permute.xlu0 %7094 }
0x3330   :  { %v7102_v59 = vmul.f32 %v7095_v58, %v6815_v22 }
0x3332   :  { %v9001_v0 = vpack.c.bf16 %v7103_v29, %v7102_v59 }
0x3334   :  { %9002 = vmatpush3.bf16.msra.mxu1 %v9001_v0 }
0x3335   :  { %8785 = vmatprep.subr.mxu1 %v9285_v45 }
0x3337   :  { %8776 = vmatmul.mubr.msk.f32.vlgmr.msra.gmra.mrb[86].mxu1 %vm254_vm2, %v9908_v52 }
0x3338   :  { %8786 = vmatpush3.msra.mxu1 %v7174_v61  ;;  %8787 = vmatprep.mubr.msk.f32.mxu1 %vm9284_vm3, %v9285_v45 }
0x3339   :  { %9012 = vmatprep.subr.bf16.mxu1 %v9283_v44 }
0x333b   :  { %8788 = vmatmul.mubr.msk.f32.vlgmr.msra.gmra.mrb[88].mxu1 %vm2470_vm12, %v10012_v10  ;;  %v7331_v10 = vld [vmem:[%s10531_s5 + $0x2e8] sm:$0xff] }
0x333c   :  { %8805 = vmatprep.mubr.msk.f32.mxu1 %vm9284_vm3, %v9285_v45  ;;  %v9007_v22 = vpack.c.bf16 %v7331_v10, %v7330_v7  ;;  %9014 = vmatpush3.bf16.msra.mxu1 %v9013_v31 }
0x333d   :  { %9015 = vmatprep.subr.bf16.mxu1 %v9283_v44 }
0x340a   :  { %v7170_v12 = vpop.f32.mrb[86].mxu1 }
0x340b   :  { %v8777_v51 = vpop.f32.mrb[87].mxu1  ;;  %8783 = vmatmul.mubr.msk.f32.vlgmr.msra.gmra.mrb[88].mxu0 %vm254_vm2, %v7170_v12 }
0x340c   :  { %8798 = vmatprep.mubr.msk.f32.mxu0 %vm9284_vm3, %v9285_v45  ;;  %9008 = vmatpush3.bf16.msra.mxu0 %v9007_v22 }
0x340d   :  { %9009 = vmatprep.subr.bf16.mxu0 %v9283_v44  ;;  %v7495_v44 = vld [vmem:[%s10531_s5 + $0x328] sm:$0xff] }
0x340e   :  { %v7319_v52 = vpop.f32.mrb[88].mxu1  ;;  %v9016_v34 = vpack.c.bf16 %v7495_v44, %v7494_v33 }
0x340f   :  { %v8789_v28 = vpop.f32.mrb[89].mxu1 }
0x3410   :  { %9011 = vmatpush3.bf16.msra.mxu0 %v9010_v9 }
0x34de   :  { %v7246_v50 = vpop.f32.mrb[88].mxu0 }
0x34df   :  { %v7320_v4 = vadd.f32 %v7319_v52, %v7246_v50  ;;  %v8784_v24 = vpop.f32.mrb[89].mxu0 }
0x34e1   :  { %v7328_v63 = vadd.f32 %v7847_v30, %v7320_v4 }
0x34e3   :  { %v7329_v8 = vmax.f32 %v7328_v63, 0.0 }
0x34e5   :  { %8799 = vmatmul.mubr.msk.f32.vlgmr.msra.gmra.mrb[90].mxu0 %vm1183_vm11, %v7329_v8 }
0x35b8   :  { %v7408_v20 = vpop.f32.mrb[90].mxu0 }
0x35b9   :  { %v7409_v25 = vadd.f32 %v7848_v15, %v7408_v20  ;;  %v8800_v43 = vpop.f32.mrb[91].mxu0 }
0x35bb   :  { %v7412_v3 = vmax.f32 %v7409_v25, 0.0 }
0x35bd   :  { %8806 = vmatmul.mubr.msk.f32.vlgmr.msra.gmra.mrb[90].mxu1 %vm254_vm2, %v7412_v3 }
0x35be   :  { %8812 = vmatprep.mubr.msk.f32.mxu1 %vm9284_vm3, %v9285_v45  ;;  %9017 = vmatpush3.bf16.msra.mxu1 %v9016_v34  ;;  %v7852_v45 = vld [vmem:[%s10531_s5 + $0x330] ss:$0 sm:$0xff] }
0x3690   :  { %v7489_v53 = vpop.f32.mrb[90].mxu1 }
0x3691   :  { %v7490_v23 = vadd.f32 %v7850_v16, %v7489_v53  ;;  %v8807_v19 = vpop.f32.mrb[91].mxu1 }
0x3693   :  { %v7493_v21 = vmax.f32 %v7490_v23, 0.0 }
0x3695   :  { %8813 = vmatmul.mubr.msk.f32.vlgmr.msra.gmra.mrb[92].mxu1 %vm254_vm2, %v7493_v21 }
0x3768   :  { %v7570_v14 = vpop.f32.mrb[92].mxu1 }
0x3769   :  { %v7571_v47 = vadd.f32 %v7852_v45, %v7570_v14  ;;  %v8814_v18 = vpop.f32.mrb[93].mxu1 }
0x376b   :  { %7575 = vst.msk [vmem:[%s10537_s6] sm:$0x3] %vm7574_vm0, %v7571_v47 }

</bundles_post_ra>
